<compile_context>
chip_gen: v7x
topology: tpu7x:2x2x1
jax: 0.10.0
libtpu: 0.0.40
codegen_flags: <defaults>
</compile_context>

<pallas_src>
import math
import numpy as np
import jax
import jax.numpy as jnp
from jax.experimental import pallas as pl
from jax.experimental.pallas import tpu as pltpu

# ----- small, deterministic hyperparameters (optuna best_params surrogate) --
N_FEATURES = 15               # d_numerical -> SEQ = N_FEATURES + 1 tokens
D_TOKEN    = 32
N_HEADS    = 4
N_LAYERS   = 2
DIM_FFN    = 64
BATCH      = 2
SEQ        = N_FEATURES + 1
HEAD_DIM   = D_TOKEN // N_HEADS
LN_EPS     = 1e-5


# --------------------------- kernel helpers ---------------------------------
def _layer_norm(x, gamma, beta):
    mu = jnp.mean(x, axis=-1, keepdims=True)
    var = jnp.mean(jnp.square(x - mu), axis=-1, keepdims=True)
    return (x - mu) * jax.lax.rsqrt(var + LN_EPS) * gamma + beta


# --------------------------- fused Pallas kernel -----------------------------
def _fused_forward_kernel(x_ref, tok_w_ref, tok_b_ref, *rest):
    # rest = [12 refs per layer] * N_LAYERS + [cls_w, cls_b, out_ref]
    out_ref = rest[-1]
    cls_w_ref = rest[-3]
    cls_b_ref = rest[-2]
    layer_refs = rest[:-3]

    D = D_TOKEN
    scale = 1.0 / math.sqrt(HEAD_DIM)

    # ---------------- Tokenizer (cls column built in-kernel) ---------------
    xn = x_ref[...]                                                # (B, NF)
    xcat = jnp.concatenate(
        [jnp.ones((BATCH, 1), jnp.float32), xn], axis=1)           # (B, S)
    tokens = (tok_w_ref[...][None, :, :] * xcat[:, :, None]
              + tok_b_ref[...][None, :, :])                        # (B, S, D)
    # flatten batch into the matmul M dimension: (B*S, D)
    x = jnp.concatenate([tokens[b] for b in range(BATCH)], axis=0)

    # ---------------- Encoder layers (static unroll) ------------------------
    for l in range(N_LAYERS):
        (wqkv_ref, bqkv_ref, wo_ref, bo_ref, g1_ref, be1_ref,
         w1_ref, b1_ref, w2_ref, b2_ref, g2_ref, be2_ref) = \
            layer_refs[l * 12:(l + 1) * 12]

        # weight refs loaded exactly once per layer (hoisted)
        wqkv = wqkv_ref[...]          # (D, 3D)  (in, out)
        wo = wo_ref[...]              # (D, D)   (in, out)
        w1 = w1_ref[...]              # (D, F)   (in, out)
        w2 = w2_ref[...]              # (F, D)   (in, out)

        # ---- multi-head self-attention (whole batch in one matmul) --------
        qkv = jnp.dot(x, wqkv, preferred_element_type=jnp.float32) \
            + bqkv_ref[...]                                        # (B*S, 3D)

        attn_parts = []
        for b in range(BATCH):                    # static unroll over batch
            r0 = b * SEQ
            q_b = qkv[r0:r0 + SEQ, 0 * D:1 * D]
            k_b = qkv[r0:r0 + SEQ, 1 * D:2 * D]
            v_b = qkv[r0:r0 + SEQ, 2 * D:3 * D]
            acc = None
            for h in range(N_HEADS):              # static unroll over heads
                c0 = h * HEAD_DIM
                qh = q_b[:, c0:c0 + HEAD_DIM]
                kh = k_b[:, c0:c0 + HEAD_DIM]
                vh = v_b[:, c0:c0 + HEAD_DIM]
                s = jax.lax.dot_general(
                    qh, kh, (((1,), (1,)), ((), ())),
                    preferred_element_type=jnp.float32) * scale    # (S, S)
                s = s - jnp.max(s, axis=-1, keepdims=True)
                p = jnp.exp(s)
                p = p * pl.reciprocal(jnp.sum(p, axis=-1, keepdims=True),
                                      approx=True)
                oh = jnp.dot(p, vh,
                             preferred_element_type=jnp.float32)   # (S, dh)
                # accumulate output projection per head (no concat/shuffle)
                contrib = jnp.dot(oh, wo[c0:c0 + HEAD_DIM, :],
                                  preferred_element_type=jnp.float32)  # (S, D)
                acc = contrib if acc is None else acc + contrib
            attn_parts.append(acc)
        attn = jnp.concatenate(attn_parts, axis=0) + bo_ref[...]   # (B*S, D)

        # ---- residual + norm1 ---------------------------------------------
        h1 = _layer_norm(x + attn, g1_ref[...], be1_ref[...])

        # ---- feed-forward (relu) -------------------------------------------
        f = jnp.maximum(
            jnp.dot(h1, w1, preferred_element_type=jnp.float32) + b1_ref[...],
            0.0)
        f = jnp.dot(f, w2, preferred_element_type=jnp.float32) + b2_ref[...]

        # ---- residual + norm2 -----------------------------------------------
        x = _layer_norm(h1 + f, g2_ref[...], be2_ref[...])

    # ---------------- Classifier + sigmoid ----------------------------------
    cls_tok = jnp.concatenate(
        [x[b * SEQ:b * SEQ + 1, :] for b in range(BATCH)], axis=0)  # (B, D)
    logits = (jnp.sum(cls_tok * cls_w_ref[...], axis=-1, keepdims=True)
              + cls_b_ref[...])                                     # (B, 1)
    out_ref[...] = pl.reciprocal(1.0 + jnp.exp(-logits), approx=True)


# --------------------------- pallas_call wrapper ------------------------------
def _full_spec(shape):
    nd = len(shape)
    return pl.BlockSpec(shape, lambda i, _nd=nd: (0,) * _nd)


def transformer_forward(x_num, kparams):
    """Single fused pallas_call for the whole forward pass."""
    B = x_num.shape[0]
    weight_args = [kparams['tok_w'], kparams['tok_b']]
    for lp in kparams['layers']:
        weight_args += [lp['wqkv'], lp['bqkv'], lp['wo'], lp['bo'],
                        lp['g1'], lp['be1'], lp['w1'], lp['b1'],
                        lp['w2'], lp['b2'], lp['g2'], lp['be2']]
    weight_args += [kparams['cls_w'], kparams['cls_b']]

    out = pl.pallas_call(
        _fused_forward_kernel,
        out_shape=jax.ShapeDtypeStruct((B, 1), jnp.float32),
        grid=(1,),
        in_specs=[_full_spec(x_num.shape)] +
                 [_full_spec(a.shape) for a in weight_args],
        out_specs=_full_spec((B, 1)),
    )(x_num, *weight_args)
    return out[:, 0]                       # squeeze(1)


# --------------------------- parameter init ----------------------------------
def _uniform(key, shape, bound):
    return jax.random.uniform(key, shape, jnp.float32, -bound, bound)


def init_params(key):
    """PyTorch-layout parameters (nn.Linear convention: y = x @ W.T + b)."""
    keys = iter(jax.random.split(key, 64))
    p = {
        # kaiming_uniform(a=sqrt(5)) on (S, D) -> bound = 1/sqrt(fan_in=D)
        'tok_w': _uniform(next(keys), (SEQ, D_TOKEN), 1.0 / math.sqrt(D_TOKEN)),
        'tok_b': jnp.zeros((SEQ, D_TOKEN), jnp.float32),
        'layers': [],
    }
    for _ in range(N_LAYERS):
        lp = {
            'wqkv': _uniform(next(keys), (3 * D_TOKEN, D_TOKEN), 1.0 / math.sqrt(D_TOKEN)),
            'bqkv': jnp.zeros((1, 3 * D_TOKEN), jnp.float32),
            'wo':   _uniform(next(keys), (D_TOKEN, D_TOKEN), 1.0 / math.sqrt(D_TOKEN)),
            'bo':   jnp.zeros((1, D_TOKEN), jnp.float32),
            'g1':   jnp.ones((1, D_TOKEN), jnp.float32),
            'be1':  jnp.zeros((1, D_TOKEN), jnp.float32),
            'w1':   _uniform(next(keys), (DIM_FFN, D_TOKEN), 1.0 / math.sqrt(D_TOKEN)),
            'b1':   _uniform(next(keys), (1, DIM_FFN), 1.0 / math.sqrt(D_TOKEN)),
            'w2':   _uniform(next(keys), (D_TOKEN, DIM_FFN), 1.0 / math.sqrt(DIM_FFN)),
            'b2':   _uniform(next(keys), (1, D_TOKEN), 1.0 / math.sqrt(DIM_FFN)),
            'g2':   jnp.ones((1, D_TOKEN), jnp.float32),
            'be2':  jnp.zeros((1, D_TOKEN), jnp.float32),
        }
        p['layers'].append(lp)
    p['cls_w'] = _uniform(next(keys), (1, D_TOKEN), 1.0 / math.sqrt(D_TOKEN))
    p['cls_b'] = _uniform(next(keys), (1, 1), 1.0 / math.sqrt(D_TOKEN))
    return p


def prepare_kernel_params(params):
    """Pre-transpose linear weights ONCE on the host to (in, out) layout."""
    kp = {'tok_w': params['tok_w'], 'tok_b': params['tok_b'],
          'cls_w': params['cls_w'], 'cls_b': params['cls_b'], 'layers': []}
    for lp in params['layers']:
        kp['layers'].append({
            'wqkv': jnp.asarray(lp['wqkv'].T),   # (D, 3D)
            'bqkv': lp['bqkv'],
            'wo':   jnp.asarray(lp['wo'].T),     # (D, D)  (in, out)
            'bo':   lp['bo'],
            'g1':   lp['g1'], 'be1': lp['be1'],
            'w1':   jnp.asarray(lp['w1'].T),     # (D, F)
            'b1':   lp['b1'],
            'w2':   jnp.asarray(lp['w2'].T),     # (F, D)
            'b2':   lp['b2'],
            'g2':   lp['g2'], 'be2': lp['be2'],
        })
    return kp


# --------------------------- pure-JAX reference -------------------------------
def _ln_ref(x, g, b):
    mu = jnp.mean(x, axis=-1, keepdims=True)
    var = jnp.mean(jnp.square(x - mu), axis=-1, keepdims=True)
    return (x - mu) * jax.lax.rsqrt(var + LN_EPS) * g + b


def reference_forward(x_num, params):
    B = x_num.shape[0]
    xcat = jnp.concatenate([jnp.ones((B, 1), jnp.float32), x_num], axis=1)
    x = params['tok_w'][None] * xcat[:, :, None] + params['tok_b'][None]
    for lp in params['layers']:
        qkv = x @ lp['wqkv'].T + lp['bqkv'][0]
        q, k, v = jnp.split(qkv, 3, axis=-1)
        sh = lambda t: t.reshape(B, SEQ, N_HEADS, HEAD_DIM).transpose(0, 2, 1, 3)
        qh, kh, vh = sh(q), sh(k), sh(v)
        s = jnp.einsum('bhqd,bhkd->bhqk', qh, kh) / math.sqrt(HEAD_DIM)
        p = jax.nn.softmax(s, axis=-1)
        a = jnp.einsum('bhqk,bhkd->bhqd', p, vh).transpose(0, 2, 1, 3).reshape(B, SEQ, D_TOKEN)
        a = a @ lp['wo'].T + lp['bo'][0]
        x = _ln_ref(x + a, lp['g1'][0], lp['be1'][0])
        f = jnp.maximum(x @ lp['w1'].T + lp['b1'][0], 0.0)
        f = f @ lp['w2'].T + lp['b2'][0]
        x = _ln_ref(x + f, lp['g2'][0], lp['be2'][0])
    logits = x[:, 0, :] @ params['cls_w'].T + params['cls_b'][0]
    return jax.nn.sigmoid(logits)[:, 0]


# ------------------------------------ main ------------------------------------
if __name__ == "__main__":
    key = jax.random.PRNGKey(0)
    pkey, xkey = jax.random.split(key)
    params = init_params(pkey)
    kparams = prepare_kernel_params(params)
    x_num = jax.random.normal(xkey, (BATCH, N_FEATURES), jnp.float32)

    out = transformer_forward(x_num, kparams)
    out = jax.block_until_ready(out)

    ref = reference_forward(x_num, params)
    assert out.shape == (BATCH,)
    assert np.all(np.isfinite(np.asarray(out)))
    assert np.allclose(np.asarray(out), np.asarray(ref), atol=1e-2, rtol=1e-2), \
        f"mismatch: {out} vs {ref}"
    print("KERNEL_OK")
</pallas_src>

<mosaic_0001>
module attributes {stable_mosaic.version = 11 : i64} {
  func.func @_fused_forward_kernel(%arg0: i32, %arg1: memref<2x15xf32, #tpu.memory_space<vmem>>, %arg2: memref<16x32xf32, #tpu.memory_space<vmem>>, %arg3: memref<16x32xf32, #tpu.memory_space<vmem>>, %arg4: memref<32x96xf32, #tpu.memory_space<vmem>>, %arg5: memref<1x96xf32, #tpu.memory_space<vmem>>, %arg6: memref<32x32xf32, #tpu.memory_space<vmem>>, %arg7: memref<1x32xf32, #tpu.memory_space<vmem>>, %arg8: memref<1x32xf32, #tpu.memory_space<vmem>>, %arg9: memref<1x32xf32, #tpu.memory_space<vmem>>, %arg10: memref<32x64xf32, #tpu.memory_space<vmem>>, %arg11: memref<1x64xf32, #tpu.memory_space<vmem>>, %arg12: memref<64x32xf32, #tpu.memory_space<vmem>>, %arg13: memref<1x32xf32, #tpu.memory_space<vmem>>, %arg14: memref<1x32xf32, #tpu.memory_space<vmem>>, %arg15: memref<1x32xf32, #tpu.memory_space<vmem>>, %arg16: memref<32x96xf32, #tpu.memory_space<vmem>>, %arg17: memref<1x96xf32, #tpu.memory_space<vmem>>, %arg18: memref<32x32xf32, #tpu.memory_space<vmem>>, %arg19: memref<1x32xf32, #tpu.memory_space<vmem>>, %arg20: memref<1x32xf32, #tpu.memory_space<vmem>>, %arg21: memref<1x32xf32, #tpu.memory_space<vmem>>, %arg22: memref<32x64xf32, #tpu.memory_space<vmem>>, %arg23: memref<1x64xf32, #tpu.memory_space<vmem>>, %arg24: memref<64x32xf32, #tpu.memory_space<vmem>>, %arg25: memref<1x32xf32, #tpu.memory_space<vmem>>, %arg26: memref<1x32xf32, #tpu.memory_space<vmem>>, %arg27: memref<1x32xf32, #tpu.memory_space<vmem>>, %arg28: memref<1x32xf32, #tpu.memory_space<vmem>>, %arg29: memref<1x1xf32, #tpu.memory_space<vmem>>, %arg30: memref<2x1xf32, #tpu.memory_space<vmem>>) attributes {dimension_semantics = [#tpu.dimension_semantics<arbitrary>], iteration_bounds = array<i64: 1>, scalar_prefetch = 0 : i64, scratch_operands = 0 : i64, tpu.core_type = #tpu.core_type<tc>, window_params = [{pipeline_mode = #tpu.pipeline_mode<synchronous>, transform_indices = @transform_0, window_bounds = array<i64: 2, 15>}, {pipeline_mode = #tpu.pipeline_mode<synchronous>, transform_indices = @transform_1, window_bounds = array<i64: 16, 32>}, {pipeline_mode = #tpu.pipeline_mode<synchronous>, transform_indices = @transform_2, window_bounds = array<i64: 16, 32>}, {pipeline_mode = #tpu.pipeline_mode<synchronous>, transform_indices = @transform_3, window_bounds = array<i64: 32, 96>}, {pipeline_mode = #tpu.pipeline_mode<synchronous>, transform_indices = @transform_4, window_bounds = array<i64: 1, 96>}, {pipeline_mode = #tpu.pipeline_mode<synchronous>, transform_indices = @transform_5, window_bounds = array<i64: 32, 32>}, {pipeline_mode = #tpu.pipeline_mode<synchronous>, transform_indices = @transform_6, window_bounds = array<i64: 1, 32>}, {pipeline_mode = #tpu.pipeline_mode<synchronous>, transform_indices = @transform_7, window_bounds = array<i64: 1, 32>}, {pipeline_mode = #tpu.pipeline_mode<synchronous>, transform_indices = @transform_8, window_bounds = array<i64: 1, 32>}, {pipeline_mode = #tpu.pipeline_mode<synchronous>, transform_indices = @transform_9, window_bounds = array<i64: 32, 64>}, {pipeline_mode = #tpu.pipeline_mode<synchronous>, transform_indices = @transform_10, window_bounds = array<i64: 1, 64>}, {pipeline_mode = #tpu.pipeline_mode<synchronous>, transform_indices = @transform_11, window_bounds = array<i64: 64, 32>}, {pipeline_mode = #tpu.pipeline_mode<synchronous>, transform_indices = @transform_12, window_bounds = array<i64: 1, 32>}, {pipeline_mode = #tpu.pipeline_mode<synchronous>, transform_indices = @transform_13, window_bounds = array<i64: 1, 32>}, {pipeline_mode = #tpu.pipeline_mode<synchronous>, transform_indices = @transform_14, window_bounds = array<i64: 1, 32>}, {pipeline_mode = #tpu.pipeline_mode<synchronous>, transform_indices = @transform_15, window_bounds = array<i64: 32, 96>}, {pipeline_mode = #tpu.pipeline_mode<synchronous>, transform_indices = @transform_16, window_bounds = array<i64: 1, 96>}, {pipeline_mode = #tpu.pipeline_mode<synchronous>, transform_indices = @transform_17, window_bounds = array<i64: 32, 32>}, {pipeline_mode = #tpu.pipeline_mode<synchronous>, transform_indices = @transform_18, window_bounds = array<i64: 1, 32>}, {pipeline_mode = #tpu.pipeline_mode<synchronous>, transform_indices = @transform_19, window_bounds = array<i64: 1, 32>}, {pipeline_mode = #tpu.pipeline_mode<synchronous>, transform_indices = @transform_20, window_bounds = array<i64: 1, 32>}, {pipeline_mode = #tpu.pipeline_mode<synchronous>, transform_indices = @transform_21, window_bounds = array<i64: 32, 64>}, {pipeline_mode = #tpu.pipeline_mode<synchronous>, transform_indices = @transform_22, window_bounds = array<i64: 1, 64>}, {pipeline_mode = #tpu.pipeline_mode<synchronous>, transform_indices = @transform_23, window_bounds = array<i64: 64, 32>}, {pipeline_mode = #tpu.pipeline_mode<synchronous>, transform_indices = @transform_24, window_bounds = array<i64: 1, 32>}, {pipeline_mode = #tpu.pipeline_mode<synchronous>, transform_indices = @transform_25, window_bounds = array<i64: 1, 32>}, {pipeline_mode = #tpu.pipeline_mode<synchronous>, transform_indices = @transform_26, window_bounds = array<i64: 1, 32>}, {pipeline_mode = #tpu.pipeline_mode<synchronous>, transform_indices = @transform_27, window_bounds = array<i64: 1, 32>}, {pipeline_mode = #tpu.pipeline_mode<synchronous>, transform_indices = @transform_28, window_bounds = array<i64: 1, 1>}, {pipeline_mode = #tpu.pipeline_mode<synchronous>, transform_indices = @transform_29, window_bounds = array<i64: 2, 1>}]} {
    %c0 = arith.constant 0 : index
    %c0_0 = arith.constant 0 : index
    %0 = vector.load %arg1[%c0, %c0_0] : memref<2x15xf32, #tpu.memory_space<vmem>>, vector<2x15xf32>
    %cst = arith.constant 1.000000e+00 : f32
    %1 = vector.broadcast %cst : f32 to vector<2x1xf32>
    %2 = tpu.concatenate %1, %0 in 1 : vector<2x1xf32>, vector<2x15xf32> -> vector<2x16xf32>
    %c0_1 = arith.constant 0 : index
    %c0_2 = arith.constant 0 : index
    %3 = vector.load %arg2[%c0_1, %c0_2] : memref<16x32xf32, #tpu.memory_space<vmem>>, vector<16x32xf32>
    %4 = vector.shape_cast %3 : vector<16x32xf32> to vector<1x16x32xf32>
    %5 = vector.shape_cast %2 : vector<2x16xf32> to vector<2x16x1xf32>
    %6 = vector.broadcast %4 : vector<1x16x32xf32> to vector<2x16x32xf32>
    %7 = vector.broadcast %5 : vector<2x16x1xf32> to vector<2x16x32xf32>
    %8 = arith.mulf %6, %7 : vector<2x16x32xf32>
    %c0_3 = arith.constant 0 : index
    %c0_4 = arith.constant 0 : index
    %9 = vector.load %arg3[%c0_3, %c0_4] : memref<16x32xf32, #tpu.memory_space<vmem>>, vector<16x32xf32>
    %10 = vector.shape_cast %9 : vector<16x32xf32> to vector<1x16x32xf32>
    %11 = vector.broadcast %10 : vector<1x16x32xf32> to vector<2x16x32xf32>
    %12 = arith.addf %8, %11 : vector<2x16x32xf32>
    %13 = vector.extract_strided_slice %12 {offsets = [0, 0, 0], sizes = [1, 16, 32], strides = [1, 1, 1]} : vector<2x16x32xf32> to vector<1x16x32xf32>
    %14 = vector.shape_cast %13 : vector<1x16x32xf32> to vector<16x32xf32>
    %15 = vector.extract_strided_slice %12 {offsets = [1, 0, 0], sizes = [1, 16, 32], strides = [1, 1, 1]} : vector<2x16x32xf32> to vector<1x16x32xf32>
    %16 = vector.shape_cast %15 : vector<1x16x32xf32> to vector<16x32xf32>
    %17 = tpu.concatenate %14, %16 in 0 : vector<16x32xf32>, vector<16x32xf32> -> vector<32x32xf32>
    %c0_5 = arith.constant 0 : index
    %c0_6 = arith.constant 0 : index
    %18 = vector.load %arg4[%c0_5, %c0_6] : memref<32x96xf32, #tpu.memory_space<vmem>>, vector<32x96xf32>
    %c0_7 = arith.constant 0 : index
    %c0_8 = arith.constant 0 : index
    %19 = vector.load %arg6[%c0_7, %c0_8] : memref<32x32xf32, #tpu.memory_space<vmem>>, vector<32x32xf32>
    %c0_9 = arith.constant 0 : index
    %c0_10 = arith.constant 0 : index
    %20 = vector.load %arg10[%c0_9, %c0_10] : memref<32x64xf32, #tpu.memory_space<vmem>>, vector<32x64xf32>
    %c0_11 = arith.constant 0 : index
    %c0_12 = arith.constant 0 : index
    %21 = vector.load %arg12[%c0_11, %c0_12] : memref<64x32xf32, #tpu.memory_space<vmem>>, vector<64x32xf32>
    %cst_13 = arith.constant dense<0.000000e+00> : vector<32x96xf32>
    %22 = tpu.matmul %17, %18, %cst_13 {dimension_numbers = #tpu.dot_dimension_numbers<[1], [0], [0], [1], [0, 0, 1, 1], [], []>} : vector<32x32xf32>, vector<32x96xf32>, vector<32x96xf32> -> vector<32x96xf32>
    %c0_14 = arith.constant 0 : index
    %c0_15 = arith.constant 0 : index
    %23 = vector.load %arg5[%c0_14, %c0_15] : memref<1x96xf32, #tpu.memory_space<vmem>>, vector<1x96xf32>
    %24 = vector.broadcast %23 : vector<1x96xf32> to vector<32x96xf32>
    %25 = arith.addf %22, %24 : vector<32x96xf32>
    %26 = vector.extract_strided_slice %25 {offsets = [0, 0], sizes = [16, 32], strides = [1, 1]} : vector<32x96xf32> to vector<16x32xf32>
    %27 = vector.extract_strided_slice %25 {offsets = [0, 32], sizes = [16, 32], strides = [1, 1]} : vector<32x96xf32> to vector<16x32xf32>
    %28 = vector.extract_strided_slice %25 {offsets = [0, 64], sizes = [16, 32], strides = [1, 1]} : vector<32x96xf32> to vector<16x32xf32>
    %29 = vector.extract_strided_slice %26 {offsets = [0, 0], sizes = [16, 8], strides = [1, 1]} : vector<16x32xf32> to vector<16x8xf32>
    %30 = vector.extract_strided_slice %27 {offsets = [0, 0], sizes = [16, 8], strides = [1, 1]} : vector<16x32xf32> to vector<16x8xf32>
    %31 = vector.extract_strided_slice %28 {offsets = [0, 0], sizes = [16, 8], strides = [1, 1]} : vector<16x32xf32> to vector<16x8xf32>
    %cst_16 = arith.constant dense<0.000000e+00> : vector<16x16xf32>
    %32 = tpu.matmul %29, %30, %cst_16 {dimension_numbers = #tpu.dot_dimension_numbers<[1], [1], [0], [0], [0, 0, 1, 0], [], []>} : vector<16x8xf32>, vector<16x8xf32>, vector<16x16xf32> -> vector<16x16xf32>
    %cst_17 = arith.constant 0.353553385 : f32
    %33 = vector.broadcast %cst_17 : f32 to vector<16x16xf32>
    %34 = arith.mulf %32, %33 : vector<16x16xf32>
    %cst_18 = arith.constant dense<0xFF800000> : vector<16xf32>
    %35 = vector.multi_reduction <maximumf>, %34, %cst_18 [1] : vector<16x16xf32> to vector<16xf32>
    %36 = vector.shape_cast %35 : vector<16xf32> to vector<16x1xf32>
    %37 = vector.broadcast %36 : vector<16x1xf32> to vector<16x16xf32>
    %38 = arith.subf %34, %37 : vector<16x16xf32>
    %39 = math.exp %38 : vector<16x16xf32>
    %cst_19 = arith.constant dense<0.000000e+00> : vector<16xf32>
    %40 = vector.multi_reduction <add>, %39, %cst_19 [1] : vector<16x16xf32> to vector<16xf32>
    %41 = vector.shape_cast %40 : vector<16xf32> to vector<16x1xf32>
    %42 = tpu.reciprocal %41 {approx = true} : vector<16x1xf32> -> vector<16x1xf32>
    %43 = vector.broadcast %42 : vector<16x1xf32> to vector<16x16xf32>
    %44 = arith.mulf %39, %43 : vector<16x16xf32>
    %cst_20 = arith.constant dense<0.000000e+00> : vector<16x8xf32>
    %45 = tpu.matmul %44, %31, %cst_20 {dimension_numbers = #tpu.dot_dimension_numbers<[1], [0], [0], [1], [0, 0, 1, 1], [], []>} : vector<16x16xf32>, vector<16x8xf32>, vector<16x8xf32> -> vector<16x8xf32>
    %46 = vector.extract_strided_slice %19 {offsets = [0, 0], sizes = [8, 32], strides = [1, 1]} : vector<32x32xf32> to vector<8x32xf32>
    %cst_21 = arith.constant dense<0.000000e+00> : vector<16x32xf32>
    %47 = tpu.matmul %45, %46, %cst_21 {dimension_numbers = #tpu.dot_dimension_numbers<[1], [0], [0], [1], [0, 0, 1, 1], [], []>} : vector<16x8xf32>, vector<8x32xf32>, vector<16x32xf32> -> vector<16x32xf32>
    %48 = vector.extract_strided_slice %26 {offsets = [0, 8], sizes = [16, 8], strides = [1, 1]} : vector<16x32xf32> to vector<16x8xf32>
    %49 = vector.extract_strided_slice %27 {offsets = [0, 8], sizes = [16, 8], strides = [1, 1]} : vector<16x32xf32> to vector<16x8xf32>
    %50 = vector.extract_strided_slice %28 {offsets = [0, 8], sizes = [16, 8], strides = [1, 1]} : vector<16x32xf32> to vector<16x8xf32>
    %cst_22 = arith.constant dense<0.000000e+00> : vector<16x16xf32>
    %51 = tpu.matmul %48, %49, %cst_22 {dimension_numbers = #tpu.dot_dimension_numbers<[1], [1], [0], [0], [0, 0, 1, 0], [], []>} : vector<16x8xf32>, vector<16x8xf32>, vector<16x16xf32> -> vector<16x16xf32>
    %cst_23 = arith.constant 0.353553385 : f32
    %52 = vector.broadcast %cst_23 : f32 to vector<16x16xf32>
    %53 = arith.mulf %51, %52 : vector<16x16xf32>
    %cst_24 = arith.constant dense<0xFF800000> : vector<16xf32>
    %54 = vector.multi_reduction <maximumf>, %53, %cst_24 [1] : vector<16x16xf32> to vector<16xf32>
    %55 = vector.shape_cast %54 : vector<16xf32> to vector<16x1xf32>
    %56 = vector.broadcast %55 : vector<16x1xf32> to vector<16x16xf32>
    %57 = arith.subf %53, %56 : vector<16x16xf32>
    %58 = math.exp %57 : vector<16x16xf32>
    %cst_25 = arith.constant dense<0.000000e+00> : vector<16xf32>
    %59 = vector.multi_reduction <add>, %58, %cst_25 [1] : vector<16x16xf32> to vector<16xf32>
    %60 = vector.shape_cast %59 : vector<16xf32> to vector<16x1xf32>
    %61 = tpu.reciprocal %60 {approx = true} : vector<16x1xf32> -> vector<16x1xf32>
    %62 = vector.broadcast %61 : vector<16x1xf32> to vector<16x16xf32>
    %63 = arith.mulf %58, %62 : vector<16x16xf32>
    %cst_26 = arith.constant dense<0.000000e+00> : vector<16x8xf32>
    %64 = tpu.matmul %63, %50, %cst_26 {dimension_numbers = #tpu.dot_dimension_numbers<[1], [0], [0], [1], [0, 0, 1, 1], [], []>} : vector<16x16xf32>, vector<16x8xf32>, vector<16x8xf32> -> vector<16x8xf32>
    %65 = vector.extract_strided_slice %19 {offsets = [8, 0], sizes = [8, 32], strides = [1, 1]} : vector<32x32xf32> to vector<8x32xf32>
    %cst_27 = arith.constant dense<0.000000e+00> : vector<16x32xf32>
    %66 = tpu.matmul %64, %65, %cst_27 {dimension_numbers = #tpu.dot_dimension_numbers<[1], [0], [0], [1], [0, 0, 1, 1], [], []>} : vector<16x8xf32>, vector<8x32xf32>, vector<16x32xf32> -> vector<16x32xf32>
    %67 = arith.addf %47, %66 : vector<16x32xf32>
    %68 = vector.extract_strided_slice %26 {offsets = [0, 16], sizes = [16, 8], strides = [1, 1]} : vector<16x32xf32> to vector<16x8xf32>
    %69 = vector.extract_strided_slice %27 {offsets = [0, 16], sizes = [16, 8], strides = [1, 1]} : vector<16x32xf32> to vector<16x8xf32>
    %70 = vector.extract_strided_slice %28 {offsets = [0, 16], sizes = [16, 8], strides = [1, 1]} : vector<16x32xf32> to vector<16x8xf32>
    %cst_28 = arith.constant dense<0.000000e+00> : vector<16x16xf32>
    %71 = tpu.matmul %68, %69, %cst_28 {dimension_numbers = #tpu.dot_dimension_numbers<[1], [1], [0], [0], [0, 0, 1, 0], [], []>} : vector<16x8xf32>, vector<16x8xf32>, vector<16x16xf32> -> vector<16x16xf32>
    %cst_29 = arith.constant 0.353553385 : f32
    %72 = vector.broadcast %cst_29 : f32 to vector<16x16xf32>
    %73 = arith.mulf %71, %72 : vector<16x16xf32>
    %cst_30 = arith.constant dense<0xFF800000> : vector<16xf32>
    %74 = vector.multi_reduction <maximumf>, %73, %cst_30 [1] : vector<16x16xf32> to vector<16xf32>
    %75 = vector.shape_cast %74 : vector<16xf32> to vector<16x1xf32>
    %76 = vector.broadcast %75 : vector<16x1xf32> to vector<16x16xf32>
    %77 = arith.subf %73, %76 : vector<16x16xf32>
    %78 = math.exp %77 : vector<16x16xf32>
    %cst_31 = arith.constant dense<0.000000e+00> : vector<16xf32>
    %79 = vector.multi_reduction <add>, %78, %cst_31 [1] : vector<16x16xf32> to vector<16xf32>
    %80 = vector.shape_cast %79 : vector<16xf32> to vector<16x1xf32>
    %81 = tpu.reciprocal %80 {approx = true} : vector<16x1xf32> -> vector<16x1xf32>
    %82 = vector.broadcast %81 : vector<16x1xf32> to vector<16x16xf32>
    %83 = arith.mulf %78, %82 : vector<16x16xf32>
    %cst_32 = arith.constant dense<0.000000e+00> : vector<16x8xf32>
    %84 = tpu.matmul %83, %70, %cst_32 {dimension_numbers = #tpu.dot_dimension_numbers<[1], [0], [0], [1], [0, 0, 1, 1], [], []>} : vector<16x16xf32>, vector<16x8xf32>, vector<16x8xf32> -> vector<16x8xf32>
    %85 = vector.extract_strided_slice %19 {offsets = [16, 0], sizes = [8, 32], strides = [1, 1]} : vector<32x32xf32> to vector<8x32xf32>
    %cst_33 = arith.constant dense<0.000000e+00> : vector<16x32xf32>
    %86 = tpu.matmul %84, %85, %cst_33 {dimension_numbers = #tpu.dot_dimension_numbers<[1], [0], [0], [1], [0, 0, 1, 1], [], []>} : vector<16x8xf32>, vector<8x32xf32>, vector<16x32xf32> -> vector<16x32xf32>
    %87 = arith.addf %67, %86 : vector<16x32xf32>
    %88 = vector.extract_strided_slice %26 {offsets = [0, 24], sizes = [16, 8], strides = [1, 1]} : vector<16x32xf32> to vector<16x8xf32>
    %89 = vector.extract_strided_slice %27 {offsets = [0, 24], sizes = [16, 8], strides = [1, 1]} : vector<16x32xf32> to vector<16x8xf32>
    %90 = vector.extract_strided_slice %28 {offsets = [0, 24], sizes = [16, 8], strides = [1, 1]} : vector<16x32xf32> to vector<16x8xf32>
    %cst_34 = arith.constant dense<0.000000e+00> : vector<16x16xf32>
    %91 = tpu.matmul %88, %89, %cst_34 {dimension_numbers = #tpu.dot_dimension_numbers<[1], [1], [0], [0], [0, 0, 1, 0], [], []>} : vector<16x8xf32>, vector<16x8xf32>, vector<16x16xf32> -> vector<16x16xf32>
    %cst_35 = arith.constant 0.353553385 : f32
    %92 = vector.broadcast %cst_35 : f32 to vector<16x16xf32>
    %93 = arith.mulf %91, %92 : vector<16x16xf32>
    %cst_36 = arith.constant dense<0xFF800000> : vector<16xf32>
    %94 = vector.multi_reduction <maximumf>, %93, %cst_36 [1] : vector<16x16xf32> to vector<16xf32>
    %95 = vector.shape_cast %94 : vector<16xf32> to vector<16x1xf32>
    %96 = vector.broadcast %95 : vector<16x1xf32> to vector<16x16xf32>
    %97 = arith.subf %93, %96 : vector<16x16xf32>
    %98 = math.exp %97 : vector<16x16xf32>
    %cst_37 = arith.constant dense<0.000000e+00> : vector<16xf32>
    %99 = vector.multi_reduction <add>, %98, %cst_37 [1] : vector<16x16xf32> to vector<16xf32>
    %100 = vector.shape_cast %99 : vector<16xf32> to vector<16x1xf32>
    %101 = tpu.reciprocal %100 {approx = true} : vector<16x1xf32> -> vector<16x1xf32>
    %102 = vector.broadcast %101 : vector<16x1xf32> to vector<16x16xf32>
    %103 = arith.mulf %98, %102 : vector<16x16xf32>
    %cst_38 = arith.constant dense<0.000000e+00> : vector<16x8xf32>
    %104 = tpu.matmul %103, %90, %cst_38 {dimension_numbers = #tpu.dot_dimension_numbers<[1], [0], [0], [1], [0, 0, 1, 1], [], []>} : vector<16x16xf32>, vector<16x8xf32>, vector<16x8xf32> -> vector<16x8xf32>
    %105 = vector.extract_strided_slice %19 {offsets = [24, 0], sizes = [8, 32], strides = [1, 1]} : vector<32x32xf32> to vector<8x32xf32>
    %cst_39 = arith.constant dense<0.000000e+00> : vector<16x32xf32>
    %106 = tpu.matmul %104, %105, %cst_39 {dimension_numbers = #tpu.dot_dimension_numbers<[1], [0], [0], [1], [0, 0, 1, 1], [], []>} : vector<16x8xf32>, vector<8x32xf32>, vector<16x32xf32> -> vector<16x32xf32>
    %107 = arith.addf %87, %106 : vector<16x32xf32>
    %108 = vector.extract_strided_slice %25 {offsets = [16, 0], sizes = [16, 32], strides = [1, 1]} : vector<32x96xf32> to vector<16x32xf32>
    %109 = vector.extract_strided_slice %25 {offsets = [16, 32], sizes = [16, 32], strides = [1, 1]} : vector<32x96xf32> to vector<16x32xf32>
    %110 = vector.extract_strided_slice %25 {offsets = [16, 64], sizes = [16, 32], strides = [1, 1]} : vector<32x96xf32> to vector<16x32xf32>
    %111 = vector.extract_strided_slice %108 {offsets = [0, 0], sizes = [16, 8], strides = [1, 1]} : vector<16x32xf32> to vector<16x8xf32>
    %112 = vector.extract_strided_slice %109 {offsets = [0, 0], sizes = [16, 8], strides = [1, 1]} : vector<16x32xf32> to vector<16x8xf32>
    %113 = vector.extract_strided_slice %110 {offsets = [0, 0], sizes = [16, 8], strides = [1, 1]} : vector<16x32xf32> to vector<16x8xf32>
    %cst_40 = arith.constant dense<0.000000e+00> : vector<16x16xf32>
    %114 = tpu.matmul %111, %112, %cst_40 {dimension_numbers = #tpu.dot_dimension_numbers<[1], [1], [0], [0], [0, 0, 1, 0], [], []>} : vector<16x8xf32>, vector<16x8xf32>, vector<16x16xf32> -> vector<16x16xf32>
    %cst_41 = arith.constant 0.353553385 : f32
    %115 = vector.broadcast %cst_41 : f32 to vector<16x16xf32>
    %116 = arith.mulf %114, %115 : vector<16x16xf32>
    %cst_42 = arith.constant dense<0xFF800000> : vector<16xf32>
    %117 = vector.multi_reduction <maximumf>, %116, %cst_42 [1] : vector<16x16xf32> to vector<16xf32>
    %118 = vector.shape_cast %117 : vector<16xf32> to vector<16x1xf32>
    %119 = vector.broadcast %118 : vector<16x1xf32> to vector<16x16xf32>
    %120 = arith.subf %116, %119 : vector<16x16xf32>
    %121 = math.exp %120 : vector<16x16xf32>
    %cst_43 = arith.constant dense<0.000000e+00> : vector<16xf32>
    %122 = vector.multi_reduction <add>, %121, %cst_43 [1] : vector<16x16xf32> to vector<16xf32>
    %123 = vector.shape_cast %122 : vector<16xf32> to vector<16x1xf32>
    %124 = tpu.reciprocal %123 {approx = true} : vector<16x1xf32> -> vector<16x1xf32>
    %125 = vector.broadcast %124 : vector<16x1xf32> to vector<16x16xf32>
    %126 = arith.mulf %121, %125 : vector<16x16xf32>
    %cst_44 = arith.constant dense<0.000000e+00> : vector<16x8xf32>
    %127 = tpu.matmul %126, %113, %cst_44 {dimension_numbers = #tpu.dot_dimension_numbers<[1], [0], [0], [1], [0, 0, 1, 1], [], []>} : vector<16x16xf32>, vector<16x8xf32>, vector<16x8xf32> -> vector<16x8xf32>
    %128 = vector.extract_strided_slice %19 {offsets = [0, 0], sizes = [8, 32], strides = [1, 1]} : vector<32x32xf32> to vector<8x32xf32>
    %cst_45 = arith.constant dense<0.000000e+00> : vector<16x32xf32>
    %129 = tpu.matmul %127, %128, %cst_45 {dimension_numbers = #tpu.dot_dimension_numbers<[1], [0], [0], [1], [0, 0, 1, 1], [], []>} : vector<16x8xf32>, vector<8x32xf32>, vector<16x32xf32> -> vector<16x32xf32>
    %130 = vector.extract_strided_slice %108 {offsets = [0, 8], sizes = [16, 8], strides = [1, 1]} : vector<16x32xf32> to vector<16x8xf32>
    %131 = vector.extract_strided_slice %109 {offsets = [0, 8], sizes = [16, 8], strides = [1, 1]} : vector<16x32xf32> to vector<16x8xf32>
    %132 = vector.extract_strided_slice %110 {offsets = [0, 8], sizes = [16, 8], strides = [1, 1]} : vector<16x32xf32> to vector<16x8xf32>
    %cst_46 = arith.constant dense<0.000000e+00> : vector<16x16xf32>
    %133 = tpu.matmul %130, %131, %cst_46 {dimension_numbers = #tpu.dot_dimension_numbers<[1], [1], [0], [0], [0, 0, 1, 0], [], []>} : vector<16x8xf32>, vector<16x8xf32>, vector<16x16xf32> -> vector<16x16xf32>
    %cst_47 = arith.constant 0.353553385 : f32
    %134 = vector.broadcast %cst_47 : f32 to vector<16x16xf32>
    %135 = arith.mulf %133, %134 : vector<16x16xf32>
    %cst_48 = arith.constant dense<0xFF800000> : vector<16xf32>
    %136 = vector.multi_reduction <maximumf>, %135, %cst_48 [1] : vector<16x16xf32> to vector<16xf32>
    %137 = vector.shape_cast %136 : vector<16xf32> to vector<16x1xf32>
    %138 = vector.broadcast %137 : vector<16x1xf32> to vector<16x16xf32>
    %139 = arith.subf %135, %138 : vector<16x16xf32>
    %140 = math.exp %139 : vector<16x16xf32>
    %cst_49 = arith.constant dense<0.000000e+00> : vector<16xf32>
    %141 = vector.multi_reduction <add>, %140, %cst_49 [1] : vector<16x16xf32> to vector<16xf32>
    %142 = vector.shape_cast %141 : vector<16xf32> to vector<16x1xf32>
    %143 = tpu.reciprocal %142 {approx = true} : vector<16x1xf32> -> vector<16x1xf32>
    %144 = vector.broadcast %143 : vector<16x1xf32> to vector<16x16xf32>
    %145 = arith.mulf %140, %144 : vector<16x16xf32>
    %cst_50 = arith.constant dense<0.000000e+00> : vector<16x8xf32>
    %146 = tpu.matmul %145, %132, %cst_50 {dimension_numbers = #tpu.dot_dimension_numbers<[1], [0], [0], [1], [0, 0, 1, 1], [], []>} : vector<16x16xf32>, vector<16x8xf32>, vector<16x8xf32> -> vector<16x8xf32>
    %147 = vector.extract_strided_slice %19 {offsets = [8, 0], sizes = [8, 32], strides = [1, 1]} : vector<32x32xf32> to vector<8x32xf32>
    %cst_51 = arith.constant dense<0.000000e+00> : vector<16x32xf32>
    %148 = tpu.matmul %146, %147, %cst_51 {dimension_numbers = #tpu.dot_dimension_numbers<[1], [0], [0], [1], [0, 0, 1, 1], [], []>} : vector<16x8xf32>, vector<8x32xf32>, vector<16x32xf32> -> vector<16x32xf32>
    %149 = arith.addf %129, %148 : vector<16x32xf32>
    %150 = vector.extract_strided_slice %108 {offsets = [0, 16], sizes = [16, 8], strides = [1, 1]} : vector<16x32xf32> to vector<16x8xf32>
    %151 = vector.extract_strided_slice %109 {offsets = [0, 16], sizes = [16, 8], strides = [1, 1]} : vector<16x32xf32> to vector<16x8xf32>
    %152 = vector.extract_strided_slice %110 {offsets = [0, 16], sizes = [16, 8], strides = [1, 1]} : vector<16x32xf32> to vector<16x8xf32>
    %cst_52 = arith.constant dense<0.000000e+00> : vector<16x16xf32>
    %153 = tpu.matmul %150, %151, %cst_52 {dimension_numbers = #tpu.dot_dimension_numbers<[1], [1], [0], [0], [0, 0, 1, 0], [], []>} : vector<16x8xf32>, vector<16x8xf32>, vector<16x16xf32> -> vector<16x16xf32>
    %cst_53 = arith.constant 0.353553385 : f32
    %154 = vector.broadcast %cst_53 : f32 to vector<16x16xf32>
    %155 = arith.mulf %153, %154 : vector<16x16xf32>
    %cst_54 = arith.constant dense<0xFF800000> : vector<16xf32>
    %156 = vector.multi_reduction <maximumf>, %155, %cst_54 [1] : vector<16x16xf32> to vector<16xf32>
    %157 = vector.shape_cast %156 : vector<16xf32> to vector<16x1xf32>
    %158 = vector.broadcast %157 : vector<16x1xf32> to vector<16x16xf32>
    %159 = arith.subf %155, %158 : vector<16x16xf32>
    %160 = math.exp %159 : vector<16x16xf32>
    %cst_55 = arith.constant dense<0.000000e+00> : vector<16xf32>
    %161 = vector.multi_reduction <add>, %160, %cst_55 [1] : vector<16x16xf32> to vector<16xf32>
    %162 = vector.shape_cast %161 : vector<16xf32> to vector<16x1xf32>
    %163 = tpu.reciprocal %162 {approx = true} : vector<16x1xf32> -> vector<16x1xf32>
    %164 = vector.broadcast %163 : vector<16x1xf32> to vector<16x16xf32>
    %165 = arith.mulf %160, %164 : vector<16x16xf32>
    %cst_56 = arith.constant dense<0.000000e+00> : vector<16x8xf32>
    %166 = tpu.matmul %165, %152, %cst_56 {dimension_numbers = #tpu.dot_dimension_numbers<[1], [0], [0], [1], [0, 0, 1, 1], [], []>} : vector<16x16xf32>, vector<16x8xf32>, vector<16x8xf32> -> vector<16x8xf32>
    %167 = vector.extract_strided_slice %19 {offsets = [16, 0], sizes = [8, 32], strides = [1, 1]} : vector<32x32xf32> to vector<8x32xf32>
    %cst_57 = arith.constant dense<0.000000e+00> : vector<16x32xf32>
    %168 = tpu.matmul %166, %167, %cst_57 {dimension_numbers = #tpu.dot_dimension_numbers<[1], [0], [0], [1], [0, 0, 1, 1], [], []>} : vector<16x8xf32>, vector<8x32xf32>, vector<16x32xf32> -> vector<16x32xf32>
    %169 = arith.addf %149, %168 : vector<16x32xf32>
    %170 = vector.extract_strided_slice %108 {offsets = [0, 24], sizes = [16, 8], strides = [1, 1]} : vector<16x32xf32> to vector<16x8xf32>
    %171 = vector.extract_strided_slice %109 {offsets = [0, 24], sizes = [16, 8], strides = [1, 1]} : vector<16x32xf32> to vector<16x8xf32>
    %172 = vector.extract_strided_slice %110 {offsets = [0, 24], sizes = [16, 8], strides = [1, 1]} : vector<16x32xf32> to vector<16x8xf32>
    %cst_58 = arith.constant dense<0.000000e+00> : vector<16x16xf32>
    %173 = tpu.matmul %170, %171, %cst_58 {dimension_numbers = #tpu.dot_dimension_numbers<[1], [1], [0], [0], [0, 0, 1, 0], [], []>} : vector<16x8xf32>, vector<16x8xf32>, vector<16x16xf32> -> vector<16x16xf32>
    %cst_59 = arith.constant 0.353553385 : f32
    %174 = vector.broadcast %cst_59 : f32 to vector<16x16xf32>
    %175 = arith.mulf %173, %174 : vector<16x16xf32>
    %cst_60 = arith.constant dense<0xFF800000> : vector<16xf32>
    %176 = vector.multi_reduction <maximumf>, %175, %cst_60 [1] : vector<16x16xf32> to vector<16xf32>
    %177 = vector.shape_cast %176 : vector<16xf32> to vector<16x1xf32>
    %178 = vector.broadcast %177 : vector<16x1xf32> to vector<16x16xf32>
    %179 = arith.subf %175, %178 : vector<16x16xf32>
    %180 = math.exp %179 : vector<16x16xf32>
    %cst_61 = arith.constant dense<0.000000e+00> : vector<16xf32>
    %181 = vector.multi_reduction <add>, %180, %cst_61 [1] : vector<16x16xf32> to vector<16xf32>
    %182 = vector.shape_cast %181 : vector<16xf32> to vector<16x1xf32>
    %183 = tpu.reciprocal %182 {approx = true} : vector<16x1xf32> -> vector<16x1xf32>
    %184 = vector.broadcast %183 : vector<16x1xf32> to vector<16x16xf32>
    %185 = arith.mulf %180, %184 : vector<16x16xf32>
    %cst_62 = arith.constant dense<0.000000e+00> : vector<16x8xf32>
    %186 = tpu.matmul %185, %172, %cst_62 {dimension_numbers = #tpu.dot_dimension_numbers<[1], [0], [0], [1], [0, 0, 1, 1], [], []>} : vector<16x16xf32>, vector<16x8xf32>, vector<16x8xf32> -> vector<16x8xf32>
    %187 = vector.extract_strided_slice %19 {offsets = [24, 0], sizes = [8, 32], strides = [1, 1]} : vector<32x32xf32> to vector<8x32xf32>
    %cst_63 = arith.constant dense<0.000000e+00> : vector<16x32xf32>
    %188 = tpu.matmul %186, %187, %cst_63 {dimension_numbers = #tpu.dot_dimension_numbers<[1], [0], [0], [1], [0, 0, 1, 1], [], []>} : vector<16x8xf32>, vector<8x32xf32>, vector<16x32xf32> -> vector<16x32xf32>
    %189 = arith.addf %169, %188 : vector<16x32xf32>
    %190 = tpu.concatenate %107, %189 in 0 : vector<16x32xf32>, vector<16x32xf32> -> vector<32x32xf32>
    %c0_64 = arith.constant 0 : index
    %c0_65 = arith.constant 0 : index
    %191 = vector.load %arg7[%c0_64, %c0_65] : memref<1x32xf32, #tpu.memory_space<vmem>>, vector<1x32xf32>
    %192 = vector.broadcast %191 : vector<1x32xf32> to vector<32x32xf32>
    %193 = arith.addf %190, %192 : vector<32x32xf32>
    %194 = arith.addf %17, %193 : vector<32x32xf32>
    %c0_66 = arith.constant 0 : index
    %c0_67 = arith.constant 0 : index
    %195 = vector.load %arg8[%c0_66, %c0_67] : memref<1x32xf32, #tpu.memory_space<vmem>>, vector<1x32xf32>
    %c0_68 = arith.constant 0 : index
    %c0_69 = arith.constant 0 : index
    %196 = vector.load %arg9[%c0_68, %c0_69] : memref<1x32xf32, #tpu.memory_space<vmem>>, vector<1x32xf32>
    %cst_70 = arith.constant dense<0.000000e+00> : vector<32xf32>
    %197 = vector.multi_reduction <add>, %194, %cst_70 [1] : vector<32x32xf32> to vector<32xf32>
    %198 = vector.shape_cast %197 : vector<32xf32> to vector<32x1xf32>
    %cst_71 = arith.constant 3.200000e+01 : f32
    %199 = vector.broadcast %cst_71 : f32 to vector<32x1xf32>
    %200 = arith.divf %198, %199 : vector<32x1xf32>
    %201 = vector.broadcast %200 : vector<32x1xf32> to vector<32x32xf32>
    %202 = arith.subf %194, %201 : vector<32x32xf32>
    %203 = arith.mulf %202, %202 : vector<32x32xf32>
    %cst_72 = arith.constant dense<0.000000e+00> : vector<32xf32>
    %204 = vector.multi_reduction <add>, %203, %cst_72 [1] : vector<32x32xf32> to vector<32xf32>
    %205 = vector.shape_cast %204 : vector<32xf32> to vector<32x1xf32>
    %cst_73 = arith.constant 3.200000e+01 : f32
    %206 = vector.broadcast %cst_73 : f32 to vector<32x1xf32>
    %207 = arith.divf %205, %206 : vector<32x1xf32>
    %208 = vector.broadcast %200 : vector<32x1xf32> to vector<32x32xf32>
    %209 = arith.subf %194, %208 : vector<32x32xf32>
    %cst_74 = arith.constant 9.99999974E-6 : f32
    %210 = vector.broadcast %cst_74 : f32 to vector<32x1xf32>
    %211 = arith.addf %207, %210 : vector<32x1xf32>
    %212 = math.rsqrt %211 : vector<32x1xf32>
    %213 = vector.broadcast %212 : vector<32x1xf32> to vector<32x32xf32>
    %214 = arith.mulf %209, %213 : vector<32x32xf32>
    %215 = vector.broadcast %195 : vector<1x32xf32> to vector<32x32xf32>
    %216 = arith.mulf %214, %215 : vector<32x32xf32>
    %217 = vector.broadcast %196 : vector<1x32xf32> to vector<32x32xf32>
    %218 = arith.addf %216, %217 : vector<32x32xf32>
    %cst_75 = arith.constant dense<0.000000e+00> : vector<32x64xf32>
    %219 = tpu.matmul %218, %20, %cst_75 {dimension_numbers = #tpu.dot_dimension_numbers<[1], [0], [0], [1], [0, 0, 1, 1], [], []>} : vector<32x32xf32>, vector<32x64xf32>, vector<32x64xf32> -> vector<32x64xf32>
    %c0_76 = arith.constant 0 : index
    %c0_77 = arith.constant 0 : index
    %220 = vector.load %arg11[%c0_76, %c0_77] : memref<1x64xf32, #tpu.memory_space<vmem>>, vector<1x64xf32>
    %221 = vector.broadcast %220 : vector<1x64xf32> to vector<32x64xf32>
    %222 = arith.addf %219, %221 : vector<32x64xf32>
    %cst_78 = arith.constant 0.000000e+00 : f32
    %223 = vector.broadcast %cst_78 : f32 to vector<32x64xf32>
    %224 = arith.maximumf %222, %223 : vector<32x64xf32>
    %cst_79 = arith.constant dense<0.000000e+00> : vector<32x32xf32>
    %225 = tpu.matmul %224, %21, %cst_79 {dimension_numbers = #tpu.dot_dimension_numbers<[1], [0], [0], [1], [0, 0, 1, 1], [], []>} : vector<32x64xf32>, vector<64x32xf32>, vector<32x32xf32> -> vector<32x32xf32>
    %c0_80 = arith.constant 0 : index
    %c0_81 = arith.constant 0 : index
    %226 = vector.load %arg13[%c0_80, %c0_81] : memref<1x32xf32, #tpu.memory_space<vmem>>, vector<1x32xf32>
    %227 = vector.broadcast %226 : vector<1x32xf32> to vector<32x32xf32>
    %228 = arith.addf %225, %227 : vector<32x32xf32>
    %229 = arith.addf %218, %228 : vector<32x32xf32>
    %c0_82 = arith.constant 0 : index
    %c0_83 = arith.constant 0 : index
    %230 = vector.load %arg14[%c0_82, %c0_83] : memref<1x32xf32, #tpu.memory_space<vmem>>, vector<1x32xf32>
    %c0_84 = arith.constant 0 : index
    %c0_85 = arith.constant 0 : index
    %231 = vector.load %arg15[%c0_84, %c0_85] : memref<1x32xf32, #tpu.memory_space<vmem>>, vector<1x32xf32>
    %cst_86 = arith.constant dense<0.000000e+00> : vector<32xf32>
    %232 = vector.multi_reduction <add>, %229, %cst_86 [1] : vector<32x32xf32> to vector<32xf32>
    %233 = vector.shape_cast %232 : vector<32xf32> to vector<32x1xf32>
    %cst_87 = arith.constant 3.200000e+01 : f32
    %234 = vector.broadcast %cst_87 : f32 to vector<32x1xf32>
    %235 = arith.divf %233, %234 : vector<32x1xf32>
    %236 = vector.broadcast %235 : vector<32x1xf32> to vector<32x32xf32>
    %237 = arith.subf %229, %236 : vector<32x32xf32>
    %238 = arith.mulf %237, %237 : vector<32x32xf32>
    %cst_88 = arith.constant dense<0.000000e+00> : vector<32xf32>
    %239 = vector.multi_reduction <add>, %238, %cst_88 [1] : vector<32x32xf32> to vector<32xf32>
    %240 = vector.shape_cast %239 : vector<32xf32> to vector<32x1xf32>
    %cst_89 = arith.constant 3.200000e+01 : f32
    %241 = vector.broadcast %cst_89 : f32 to vector<32x1xf32>
    %242 = arith.divf %240, %241 : vector<32x1xf32>
    %243 = vector.broadcast %235 : vector<32x1xf32> to vector<32x32xf32>
    %244 = arith.subf %229, %243 : vector<32x32xf32>
    %cst_90 = arith.constant 9.99999974E-6 : f32
    %245 = vector.broadcast %cst_90 : f32 to vector<32x1xf32>
    %246 = arith.addf %242, %245 : vector<32x1xf32>
    %247 = math.rsqrt %246 : vector<32x1xf32>
    %248 = vector.broadcast %247 : vector<32x1xf32> to vector<32x32xf32>
    %249 = arith.mulf %244, %248 : vector<32x32xf32>
    %250 = vector.broadcast %230 : vector<1x32xf32> to vector<32x32xf32>
    %251 = arith.mulf %249, %250 : vector<32x32xf32>
    %252 = vector.broadcast %231 : vector<1x32xf32> to vector<32x32xf32>
    %253 = arith.addf %251, %252 : vector<32x32xf32>
    %c0_91 = arith.constant 0 : index
    %c0_92 = arith.constant 0 : index
    %254 = vector.load %arg16[%c0_91, %c0_92] : memref<32x96xf32, #tpu.memory_space<vmem>>, vector<32x96xf32>
    %c0_93 = arith.constant 0 : index
    %c0_94 = arith.constant 0 : index
    %255 = vector.load %arg18[%c0_93, %c0_94] : memref<32x32xf32, #tpu.memory_space<vmem>>, vector<32x32xf32>
    %c0_95 = arith.constant 0 : index
    %c0_96 = arith.constant 0 : index
    %256 = vector.load %arg22[%c0_95, %c0_96] : memref<32x64xf32, #tpu.memory_space<vmem>>, vector<32x64xf32>
    %c0_97 = arith.constant 0 : index
    %c0_98 = arith.constant 0 : index
    %257 = vector.load %arg24[%c0_97, %c0_98] : memref<64x32xf32, #tpu.memory_space<vmem>>, vector<64x32xf32>
    %cst_99 = arith.constant dense<0.000000e+00> : vector<32x96xf32>
    %258 = tpu.matmul %253, %254, %cst_99 {dimension_numbers = #tpu.dot_dimension_numbers<[1], [0], [0], [1], [0, 0, 1, 1], [], []>} : vector<32x32xf32>, vector<32x96xf32>, vector<32x96xf32> -> vector<32x96xf32>
    %c0_100 = arith.constant 0 : index
    %c0_101 = arith.constant 0 : index
    %259 = vector.load %arg17[%c0_100, %c0_101] : memref<1x96xf32, #tpu.memory_space<vmem>>, vector<1x96xf32>
    %260 = vector.broadcast %259 : vector<1x96xf32> to vector<32x96xf32>
    %261 = arith.addf %258, %260 : vector<32x96xf32>
    %262 = vector.extract_strided_slice %261 {offsets = [0, 0], sizes = [16, 32], strides = [1, 1]} : vector<32x96xf32> to vector<16x32xf32>
    %263 = vector.extract_strided_slice %261 {offsets = [0, 32], sizes = [16, 32], strides = [1, 1]} : vector<32x96xf32> to vector<16x32xf32>
    %264 = vector.extract_strided_slice %261 {offsets = [0, 64], sizes = [16, 32], strides = [1, 1]} : vector<32x96xf32> to vector<16x32xf32>
    %265 = vector.extract_strided_slice %262 {offsets = [0, 0], sizes = [16, 8], strides = [1, 1]} : vector<16x32xf32> to vector<16x8xf32>
    %266 = vector.extract_strided_slice %263 {offsets = [0, 0], sizes = [16, 8], strides = [1, 1]} : vector<16x32xf32> to vector<16x8xf32>
    %267 = vector.extract_strided_slice %264 {offsets = [0, 0], sizes = [16, 8], strides = [1, 1]} : vector<16x32xf32> to vector<16x8xf32>
    %cst_102 = arith.constant dense<0.000000e+00> : vector<16x16xf32>
    %268 = tpu.matmul %265, %266, %cst_102 {dimension_numbers = #tpu.dot_dimension_numbers<[1], [1], [0], [0], [0, 0, 1, 0], [], []>} : vector<16x8xf32>, vector<16x8xf32>, vector<16x16xf32> -> vector<16x16xf32>
    %cst_103 = arith.constant 0.353553385 : f32
    %269 = vector.broadcast %cst_103 : f32 to vector<16x16xf32>
    %270 = arith.mulf %268, %269 : vector<16x16xf32>
    %cst_104 = arith.constant dense<0xFF800000> : vector<16xf32>
    %271 = vector.multi_reduction <maximumf>, %270, %cst_104 [1] : vector<16x16xf32> to vector<16xf32>
    %272 = vector.shape_cast %271 : vector<16xf32> to vector<16x1xf32>
    %273 = vector.broadcast %272 : vector<16x1xf32> to vector<16x16xf32>
    %274 = arith.subf %270, %273 : vector<16x16xf32>
    %275 = math.exp %274 : vector<16x16xf32>
    %cst_105 = arith.constant dense<0.000000e+00> : vector<16xf32>
    %276 = vector.multi_reduction <add>, %275, %cst_105 [1] : vector<16x16xf32> to vector<16xf32>
    %277 = vector.shape_cast %276 : vector<16xf32> to vector<16x1xf32>
    %278 = tpu.reciprocal %277 {approx = true} : vector<16x1xf32> -> vector<16x1xf32>
    %279 = vector.broadcast %278 : vector<16x1xf32> to vector<16x16xf32>
    %280 = arith.mulf %275, %279 : vector<16x16xf32>
    %cst_106 = arith.constant dense<0.000000e+00> : vector<16x8xf32>
    %281 = tpu.matmul %280, %267, %cst_106 {dimension_numbers = #tpu.dot_dimension_numbers<[1], [0], [0], [1], [0, 0, 1, 1], [], []>} : vector<16x16xf32>, vector<16x8xf32>, vector<16x8xf32> -> vector<16x8xf32>
    %282 = vector.extract_strided_slice %255 {offsets = [0, 0], sizes = [8, 32], strides = [1, 1]} : vector<32x32xf32> to vector<8x32xf32>
    %cst_107 = arith.constant dense<0.000000e+00> : vector<16x32xf32>
    %283 = tpu.matmul %281, %282, %cst_107 {dimension_numbers = #tpu.dot_dimension_numbers<[1], [0], [0], [1], [0, 0, 1, 1], [], []>} : vector<16x8xf32>, vector<8x32xf32>, vector<16x32xf32> -> vector<16x32xf32>
    %284 = vector.extract_strided_slice %262 {offsets = [0, 8], sizes = [16, 8], strides = [1, 1]} : vector<16x32xf32> to vector<16x8xf32>
    %285 = vector.extract_strided_slice %263 {offsets = [0, 8], sizes = [16, 8], strides = [1, 1]} : vector<16x32xf32> to vector<16x8xf32>
    %286 = vector.extract_strided_slice %264 {offsets = [0, 8], sizes = [16, 8], strides = [1, 1]} : vector<16x32xf32> to vector<16x8xf32>
    %cst_108 = arith.constant dense<0.000000e+00> : vector<16x16xf32>
    %287 = tpu.matmul %284, %285, %cst_108 {dimension_numbers = #tpu.dot_dimension_numbers<[1], [1], [0], [0], [0, 0, 1, 0], [], []>} : vector<16x8xf32>, vector<16x8xf32>, vector<16x16xf32> -> vector<16x16xf32>
    %cst_109 = arith.constant 0.353553385 : f32
    %288 = vector.broadcast %cst_109 : f32 to vector<16x16xf32>
    %289 = arith.mulf %287, %288 : vector<16x16xf32>
    %cst_110 = arith.constant dense<0xFF800000> : vector<16xf32>
    %290 = vector.multi_reduction <maximumf>, %289, %cst_110 [1] : vector<16x16xf32> to vector<16xf32>
    %291 = vector.shape_cast %290 : vector<16xf32> to vector<16x1xf32>
    %292 = vector.broadcast %291 : vector<16x1xf32> to vector<16x16xf32>
    %293 = arith.subf %289, %292 : vector<16x16xf32>
    %294 = math.exp %293 : vector<16x16xf32>
    %cst_111 = arith.constant dense<0.000000e+00> : vector<16xf32>
    %295 = vector.multi_reduction <add>, %294, %cst_111 [1] : vector<16x16xf32> to vector<16xf32>
    %296 = vector.shape_cast %295 : vector<16xf32> to vector<16x1xf32>
    %297 = tpu.reciprocal %296 {approx = true} : vector<16x1xf32> -> vector<16x1xf32>
    %298 = vector.broadcast %297 : vector<16x1xf32> to vector<16x16xf32>
    %299 = arith.mulf %294, %298 : vector<16x16xf32>
    %cst_112 = arith.constant dense<0.000000e+00> : vector<16x8xf32>
    %300 = tpu.matmul %299, %286, %cst_112 {dimension_numbers = #tpu.dot_dimension_numbers<[1], [0], [0], [1], [0, 0, 1, 1], [], []>} : vector<16x16xf32>, vector<16x8xf32>, vector<16x8xf32> -> vector<16x8xf32>
    %301 = vector.extract_strided_slice %255 {offsets = [8, 0], sizes = [8, 32], strides = [1, 1]} : vector<32x32xf32> to vector<8x32xf32>
    %cst_113 = arith.constant dense<0.000000e+00> : vector<16x32xf32>
    %302 = tpu.matmul %300, %301, %cst_113 {dimension_numbers = #tpu.dot_dimension_numbers<[1], [0], [0], [1], [0, 0, 1, 1], [], []>} : vector<16x8xf32>, vector<8x32xf32>, vector<16x32xf32> -> vector<16x32xf32>
    %303 = arith.addf %283, %302 : vector<16x32xf32>
    %304 = vector.extract_strided_slice %262 {offsets = [0, 16], sizes = [16, 8], strides = [1, 1]} : vector<16x32xf32> to vector<16x8xf32>
    %305 = vector.extract_strided_slice %263 {offsets = [0, 16], sizes = [16, 8], strides = [1, 1]} : vector<16x32xf32> to vector<16x8xf32>
    %306 = vector.extract_strided_slice %264 {offsets = [0, 16], sizes = [16, 8], strides = [1, 1]} : vector<16x32xf32> to vector<16x8xf32>
    %cst_114 = arith.constant dense<0.000000e+00> : vector<16x16xf32>
    %307 = tpu.matmul %304, %305, %cst_114 {dimension_numbers = #tpu.dot_dimension_numbers<[1], [1], [0], [0], [0, 0, 1, 0], [], []>} : vector<16x8xf32>, vector<16x8xf32>, vector<16x16xf32> -> vector<16x16xf32>
    %cst_115 = arith.constant 0.353553385 : f32
    %308 = vector.broadcast %cst_115 : f32 to vector<16x16xf32>
    %309 = arith.mulf %307, %308 : vector<16x16xf32>
    %cst_116 = arith.constant dense<0xFF800000> : vector<16xf32>
    %310 = vector.multi_reduction <maximumf>, %309, %cst_116 [1] : vector<16x16xf32> to vector<16xf32>
    %311 = vector.shape_cast %310 : vector<16xf32> to vector<16x1xf32>
    %312 = vector.broadcast %311 : vector<16x1xf32> to vector<16x16xf32>
    %313 = arith.subf %309, %312 : vector<16x16xf32>
    %314 = math.exp %313 : vector<16x16xf32>
    %cst_117 = arith.constant dense<0.000000e+00> : vector<16xf32>
    %315 = vector.multi_reduction <add>, %314, %cst_117 [1] : vector<16x16xf32> to vector<16xf32>
    %316 = vector.shape_cast %315 : vector<16xf32> to vector<16x1xf32>
    %317 = tpu.reciprocal %316 {approx = true} : vector<16x1xf32> -> vector<16x1xf32>
    %318 = vector.broadcast %317 : vector<16x1xf32> to vector<16x16xf32>
    %319 = arith.mulf %314, %318 : vector<16x16xf32>
    %cst_118 = arith.constant dense<0.000000e+00> : vector<16x8xf32>
    %320 = tpu.matmul %319, %306, %cst_118 {dimension_numbers = #tpu.dot_dimension_numbers<[1], [0], [0], [1], [0, 0, 1, 1], [], []>} : vector<16x16xf32>, vector<16x8xf32>, vector<16x8xf32> -> vector<16x8xf32>
    %321 = vector.extract_strided_slice %255 {offsets = [16, 0], sizes = [8, 32], strides = [1, 1]} : vector<32x32xf32> to vector<8x32xf32>
    %cst_119 = arith.constant dense<0.000000e+00> : vector<16x32xf32>
    %322 = tpu.matmul %320, %321, %cst_119 {dimension_numbers = #tpu.dot_dimension_numbers<[1], [0], [0], [1], [0, 0, 1, 1], [], []>} : vector<16x8xf32>, vector<8x32xf32>, vector<16x32xf32> -> vector<16x32xf32>
    %323 = arith.addf %303, %322 : vector<16x32xf32>
    %324 = vector.extract_strided_slice %262 {offsets = [0, 24], sizes = [16, 8], strides = [1, 1]} : vector<16x32xf32> to vector<16x8xf32>
    %325 = vector.extract_strided_slice %263 {offsets = [0, 24], sizes = [16, 8], strides = [1, 1]} : vector<16x32xf32> to vector<16x8xf32>
    %326 = vector.extract_strided_slice %264 {offsets = [0, 24], sizes = [16, 8], strides = [1, 1]} : vector<16x32xf32> to vector<16x8xf32>
    %cst_120 = arith.constant dense<0.000000e+00> : vector<16x16xf32>
    %327 = tpu.matmul %324, %325, %cst_120 {dimension_numbers = #tpu.dot_dimension_numbers<[1], [1], [0], [0], [0, 0, 1, 0], [], []>} : vector<16x8xf32>, vector<16x8xf32>, vector<16x16xf32> -> vector<16x16xf32>
    %cst_121 = arith.constant 0.353553385 : f32
    %328 = vector.broadcast %cst_121 : f32 to vector<16x16xf32>
    %329 = arith.mulf %327, %328 : vector<16x16xf32>
    %cst_122 = arith.constant dense<0xFF800000> : vector<16xf32>
    %330 = vector.multi_reduction <maximumf>, %329, %cst_122 [1] : vector<16x16xf32> to vector<16xf32>
    %331 = vector.shape_cast %330 : vector<16xf32> to vector<16x1xf32>
    %332 = vector.broadcast %331 : vector<16x1xf32> to vector<16x16xf32>
    %333 = arith.subf %329, %332 : vector<16x16xf32>
    %334 = math.exp %333 : vector<16x16xf32>
    %cst_123 = arith.constant dense<0.000000e+00> : vector<16xf32>
    %335 = vector.multi_reduction <add>, %334, %cst_123 [1] : vector<16x16xf32> to vector<16xf32>
    %336 = vector.shape_cast %335 : vector<16xf32> to vector<16x1xf32>
    %337 = tpu.reciprocal %336 {approx = true} : vector<16x1xf32> -> vector<16x1xf32>
    %338 = vector.broadcast %337 : vector<16x1xf32> to vector<16x16xf32>
    %339 = arith.mulf %334, %338 : vector<16x16xf32>
    %cst_124 = arith.constant dense<0.000000e+00> : vector<16x8xf32>
    %340 = tpu.matmul %339, %326, %cst_124 {dimension_numbers = #tpu.dot_dimension_numbers<[1], [0], [0], [1], [0, 0, 1, 1], [], []>} : vector<16x16xf32>, vector<16x8xf32>, vector<16x8xf32> -> vector<16x8xf32>
    %341 = vector.extract_strided_slice %255 {offsets = [24, 0], sizes = [8, 32], strides = [1, 1]} : vector<32x32xf32> to vector<8x32xf32>
    %cst_125 = arith.constant dense<0.000000e+00> : vector<16x32xf32>
    %342 = tpu.matmul %340, %341, %cst_125 {dimension_numbers = #tpu.dot_dimension_numbers<[1], [0], [0], [1], [0, 0, 1, 1], [], []>} : vector<16x8xf32>, vector<8x32xf32>, vector<16x32xf32> -> vector<16x32xf32>
    %343 = arith.addf %323, %342 : vector<16x32xf32>
    %344 = vector.extract_strided_slice %261 {offsets = [16, 0], sizes = [16, 32], strides = [1, 1]} : vector<32x96xf32> to vector<16x32xf32>
    %345 = vector.extract_strided_slice %261 {offsets = [16, 32], sizes = [16, 32], strides = [1, 1]} : vector<32x96xf32> to vector<16x32xf32>
    %346 = vector.extract_strided_slice %261 {offsets = [16, 64], sizes = [16, 32], strides = [1, 1]} : vector<32x96xf32> to vector<16x32xf32>
    %347 = vector.extract_strided_slice %344 {offsets = [0, 0], sizes = [16, 8], strides = [1, 1]} : vector<16x32xf32> to vector<16x8xf32>
    %348 = vector.extract_strided_slice %345 {offsets = [0, 0], sizes = [16, 8], strides = [1, 1]} : vector<16x32xf32> to vector<16x8xf32>
    %349 = vector.extract_strided_slice %346 {offsets = [0, 0], sizes = [16, 8], strides = [1, 1]} : vector<16x32xf32> to vector<16x8xf32>
    %cst_126 = arith.constant dense<0.000000e+00> : vector<16x16xf32>
    %350 = tpu.matmul %347, %348, %cst_126 {dimension_numbers = #tpu.dot_dimension_numbers<[1], [1], [0], [0], [0, 0, 1, 0], [], []>} : vector<16x8xf32>, vector<16x8xf32>, vector<16x16xf32> -> vector<16x16xf32>
    %cst_127 = arith.constant 0.353553385 : f32
    %351 = vector.broadcast %cst_127 : f32 to vector<16x16xf32>
    %352 = arith.mulf %350, %351 : vector<16x16xf32>
    %cst_128 = arith.constant dense<0xFF800000> : vector<16xf32>
    %353 = vector.multi_reduction <maximumf>, %352, %cst_128 [1] : vector<16x16xf32> to vector<16xf32>
    %354 = vector.shape_cast %353 : vector<16xf32> to vector<16x1xf32>
    %355 = vector.broadcast %354 : vector<16x1xf32> to vector<16x16xf32>
    %356 = arith.subf %352, %355 : vector<16x16xf32>
    %357 = math.exp %356 : vector<16x16xf32>
    %cst_129 = arith.constant dense<0.000000e+00> : vector<16xf32>
    %358 = vector.multi_reduction <add>, %357, %cst_129 [1] : vector<16x16xf32> to vector<16xf32>
    %359 = vector.shape_cast %358 : vector<16xf32> to vector<16x1xf32>
    %360 = tpu.reciprocal %359 {approx = true} : vector<16x1xf32> -> vector<16x1xf32>
    %361 = vector.broadcast %360 : vector<16x1xf32> to vector<16x16xf32>
    %362 = arith.mulf %357, %361 : vector<16x16xf32>
    %cst_130 = arith.constant dense<0.000000e+00> : vector<16x8xf32>
    %363 = tpu.matmul %362, %349, %cst_130 {dimension_numbers = #tpu.dot_dimension_numbers<[1], [0], [0], [1], [0, 0, 1, 1], [], []>} : vector<16x16xf32>, vector<16x8xf32>, vector<16x8xf32> -> vector<16x8xf32>
    %364 = vector.extract_strided_slice %255 {offsets = [0, 0], sizes = [8, 32], strides = [1, 1]} : vector<32x32xf32> to vector<8x32xf32>
    %cst_131 = arith.constant dense<0.000000e+00> : vector<16x32xf32>
    %365 = tpu.matmul %363, %364, %cst_131 {dimension_numbers = #tpu.dot_dimension_numbers<[1], [0], [0], [1], [0, 0, 1, 1], [], []>} : vector<16x8xf32>, vector<8x32xf32>, vector<16x32xf32> -> vector<16x32xf32>
    %366 = vector.extract_strided_slice %344 {offsets = [0, 8], sizes = [16, 8], strides = [1, 1]} : vector<16x32xf32> to vector<16x8xf32>
    %367 = vector.extract_strided_slice %345 {offsets = [0, 8], sizes = [16, 8], strides = [1, 1]} : vector<16x32xf32> to vector<16x8xf32>
    %368 = vector.extract_strided_slice %346 {offsets = [0, 8], sizes = [16, 8], strides = [1, 1]} : vector<16x32xf32> to vector<16x8xf32>
    %cst_132 = arith.constant dense<0.000000e+00> : vector<16x16xf32>
    %369 = tpu.matmul %366, %367, %cst_132 {dimension_numbers = #tpu.dot_dimension_numbers<[1], [1], [0], [0], [0, 0, 1, 0], [], []>} : vector<16x8xf32>, vector<16x8xf32>, vector<16x16xf32> -> vector<16x16xf32>
    %cst_133 = arith.constant 0.353553385 : f32
    %370 = vector.broadcast %cst_133 : f32 to vector<16x16xf32>
    %371 = arith.mulf %369, %370 : vector<16x16xf32>
    %cst_134 = arith.constant dense<0xFF800000> : vector<16xf32>
    %372 = vector.multi_reduction <maximumf>, %371, %cst_134 [1] : vector<16x16xf32> to vector<16xf32>
    %373 = vector.shape_cast %372 : vector<16xf32> to vector<16x1xf32>
    %374 = vector.broadcast %373 : vector<16x1xf32> to vector<16x16xf32>
    %375 = arith.subf %371, %374 : vector<16x16xf32>
    %376 = math.exp %375 : vector<16x16xf32>
    %cst_135 = arith.constant dense<0.000000e+00> : vector<16xf32>
    %377 = vector.multi_reduction <add>, %376, %cst_135 [1] : vector<16x16xf32> to vector<16xf32>
    %378 = vector.shape_cast %377 : vector<16xf32> to vector<16x1xf32>
    %379 = tpu.reciprocal %378 {approx = true} : vector<16x1xf32> -> vector<16x1xf32>
    %380 = vector.broadcast %379 : vector<16x1xf32> to vector<16x16xf32>
    %381 = arith.mulf %376, %380 : vector<16x16xf32>
    %cst_136 = arith.constant dense<0.000000e+00> : vector<16x8xf32>
    %382 = tpu.matmul %381, %368, %cst_136 {dimension_numbers = #tpu.dot_dimension_numbers<[1], [0], [0], [1], [0, 0, 1, 1], [], []>} : vector<16x16xf32>, vector<16x8xf32>, vector<16x8xf32> -> vector<16x8xf32>
    %383 = vector.extract_strided_slice %255 {offsets = [8, 0], sizes = [8, 32], strides = [1, 1]} : vector<32x32xf32> to vector<8x32xf32>
    %cst_137 = arith.constant dense<0.000000e+00> : vector<16x32xf32>
    %384 = tpu.matmul %382, %383, %cst_137 {dimension_numbers = #tpu.dot_dimension_numbers<[1], [0], [0], [1], [0, 0, 1, 1], [], []>} : vector<16x8xf32>, vector<8x32xf32>, vector<16x32xf32> -> vector<16x32xf32>
    %385 = arith.addf %365, %384 : vector<16x32xf32>
    %386 = vector.extract_strided_slice %344 {offsets = [0, 16], sizes = [16, 8], strides = [1, 1]} : vector<16x32xf32> to vector<16x8xf32>
    %387 = vector.extract_strided_slice %345 {offsets = [0, 16], sizes = [16, 8], strides = [1, 1]} : vector<16x32xf32> to vector<16x8xf32>
    %388 = vector.extract_strided_slice %346 {offsets = [0, 16], sizes = [16, 8], strides = [1, 1]} : vector<16x32xf32> to vector<16x8xf32>
    %cst_138 = arith.constant dense<0.000000e+00> : vector<16x16xf32>
    %389 = tpu.matmul %386, %387, %cst_138 {dimension_numbers = #tpu.dot_dimension_numbers<[1], [1], [0], [0], [0, 0, 1, 0], [], []>} : vector<16x8xf32>, vector<16x8xf32>, vector<16x16xf32> -> vector<16x16xf32>
    %cst_139 = arith.constant 0.353553385 : f32
    %390 = vector.broadcast %cst_139 : f32 to vector<16x16xf32>
    %391 = arith.mulf %389, %390 : vector<16x16xf32>
    %cst_140 = arith.constant dense<0xFF800000> : vector<16xf32>
    %392 = vector.multi_reduction <maximumf>, %391, %cst_140 [1] : vector<16x16xf32> to vector<16xf32>
    %393 = vector.shape_cast %392 : vector<16xf32> to vector<16x1xf32>
    %394 = vector.broadcast %393 : vector<16x1xf32> to vector<16x16xf32>
    %395 = arith.subf %391, %394 : vector<16x16xf32>
    %396 = math.exp %395 : vector<16x16xf32>
    %cst_141 = arith.constant dense<0.000000e+00> : vector<16xf32>
    %397 = vector.multi_reduction <add>, %396, %cst_141 [1] : vector<16x16xf32> to vector<16xf32>
    %398 = vector.shape_cast %397 : vector<16xf32> to vector<16x1xf32>
    %399 = tpu.reciprocal %398 {approx = true} : vector<16x1xf32> -> vector<16x1xf32>
    %400 = vector.broadcast %399 : vector<16x1xf32> to vector<16x16xf32>
    %401 = arith.mulf %396, %400 : vector<16x16xf32>
    %cst_142 = arith.constant dense<0.000000e+00> : vector<16x8xf32>
    %402 = tpu.matmul %401, %388, %cst_142 {dimension_numbers = #tpu.dot_dimension_numbers<[1], [0], [0], [1], [0, 0, 1, 1], [], []>} : vector<16x16xf32>, vector<16x8xf32>, vector<16x8xf32> -> vector<16x8xf32>
    %403 = vector.extract_strided_slice %255 {offsets = [16, 0], sizes = [8, 32], strides = [1, 1]} : vector<32x32xf32> to vector<8x32xf32>
    %cst_143 = arith.constant dense<0.000000e+00> : vector<16x32xf32>
    %404 = tpu.matmul %402, %403, %cst_143 {dimension_numbers = #tpu.dot_dimension_numbers<[1], [0], [0], [1], [0, 0, 1, 1], [], []>} : vector<16x8xf32>, vector<8x32xf32>, vector<16x32xf32> -> vector<16x32xf32>
    %405 = arith.addf %385, %404 : vector<16x32xf32>
    %406 = vector.extract_strided_slice %344 {offsets = [0, 24], sizes = [16, 8], strides = [1, 1]} : vector<16x32xf32> to vector<16x8xf32>
    %407 = vector.extract_strided_slice %345 {offsets = [0, 24], sizes = [16, 8], strides = [1, 1]} : vector<16x32xf32> to vector<16x8xf32>
    %408 = vector.extract_strided_slice %346 {offsets = [0, 24], sizes = [16, 8], strides = [1, 1]} : vector<16x32xf32> to vector<16x8xf32>
    %cst_144 = arith.constant dense<0.000000e+00> : vector<16x16xf32>
    %409 = tpu.matmul %406, %407, %cst_144 {dimension_numbers = #tpu.dot_dimension_numbers<[1], [1], [0], [0], [0, 0, 1, 0], [], []>} : vector<16x8xf32>, vector<16x8xf32>, vector<16x16xf32> -> vector<16x16xf32>
    %cst_145 = arith.constant 0.353553385 : f32
    %410 = vector.broadcast %cst_145 : f32 to vector<16x16xf32>
    %411 = arith.mulf %409, %410 : vector<16x16xf32>
    %cst_146 = arith.constant dense<0xFF800000> : vector<16xf32>
    %412 = vector.multi_reduction <maximumf>, %411, %cst_146 [1] : vector<16x16xf32> to vector<16xf32>
    %413 = vector.shape_cast %412 : vector<16xf32> to vector<16x1xf32>
    %414 = vector.broadcast %413 : vector<16x1xf32> to vector<16x16xf32>
    %415 = arith.subf %411, %414 : vector<16x16xf32>
    %416 = math.exp %415 : vector<16x16xf32>
    %cst_147 = arith.constant dense<0.000000e+00> : vector<16xf32>
    %417 = vector.multi_reduction <add>, %416, %cst_147 [1] : vector<16x16xf32> to vector<16xf32>
    %418 = vector.shape_cast %417 : vector<16xf32> to vector<16x1xf32>
    %419 = tpu.reciprocal %418 {approx = true} : vector<16x1xf32> -> vector<16x1xf32>
    %420 = vector.broadcast %419 : vector<16x1xf32> to vector<16x16xf32>
    %421 = arith.mulf %416, %420 : vector<16x16xf32>
    %cst_148 = arith.constant dense<0.000000e+00> : vector<16x8xf32>
    %422 = tpu.matmul %421, %408, %cst_148 {dimension_numbers = #tpu.dot_dimension_numbers<[1], [0], [0], [1], [0, 0, 1, 1], [], []>} : vector<16x16xf32>, vector<16x8xf32>, vector<16x8xf32> -> vector<16x8xf32>
    %423 = vector.extract_strided_slice %255 {offsets = [24, 0], sizes = [8, 32], strides = [1, 1]} : vector<32x32xf32> to vector<8x32xf32>
    %cst_149 = arith.constant dense<0.000000e+00> : vector<16x32xf32>
    %424 = tpu.matmul %422, %423, %cst_149 {dimension_numbers = #tpu.dot_dimension_numbers<[1], [0], [0], [1], [0, 0, 1, 1], [], []>} : vector<16x8xf32>, vector<8x32xf32>, vector<16x32xf32> -> vector<16x32xf32>
    %425 = arith.addf %405, %424 : vector<16x32xf32>
    %426 = tpu.concatenate %343, %425 in 0 : vector<16x32xf32>, vector<16x32xf32> -> vector<32x32xf32>
    %c0_150 = arith.constant 0 : index
    %c0_151 = arith.constant 0 : index
    %427 = vector.load %arg19[%c0_150, %c0_151] : memref<1x32xf32, #tpu.memory_space<vmem>>, vector<1x32xf32>
    %428 = vector.broadcast %427 : vector<1x32xf32> to vector<32x32xf32>
    %429 = arith.addf %426, %428 : vector<32x32xf32>
    %430 = arith.addf %253, %429 : vector<32x32xf32>
    %c0_152 = arith.constant 0 : index
    %c0_153 = arith.constant 0 : index
    %431 = vector.load %arg20[%c0_152, %c0_153] : memref<1x32xf32, #tpu.memory_space<vmem>>, vector<1x32xf32>
    %c0_154 = arith.constant 0 : index
    %c0_155 = arith.constant 0 : index
    %432 = vector.load %arg21[%c0_154, %c0_155] : memref<1x32xf32, #tpu.memory_space<vmem>>, vector<1x32xf32>
    %cst_156 = arith.constant dense<0.000000e+00> : vector<32xf32>
    %433 = vector.multi_reduction <add>, %430, %cst_156 [1] : vector<32x32xf32> to vector<32xf32>
    %434 = vector.shape_cast %433 : vector<32xf32> to vector<32x1xf32>
    %cst_157 = arith.constant 3.200000e+01 : f32
    %435 = vector.broadcast %cst_157 : f32 to vector<32x1xf32>
    %436 = arith.divf %434, %435 : vector<32x1xf32>
    %437 = vector.broadcast %436 : vector<32x1xf32> to vector<32x32xf32>
    %438 = arith.subf %430, %437 : vector<32x32xf32>
    %439 = arith.mulf %438, %438 : vector<32x32xf32>
    %cst_158 = arith.constant dense<0.000000e+00> : vector<32xf32>
    %440 = vector.multi_reduction <add>, %439, %cst_158 [1] : vector<32x32xf32> to vector<32xf32>
    %441 = vector.shape_cast %440 : vector<32xf32> to vector<32x1xf32>
    %cst_159 = arith.constant 3.200000e+01 : f32
    %442 = vector.broadcast %cst_159 : f32 to vector<32x1xf32>
    %443 = arith.divf %441, %442 : vector<32x1xf32>
    %444 = vector.broadcast %436 : vector<32x1xf32> to vector<32x32xf32>
    %445 = arith.subf %430, %444 : vector<32x32xf32>
    %cst_160 = arith.constant 9.99999974E-6 : f32
    %446 = vector.broadcast %cst_160 : f32 to vector<32x1xf32>
    %447 = arith.addf %443, %446 : vector<32x1xf32>
    %448 = math.rsqrt %447 : vector<32x1xf32>
    %449 = vector.broadcast %448 : vector<32x1xf32> to vector<32x32xf32>
    %450 = arith.mulf %445, %449 : vector<32x32xf32>
    %451 = vector.broadcast %431 : vector<1x32xf32> to vector<32x32xf32>
    %452 = arith.mulf %450, %451 : vector<32x32xf32>
    %453 = vector.broadcast %432 : vector<1x32xf32> to vector<32x32xf32>
    %454 = arith.addf %452, %453 : vector<32x32xf32>
    %cst_161 = arith.constant dense<0.000000e+00> : vector<32x64xf32>
    %455 = tpu.matmul %454, %256, %cst_161 {dimension_numbers = #tpu.dot_dimension_numbers<[1], [0], [0], [1], [0, 0, 1, 1], [], []>} : vector<32x32xf32>, vector<32x64xf32>, vector<32x64xf32> -> vector<32x64xf32>
    %c0_162 = arith.constant 0 : index
    %c0_163 = arith.constant 0 : index
    %456 = vector.load %arg23[%c0_162, %c0_163] : memref<1x64xf32, #tpu.memory_space<vmem>>, vector<1x64xf32>
    %457 = vector.broadcast %456 : vector<1x64xf32> to vector<32x64xf32>
    %458 = arith.addf %455, %457 : vector<32x64xf32>
    %cst_164 = arith.constant 0.000000e+00 : f32
    %459 = vector.broadcast %cst_164 : f32 to vector<32x64xf32>
    %460 = arith.maximumf %458, %459 : vector<32x64xf32>
    %cst_165 = arith.constant dense<0.000000e+00> : vector<32x32xf32>
    %461 = tpu.matmul %460, %257, %cst_165 {dimension_numbers = #tpu.dot_dimension_numbers<[1], [0], [0], [1], [0, 0, 1, 1], [], []>} : vector<32x64xf32>, vector<64x32xf32>, vector<32x32xf32> -> vector<32x32xf32>
    %c0_166 = arith.constant 0 : index
    %c0_167 = arith.constant 0 : index
    %462 = vector.load %arg25[%c0_166, %c0_167] : memref<1x32xf32, #tpu.memory_space<vmem>>, vector<1x32xf32>
    %463 = vector.broadcast %462 : vector<1x32xf32> to vector<32x32xf32>
    %464 = arith.addf %461, %463 : vector<32x32xf32>
    %465 = arith.addf %454, %464 : vector<32x32xf32>
    %c0_168 = arith.constant 0 : index
    %c0_169 = arith.constant 0 : index
    %466 = vector.load %arg26[%c0_168, %c0_169] : memref<1x32xf32, #tpu.memory_space<vmem>>, vector<1x32xf32>
    %c0_170 = arith.constant 0 : index
    %c0_171 = arith.constant 0 : index
    %467 = vector.load %arg27[%c0_170, %c0_171] : memref<1x32xf32, #tpu.memory_space<vmem>>, vector<1x32xf32>
    %cst_172 = arith.constant dense<0.000000e+00> : vector<32xf32>
    %468 = vector.multi_reduction <add>, %465, %cst_172 [1] : vector<32x32xf32> to vector<32xf32>
    %469 = vector.shape_cast %468 : vector<32xf32> to vector<32x1xf32>
    %cst_173 = arith.constant 3.200000e+01 : f32
    %470 = vector.broadcast %cst_173 : f32 to vector<32x1xf32>
    %471 = arith.divf %469, %470 : vector<32x1xf32>
    %472 = vector.broadcast %471 : vector<32x1xf32> to vector<32x32xf32>
    %473 = arith.subf %465, %472 : vector<32x32xf32>
    %474 = arith.mulf %473, %473 : vector<32x32xf32>
    %cst_174 = arith.constant dense<0.000000e+00> : vector<32xf32>
    %475 = vector.multi_reduction <add>, %474, %cst_174 [1] : vector<32x32xf32> to vector<32xf32>
    %476 = vector.shape_cast %475 : vector<32xf32> to vector<32x1xf32>
    %cst_175 = arith.constant 3.200000e+01 : f32
    %477 = vector.broadcast %cst_175 : f32 to vector<32x1xf32>
    %478 = arith.divf %476, %477 : vector<32x1xf32>
    %479 = vector.broadcast %471 : vector<32x1xf32> to vector<32x32xf32>
    %480 = arith.subf %465, %479 : vector<32x32xf32>
    %cst_176 = arith.constant 9.99999974E-6 : f32
    %481 = vector.broadcast %cst_176 : f32 to vector<32x1xf32>
    %482 = arith.addf %478, %481 : vector<32x1xf32>
    %483 = math.rsqrt %482 : vector<32x1xf32>
    %484 = vector.broadcast %483 : vector<32x1xf32> to vector<32x32xf32>
    %485 = arith.mulf %480, %484 : vector<32x32xf32>
    %486 = vector.broadcast %466 : vector<1x32xf32> to vector<32x32xf32>
    %487 = arith.mulf %485, %486 : vector<32x32xf32>
    %488 = vector.broadcast %467 : vector<1x32xf32> to vector<32x32xf32>
    %489 = arith.addf %487, %488 : vector<32x32xf32>
    %490 = vector.extract_strided_slice %489 {offsets = [0, 0], sizes = [1, 32], strides = [1, 1]} : vector<32x32xf32> to vector<1x32xf32>
    %491 = vector.extract_strided_slice %489 {offsets = [16, 0], sizes = [1, 32], strides = [1, 1]} : vector<32x32xf32> to vector<1x32xf32>
    %492 = tpu.concatenate %490, %491 in 0 : vector<1x32xf32>, vector<1x32xf32> -> vector<2x32xf32>
    %c0_177 = arith.constant 0 : index
    %c0_178 = arith.constant 0 : index
    %493 = vector.load %arg28[%c0_177, %c0_178] : memref<1x32xf32, #tpu.memory_space<vmem>>, vector<1x32xf32>
    %494 = vector.broadcast %493 : vector<1x32xf32> to vector<2x32xf32>
    %495 = arith.mulf %492, %494 : vector<2x32xf32>
    %cst_179 = arith.constant dense<0.000000e+00> : vector<2xf32>
    %496 = vector.multi_reduction <add>, %495, %cst_179 [1] : vector<2x32xf32> to vector<2xf32>
    %497 = vector.shape_cast %496 : vector<2xf32> to vector<2x1xf32>
    %c0_180 = arith.constant 0 : index
    %c0_181 = arith.constant 0 : index
    %498 = vector.load %arg29[%c0_180, %c0_181] : memref<1x1xf32, #tpu.memory_space<vmem>>, vector<1x1xf32>
    %499 = vector.broadcast %498 : vector<1x1xf32> to vector<2x1xf32>
    %500 = arith.addf %497, %499 : vector<2x1xf32>
    %cst_182 = arith.constant 0.000000e+00 : f32
    %501 = vector.broadcast %cst_182 : f32 to vector<2x1xf32>
    %502 = arith.subf %501, %500 : vector<2x1xf32>
    %503 = math.exp %502 : vector<2x1xf32>
    %cst_183 = arith.constant 1.000000e+00 : f32
    %504 = vector.broadcast %cst_183 : f32 to vector<2x1xf32>
    %505 = arith.addf %504, %503 : vector<2x1xf32>
    %506 = tpu.reciprocal %505 {approx = true} : vector<2x1xf32> -> vector<2x1xf32>
    %c0_184 = arith.constant 0 : index
    %c0_185 = arith.constant 0 : index
    %507 = vector.load %arg30[%c0_184, %c0_185] : memref<2x1xf32, #tpu.memory_space<vmem>>, vector<2x1xf32>
    tpu.vector_store %arg30[%c0_184, %c0_185], %506 {strides = array<i32>} : memref<2x1xf32, #tpu.memory_space<vmem>>, vector<2x1xf32>,
    return
  }
  func.func @transform_0(%arg0: i32) -> (i32, i32) {
    %c0_i32 = arith.constant 0 : i32
    %c0_i32_0 = arith.constant 0 : i32
    %c0_i32_1 = arith.constant 0 : i32
    return %c0_i32, %c0_i32_0 : i32, i32
  }
  func.func @transform_1(%arg0: i32) -> (i32, i32) {
    %c0_i32 = arith.constant 0 : i32
    %c0_i32_0 = arith.constant 0 : i32
    %c0_i32_1 = arith.constant 0 : i32
    return %c0_i32, %c0_i32_0 : i32, i32
  }
  func.func @transform_2(%arg0: i32) -> (i32, i32) {
    %c0_i32 = arith.constant 0 : i32
    %c0_i32_0 = arith.constant 0 : i32
    %c0_i32_1 = arith.constant 0 : i32
    return %c0_i32, %c0_i32_0 : i32, i32
  }
  func.func @transform_3(%arg0: i32) -> (i32, i32) {
    %c0_i32 = arith.constant 0 : i32
    %c0_i32_0 = arith.constant 0 : i32
    %c0_i32_1 = arith.constant 0 : i32
    return %c0_i32, %c0_i32_0 : i32, i32
  }
  func.func @transform_4(%arg0: i32) -> (i32, i32) {
    %c0_i32 = arith.constant 0 : i32
    %c0_i32_0 = arith.constant 0 : i32
    %c0_i32_1 = arith.constant 0 : i32
    return %c0_i32, %c0_i32_0 : i32, i32
  }
  func.func @transform_5(%arg0: i32) -> (i32, i32) {
    %c0_i32 = arith.constant 0 : i32
    %c0_i32_0 = arith.constant 0 : i32
    %c0_i32_1 = arith.constant 0 : i32
    return %c0_i32, %c0_i32_0 : i32, i32
  }
  func.func @transform_6(%arg0: i32) -> (i32, i32) {
    %c0_i32 = arith.constant 0 : i32
    %c0_i32_0 = arith.constant 0 : i32
    %c0_i32_1 = arith.constant 0 : i32
    return %c0_i32, %c0_i32_0 : i32, i32
  }
  func.func @transform_7(%arg0: i32) -> (i32, i32) {
    %c0_i32 = arith.constant 0 : i32
    %c0_i32_0 = arith.constant 0 : i32
    %c0_i32_1 = arith.constant 0 : i32
    return %c0_i32, %c0_i32_0 : i32, i32
  }
  func.func @transform_8(%arg0: i32) -> (i32, i32) {
    %c0_i32 = arith.constant 0 : i32
    %c0_i32_0 = arith.constant 0 : i32
    %c0_i32_1 = arith.constant 0 : i32
    return %c0_i32, %c0_i32_0 : i32, i32
  }
  func.func @transform_9(%arg0: i32) -> (i32, i32) {
    %c0_i32 = arith.constant 0 : i32
    %c0_i32_0 = arith.constant 0 : i32
    %c0_i32_1 = arith.constant 0 : i32
    return %c0_i32, %c0_i32_0 : i32, i32
  }
  func.func @transform_10(%arg0: i32) -> (i32, i32) {
    %c0_i32 = arith.constant 0 : i32
    %c0_i32_0 = arith.constant 0 : i32
    %c0_i32_1 = arith.constant 0 : i32
    return %c0_i32, %c0_i32_0 : i32, i32
  }
  func.func @transform_11(%arg0: i32) -> (i32, i32) {
    %c0_i32 = arith.constant 0 : i32
    %c0_i32_0 = arith.constant 0 : i32
    %c0_i32_1 = arith.constant 0 : i32
    return %c0_i32, %c0_i32_0 : i32, i32
  }
  func.func @transform_12(%arg0: i32) -> (i32, i32) {
    %c0_i32 = arith.constant 0 : i32
    %c0_i32_0 = arith.constant 0 : i32
    %c0_i32_1 = arith.constant 0 : i32
    return %c0_i32, %c0_i32_0 : i32, i32
  }
  func.func @transform_13(%arg0: i32) -> (i32, i32) {
    %c0_i32 = arith.constant 0 : i32
    %c0_i32_0 = arith.constant 0 : i32
    %c0_i32_1 = arith.constant 0 : i32
    return %c0_i32, %c0_i32_0 : i32, i32
  }
  func.func @transform_14(%arg0: i32) -> (i32, i32) {
    %c0_i32 = arith.constant 0 : i32
    %c0_i32_0 = arith.constant 0 : i32
    %c0_i32_1 = arith.constant 0 : i32
    return %c0_i32, %c0_i32_0 : i32, i32
  }
  func.func @transform_15(%arg0: i32) -> (i32, i32) {
    %c0_i32 = arith.constant 0 : i32
    %c0_i32_0 = arith.constant 0 : i32
    %c0_i32_1 = arith.constant 0 : i32
    return %c0_i32, %c0_i32_0 : i32, i32
  }
  func.func @transform_16(%arg0: i32) -> (i32, i32) {
    %c0_i32 = arith.constant 0 : i32
    %c0_i32_0 = arith.constant 0 : i32
    %c0_i32_1 = arith.constant 0 : i32
    return %c0_i32, %c0_i32_0 : i32, i32
  }
  func.func @transform_17(%arg0: i32) -> (i32, i32) {
    %c0_i32 = arith.constant 0 : i32
    %c0_i32_0 = arith.constant 0 : i32
    %c0_i32_1 = arith.constant 0 : i32
    return %c0_i32, %c0_i32_0 : i32, i32
  }
  func.func @transform_18(%arg0: i32) -> (i32, i32) {
    %c0_i32 = arith.constant 0 : i32
    %c0_i32_0 = arith.constant 0 : i32
    %c0_i32_1 = arith.constant 0 : i32
    return %c0_i32, %c0_i32_0 : i32, i32
  }
  func.func @transform_19(%arg0: i32) -> (i32, i32) {
    %c0_i32 = arith.constant 0 : i32
    %c0_i32_0 = arith.constant 0 : i32
    %c0_i32_1 = arith.constant 0 : i32
    return %c0_i32, %c0_i32_0 : i32, i32
  }
  func.func @transform_20(%arg0: i32) -> (i32, i32) {
    %c0_i32 = arith.constant 0 : i32
    %c0_i32_0 = arith.constant 0 : i32
    %c0_i32_1 = arith.constant 0 : i32
    return %c0_i32, %c0_i32_0 : i32, i32
  }
  func.func @transform_21(%arg0: i32) -> (i32, i32) {
    %c0_i32 = arith.constant 0 : i32
    %c0_i32_0 = arith.constant 0 : i32
    %c0_i32_1 = arith.constant 0 : i32
    return %c0_i32, %c0_i32_0 : i32, i32
  }
  func.func @transform_22(%arg0: i32) -> (i32, i32) {
    %c0_i32 = arith.constant 0 : i32
    %c0_i32_0 = arith.constant 0 : i32
    %c0_i32_1 = arith.constant 0 : i32
    return %c0_i32, %c0_i32_0 : i32, i32
  }
  func.func @transform_23(%arg0: i32) -> (i32, i32) {
    %c0_i32 = arith.constant 0 : i32
    %c0_i32_0 = arith.constant 0 : i32
    %c0_i32_1 = arith.constant 0 : i32
    return %c0_i32, %c0_i32_0 : i32, i32
  }
  func.func @transform_24(%arg0: i32) -> (i32, i32) {
    %c0_i32 = arith.constant 0 : i32
    %c0_i32_0 = arith.constant 0 : i32
    %c0_i32_1 = arith.constant 0 : i32
    return %c0_i32, %c0_i32_0 : i32, i32
  }
  func.func @transform_25(%arg0: i32) -> (i32, i32) {
    %c0_i32 = arith.constant 0 : i32
    %c0_i32_0 = arith.constant 0 : i32
    %c0_i32_1 = arith.constant 0 : i32
    return %c0_i32, %c0_i32_0 : i32, i32
  }
  func.func @transform_26(%arg0: i32) -> (i32, i32) {
    %c0_i32 = arith.constant 0 : i32
    %c0_i32_0 = arith.constant 0 : i32
    %c0_i32_1 = arith.constant 0 : i32
    return %c0_i32, %c0_i32_0 : i32, i32
  }
  func.func @transform_27(%arg0: i32) -> (i32, i32) {
    %c0_i32 = arith.constant 0 : i32
    %c0_i32_0 = arith.constant 0 : i32
    %c0_i32_1 = arith.constant 0 : i32
    return %c0_i32, %c0_i32_0 : i32, i32
  }
  func.func @transform_28(%arg0: i32) -> (i32, i32) {
    %c0_i32 = arith.constant 0 : i32
    %c0_i32_0 = arith.constant 0 : i32
    %c0_i32_1 = arith.constant 0 : i32
    return %c0_i32, %c0_i32_0 : i32, i32
  }
  func.func @transform_29(%arg0: i32) -> (i32, i32) {
    %c0_i32 = arith.constant 0 : i32
    %c0_i32_0 = arith.constant 0 : i32
    %c0_i32_1 = arith.constant 0 : i32
    return %c0_i32, %c0_i32_0 : i32, i32
  }
}

</mosaic_0001>

<bundles_post_ra>
// kernel: tpu_custom_call.1
= control target key start
LH: loop header
LB: loop body
LE: loop exit
PB: predicated region body
PF: predicated region fallthrough
CT: control target
= control target key end

     0   :  { %s7600_s6 = smov 1   ;;  %s7601_s10 = smov 2   ;;  %s8516_s0 = inlined_call_operand.smem [shape: u32[30], index: -1, kind: input, shape index: {}] }
   0x1   :  { %s7663_s5 = sld [smem:[%s8516_s0]]   ;;  %s7602_s14 = smov 3  }
   0x2   :  { %s7668_s9 = sld [smem:[%s8516_s0 + %s7600_s6]]   ;;  %s7603_s18 = smov 4  }
   0x3   :  { %s7673_s13 = sld [smem:[%s8516_s0 + %s7601_s10]]   ;;  %s7604_s22 = smov 5  }
   0x4   :  { %s7678_s17 = sld [smem:[%s8516_s0 + %s7602_s14]]   ;;  %s7605_s26 = smov 6  }
   0x5   :  { %s7683_s21 = sld [smem:[%s8516_s0 + %s7603_s18]]   ;;  %s7606_s30 = smov 7  }
   0x6   :  { %s7688_s25 = sld [smem:[%s8516_s0 + %s7604_s22]]   ;;  %s7607_s4 = smov 8  }
   0x7   :  { %s7693_s29 = sld [smem:[%s8516_s0 + %s7605_s26]]   ;;  %s7608_s10 = smov 9  }
   0x8   :  { %s7698_s3 = sld [smem:[%s8516_s0 + %s7606_s30]]   ;;  %s7609_s15 = smov 10  }
   0x9   :  { %s7703_s8 = sld [smem:[%s8516_s0 + %s7607_s4]]   ;;  %s7610_s20 = smov 11  }
   0xa   :  { %s7708_s14 = sld [smem:[%s8516_s0 + %s7608_s10]]   ;;  %s7611_s26 = smov 12  }
   0xb   :  { %s7713_s19 = sld [smem:[%s8516_s0 + %s7609_s15]]   ;;  %s7612_s1 = smov 13  }
   0xc   :  { %s7718_s24 = sld [smem:[%s8516_s0 + %s7610_s20]]   ;;  %s7613_s7 = smov 14  }
   0xd   :  { %s7723_s30 = sld [smem:[%s8516_s0 + %s7611_s26]]   ;;  %s7614_s15 = smov 15  }
   0xe   :  { %s7728_s6 = sld [smem:[%s8516_s0 + %s7612_s1]]   ;;  %s7615_s22 = smov 16  }
   0xf   :  { %s7733_s12 = sld [smem:[%s8516_s0 + %s7613_s7]]   ;;  %s7616_s28 = smov 17  }
  0x10   :  { %8523 = sst [smem:[#allocation29_spill]] %s7708_s14  ;;  %s7617_s7 = smov 18  }
  0x11   :  { %s7738_s20 = sld [smem:[%s8516_s0 + %s7614_s15]]   ;;  %s7618_s15 = smov 19  }
  0x12   :  { %8524 = sst [smem:[#allocation30_spill]] %s7718_s24  ;;  %s7628_s1 = smov 29  }
  0x13   :  { %s7743_s27 = sld [smem:[%s8516_s0 + %s7615_s22]]   ;;  %s7619_s22 = smov 20  }
  0x14   :  { %s7748_s4 = sld [smem:[%s8516_s0 + %s7616_s28]]   ;;  %s7620_s28 = smov 21  }
  0x15   :  { %s7753_s24 = sld [smem:[%s8516_s0 + %s7617_s7]]   ;;  %s7621_s7 = smov 22  }
  0x16   :  { %s7763_s14 = sld [smem:[%s8516_s0 + %s7619_s22]]   ;;  %s7623_s22 = smov 24  }
  0x17   :  { %8525 = sst [smem:[#allocation31_spill]] %s7738_s20 }
  0x18   :  { %s7758_s20 = sld [smem:[%s8516_s0 + %s7618_s15]]   ;;  %s7622_s15 = smov 23  }
  0x1a   :  { %8526 = sst [smem:[#allocation32_spill]] %s7748_s4 }
  0x1b   :  { %8527 = sst [smem:[#allocation33_spill]] %s7753_s24 }
  0x1c   :  { %8529 = sst [smem:[#allocation35_spill]] %s7763_s14 }
  0x1d   :  { %s7768_s4 = sld [smem:[%s8516_s0 + %s7620_s28]]   ;;  %s7624_s28 = smov 25  }
  0x1e   :  { %8528 = sst [smem:[#allocation34_spill]] %s7758_s20 }
  0x1f   :  { %s7773_s24 = sld [smem:[%s8516_s0 + %s7621_s7]]   ;;  %s7625_s7 = smov 26  }
  0x20   :  { %s7778_s20 = sld [smem:[%s8516_s0 + %s7622_s15]]   ;;  %s7626_s15 = smov 27  }
  0x21   :  { %s7783_s14 = sld [smem:[%s8516_s0 + %s7623_s22]]   ;;  %s7627_s22 = smov 28  }
  0x23   :  { %8530 = sst [smem:[#allocation36_spill]] %s7768_s4 }
  0x24   :  { %s7788_s4 = sld [smem:[%s8516_s0 + %s7624_s28]]  }
  0x25   :  { %8531 = sst [smem:[#allocation37_spill]] %s7773_s24 }
  0x26   :  { %8532 = sst [smem:[#allocation38_spill]] %s7778_s20 }
  0x27   :  { %8533 = sst [smem:[#allocation39_spill]] %s7783_s14 }
  0x28   :  { %s7793_s24 = sld [smem:[%s8516_s0 + %s7625_s7]]  }
  0x29   :  { %s7798_s20 = sld [smem:[%s8516_s0 + %s7626_s15]]  }
  0x2a   :  { %8534 = sst [smem:[#allocation40_spill]] %s7788_s4 }
  0x2b   :  { %s5891_s14 = sld [smem:[%s8516_s0 + %s7627_s22]]  }
  0x2c   :  { %s7806_s4 = sld [smem:[%s8516_s0 + %s7628_s1]]  }
  0x31   :  { %v64_v0 = vstv %s5891_s14 }
  0x32   :  { %65 = vst [vmem:[#allocation2] sm:$0x1] %v64_v0 }
  0x33   :  { %66 = vsyncpa [#allocation4], 0 }
  0x34   :  { %67 = vsyncpa [#allocation6], 0 }
  0x35   :  { %68 = vsyncpa [#allocation9], 0 }
  0x36   :  { %69 = vsyncpa [#allocation12], 0 }
  0x37   :  { %70 = vsyncpa [#allocation15], 0 }
  0x38   :  { %71 = vsyncpa [#allocation18], 0 }
  0x39   :  { %72 = vsyncpa [#allocation21], 0  ;;  %s7629_s7 = smov [#allocation5]   ;;  %s7322_s11 = scalar_lea.hbm %s7668_s9, 256 }
  0x3a   :  { %s88_s10 = sshll.u32 %s7629_s7, 4  ;;  %p7323_p0 = scmp.ne.s32.totalorder %s7668_s9, %s7322_s11  ;;  %s89_s10 = int_to_ptr.vmem [resolvable:$true] %s88_s10 }
  0x3b   :  { %p7326_p1 = scmp.lt.u32.totalorder %s7322_s11, %s7668_s9 }
  0x3d   :  { %p7328_p2 = pnand %p7326_p1, %p7323_p0 }
  0x3f   :  { %7331 = shalt.err (!%p7328_p2)
}
  0x40   :  { %s7332_s0 = scalar_lea.vmem %s89_s10, 256  ;;  %p7337_p4 = scmp.lt.s32.totalorder %s89_s10, %s89_s10 }
  0x41   :  { %p7333_p3 = scmp.ne.s32.totalorder %s89_s10, %s7332_s0  ;;  %p7338_p5 = scmp.lt.s32.totalorder %s7332_s0, %s7332_s0 }
  0x43   :  { %p7339_p6 = por %p7338_p5, %p7337_p4 }
  0x45   :  { %p7340_p7 = pnand %p7339_p6, %p7333_p3 }
  0x47   :  { %7343 = shalt.err (!%p7340_p7)
}
  0x48   :  { %s7630_s14 = smov 128   ;;  %s7631_s15 = smov 8  }
  0x49   :  { %94 = dma.hbm_to_vmem [thread:$0]  %s7668_s9, 256, %s89_s10, [#allocation6], %s7630_s14, %s7630_s14, %s7631_s15  }
  0x4a   :  { %s7632_s16 = smov [#allocation8]   ;;  %s7633_s22 = smov [#allocation11]  }
  0x4b   :  { %s115_s18 = sshll.u32 %s7632_s16, 4  ;;  %s137_s23 = sshll.u32 %s7633_s22, 4  ;;  %s116_s18 = int_to_ptr.vmem [resolvable:$true] %s115_s18  ;;  %s138_s23 = int_to_ptr.vmem [resolvable:$true] %s137_s23 }
  0x4c   :  { %s7344_s26 = scalar_lea.hbm %s7683_s21, 16 }
  0x4d   :  { %p7345_p8 = scmp.ne.s32.totalorder %s7683_s21, %s7344_s26  ;;  %p7348_p9 = scmp.lt.u32.totalorder %s7344_s26, %s7683_s21 }
  0x4f   :  { %p7350_p10 = pnand %p7348_p9, %p7345_p8 }
  0x51   :  { %7353 = shalt.err (!%p7350_p10)
}
  0x52   :  { %s7354_s1 = scalar_lea.vmem %s116_s18, 16  ;;  %s7358_s28 = scalar_lea.vmem %s116_s18, 32 }
  0x53   :  { %p7355_p11 = scmp.ne.s32.totalorder %s116_s18, %s7354_s1  ;;  %p7359_p12 = scmp.lt.s32.totalorder %s116_s18, %s116_s18 }
  0x54   :  { %p7360_p13 = scmp.lt.s32.totalorder %s7358_s28, %s7354_s1 }
  0x56   :  { %p7361_p0 = por %p7360_p13, %p7359_p12 }
  0x58   :  { %p7362_p1 = pnand %p7361_p0, %p7355_p11 }
  0x5a   :  { %7365 = shalt.err (!%p7362_p1)
}
  0x5b   :  { %118 = dma.hbm_to_vmem [thread:$0]  %s7683_s21, 16, %s116_s18, [#allocation9]  }
  0x5c   :  { %s7366_s9 = scalar_lea.hbm %s7698_s3, 16 }
  0x5d   :  { %p7367_p2 = scmp.ne.s32.totalorder %s7698_s3, %s7366_s9  ;;  %p7370_p3 = scmp.lt.u32.totalorder %s7366_s9, %s7698_s3 }
  0x5f   :  { %p7372_p4 = pnand %p7370_p3, %p7367_p2 }
  0x61   :  { %7375 = shalt.err (!%p7372_p4)
}
  0x62   :  { %s7376_s2 = scalar_lea.vmem %s138_s23, 16  ;;  %s7380_s7 = scalar_lea.vmem %s138_s23, 32 }
  0x63   :  { %p7377_p5 = scmp.ne.s32.totalorder %s138_s23, %s7376_s2  ;;  %p7381_p6 = scmp.lt.s32.totalorder %s138_s23, %s138_s23 }
  0x64   :  { %p7382_p7 = scmp.lt.s32.totalorder %s7380_s7, %s7376_s2 }
  0x66   :  { %p7383_p8 = por %p7382_p7, %p7381_p6 }
  0x68   :  { %p7384_p9 = pnand %p7383_p8, %p7377_p5 }
  0x6a   :  { %7387 = shalt.err (!%p7384_p9)
}
  0x6b   :  { %140 = dma.hbm_to_vmem [thread:$0]  %s7698_s3, 16, %s138_s23, [#allocation12]  }
  0x6c   :  { %s7634_s21 = smov [#allocation14]   ;;  %s7635_s11 = smov [#allocation17]  }
  0x6d   :  { %s159_s10 = sshll.u32 %s7634_s21, 4  ;;  %s181_s0 = sshll.u32 %s7635_s11, 4  ;;  %s160_s10 = int_to_ptr.vmem [resolvable:$true] %s159_s10  ;;  %s182_s0 = int_to_ptr.vmem [resolvable:$true] %s181_s0 }
  0x6e   :  { %s7388_s16 = scalar_lea.hbm %s7713_s19, 16 }
  0x6f   :  { %p7389_p10 = scmp.ne.s32.totalorder %s7713_s19, %s7388_s16  ;;  %p7392_p11 = scmp.lt.u32.totalorder %s7388_s16, %s7713_s19 }
  0x71   :  { %p7394_p12 = pnand %p7392_p11, %p7389_p10 }
  0x73   :  { %7397 = shalt.err (!%p7394_p12)
}
  0x74   :  { %s7398_s18 = scalar_lea.vmem %s160_s10, 16  ;;  %s7402_s22 = scalar_lea.vmem %s160_s10, 32 }
  0x75   :  { %p7399_p13 = scmp.ne.s32.totalorder %s160_s10, %s7398_s18  ;;  %p7403_p0 = scmp.lt.s32.totalorder %s160_s10, %s160_s10 }
  0x76   :  { %p7404_p1 = scmp.lt.s32.totalorder %s7402_s22, %s7398_s18 }
  0x78   :  { %p7405_p2 = por %p7404_p1, %p7403_p0 }
  0x7a   :  { %p7406_p3 = pnand %p7405_p2, %p7399_p13 }
  0x7c   :  { %7409 = shalt.err (!%p7406_p3)
}
  0x7d   :  { %162 = dma.hbm_to_vmem [thread:$0]  %s7713_s19, 16, %s160_s10, [#allocation15]  }
  0x7e   :  { %s7410_s3 = scalar_lea.hbm %s7728_s6, 16 }
  0x7f   :  { %p7411_p4 = scmp.ne.s32.totalorder %s7728_s6, %s7410_s3  ;;  %p7414_p5 = scmp.lt.u32.totalorder %s7410_s3, %s7728_s6 }
  0x81   :  { %p7416_p6 = pnand %p7414_p5, %p7411_p4 }
  0x83   :  { %7419 = shalt.err (!%p7416_p6)
}
  0x84   :  { %s7420_s23 = scalar_lea.vmem %s182_s0, 16  ;;  %s7424_s26 = scalar_lea.vmem %s182_s0, 32 }
  0x85   :  { %p7421_p7 = scmp.ne.s32.totalorder %s182_s0, %s7420_s23  ;;  %p7425_p8 = scmp.lt.s32.totalorder %s182_s0, %s182_s0 }
  0x86   :  { %p7426_p9 = scmp.lt.s32.totalorder %s7424_s26, %s7420_s23 }
  0x88   :  { %p7427_p10 = por %p7426_p9, %p7425_p8 }
  0x8a   :  { %p7428_p11 = pnand %p7427_p10, %p7421_p7 }
  0x8c   :  { %7431 = shalt.err (!%p7428_p11)
}
  0x8d   :  { %184 = dma.hbm_to_vmem [thread:$0]  %s7728_s6, 16, %s182_s0, [#allocation18]  }
  0x8e   :  { %s7636_s19 = smov [#allocation3]   ;;  %s7637_s28 = smov [#allocation7]  }
  0x8f   :  { %s79_s1 = sshll.u32 %s7636_s19, 4  ;;  %s100_s9 = sshll.u32 %s7637_s28, 4  ;;  %s80_s1 = int_to_ptr.vmem [resolvable:$true] %s79_s1  ;;  %s101_s9 = int_to_ptr.vmem [resolvable:$true] %s100_s9 }
  0x90   :  { %s7432_s2 = scalar_lea.hbm %s7663_s5, 32 }
  0x91   :  { %p7433_p12 = scmp.ne.s32.totalorder %s7663_s5, %s7432_s2  ;;  %p7436_p13 = scmp.lt.u32.totalorder %s7432_s2, %s7663_s5 }
  0x93   :  { %p7438_p0 = pnand %p7436_p13, %p7433_p12 }
  0x95   :  { %7441 = shalt.err (!%p7438_p0)
}
  0x96   :  { %s7442_s7 = scalar_lea.vmem %s80_s1, 32  ;;  %p7447_p2 = scmp.lt.s32.totalorder %s80_s1, %s80_s1 }
  0x97   :  { %p7443_p1 = scmp.ne.s32.totalorder %s80_s1, %s7442_s7  ;;  %p7448_p3 = scmp.lt.s32.totalorder %s7442_s7, %s7442_s7 }
  0x99   :  { %p7449_p4 = por %p7448_p3, %p7447_p2 }
  0x9b   :  { %p7450_p5 = pnand %p7449_p4, %p7443_p1 }
  0x9d   :  { %7453 = shalt.err (!%p7450_p5)
}
  0x9e   :  { %82 = dma.hbm_to_vmem [thread:$0]  %s7663_s5, 32, %s80_s1, [#allocation4]  }
  0x9f   :  { %s7454_s6 = scalar_lea.hbm %s7673_s13, 256 }
  0xa0   :  { %p7455_p6 = scmp.ne.s32.totalorder %s7673_s13, %s7454_s6  ;;  %p7458_p7 = scmp.lt.u32.totalorder %s7454_s6, %s7673_s13 }
  0xa2   :  { %p7460_p8 = pnand %p7458_p7, %p7455_p6 }
  0xa4   :  { %7463 = shalt.err (!%p7460_p8)
}
  0xa5   :  { %s7464_s21 = scalar_lea.vmem %s101_s9, 256  ;;  %p7469_p10 = scmp.lt.s32.totalorder %s101_s9, %s101_s9 }
  0xa6   :  { %p7465_p9 = scmp.ne.s32.totalorder %s101_s9, %s7464_s21  ;;  %p7470_p11 = scmp.lt.s32.totalorder %s7464_s21, %s7464_s21 }
  0xa8   :  { %p7471_p12 = por %p7470_p11, %p7469_p10 }
  0xaa   :  { %p7472_p13 = pnand %p7471_p12, %p7465_p9 }
  0xac   :  { %7475 = shalt.err (!%p7472_p13)
}
  0xad   :  { %106 = dma.hbm_to_vmem [thread:$0]  %s7673_s13, 256, %s101_s9, [#allocation6], %s7630_s14, %s7630_s14, %s7631_s15  }
  0xae   :  { %s7638_s5 = smov [#allocation10]   ;;  %s7639_s11 = smov [#allocation13]  }
  0xaf   :  { %s127_s10 = sshll.u32 %s7638_s5, 4  ;;  %s147_s0 = sshll.u32 %s7639_s11, 4  ;;  %s128_s10 = int_to_ptr.vmem [resolvable:$true] %s127_s10  ;;  %s148_s0 = int_to_ptr.vmem [resolvable:$true] %s147_s0 }
  0xb0   :  { %s7476_s16 = scalar_lea.hbm %s7693_s29, 16 }
  0xb1   :  { %p7477_p0 = scmp.ne.s32.totalorder %s7693_s29, %s7476_s16  ;;  %p7480_p1 = scmp.lt.u32.totalorder %s7476_s16, %s7693_s29 }
  0xb3   :  { %p7482_p2 = pnand %p7480_p1, %p7477_p0 }
  0xb5   :  { %7485 = shalt.err (!%p7482_p2)
}
  0xb6   :  { %s7486_s18 = scalar_lea.vmem %s128_s10, 16  ;;  %s7490_s22 = scalar_lea.vmem %s128_s10, 32 }
  0xb7   :  { %p7487_p3 = scmp.ne.s32.totalorder %s128_s10, %s7486_s18  ;;  %p7491_p4 = scmp.lt.s32.totalorder %s128_s10, %s128_s10 }
  0xb8   :  { %p7492_p5 = scmp.lt.s32.totalorder %s7490_s22, %s7486_s18 }
  0xba   :  { %p7493_p6 = por %p7492_p5, %p7491_p4 }
  0xbc   :  { %p7494_p7 = pnand %p7493_p6, %p7487_p3 }
  0xbe   :  { %7497 = shalt.err (!%p7494_p7)
}
  0xbf   :  { %130 = dma.hbm_to_vmem [thread:$0]  %s7693_s29, 16, %s128_s10, [#allocation9]  }
  0xc0   :  { %s7498_s13 = scalar_lea.hbm %s7703_s8, 16 }
  0xc1   :  { %p7499_p8 = scmp.ne.s32.totalorder %s7703_s8, %s7498_s13  ;;  %p7502_p9 = scmp.lt.u32.totalorder %s7498_s13, %s7703_s8 }
  0xc3   :  { %p7504_p10 = pnand %p7502_p9, %p7499_p8 }
  0xc5   :  { %7507 = shalt.err (!%p7504_p10)
}
  0xc6   :  { %s7508_s14 = scalar_lea.vmem %s148_s0, 16  ;;  %s7512_s15 = scalar_lea.vmem %s148_s0, 32 }
  0xc7   :  { %p7509_p11 = scmp.ne.s32.totalorder %s148_s0, %s7508_s14  ;;  %p7513_p12 = scmp.lt.s32.totalorder %s148_s0, %s148_s0 }
  0xc8   :  { %p7514_p13 = scmp.lt.s32.totalorder %s7512_s15, %s7508_s14 }
  0xca   :  { %p7515_p0 = por %p7514_p13, %p7513_p12 }
  0xcc   :  { %p7516_p1 = pnand %p7515_p0, %p7509_p11 }
  0xce   :  { %7519 = shalt.err (!%p7516_p1)
}
  0xcf   :  { %150 = dma.hbm_to_vmem [thread:$0]  %s7703_s8, 16, %s148_s0, [#allocation12]  }
  0xd0   :  { %s7640_s29 = smov [#allocation16]   ;;  %s7641_s23 = smov [#allocation19]  }
  0xd1   :  { %s171_s3 = sshll.u32 %s7640_s29, 4  ;;  %s191_s26 = sshll.u32 %s7641_s23, 4  ;;  %s172_s3 = int_to_ptr.vmem [resolvable:$true] %s171_s3  ;;  %s192_s26 = int_to_ptr.vmem [resolvable:$true] %s191_s26 }
  0xd2   :  { %s7520_s19 = scalar_lea.hbm %s7723_s30, 16 }
  0xd3   :  { %p7521_p2 = scmp.ne.s32.totalorder %s7723_s30, %s7520_s19  ;;  %p7524_p3 = scmp.lt.u32.totalorder %s7520_s19, %s7723_s30 }
  0xd5   :  { %p7526_p4 = pnand %p7524_p3, %p7521_p2 }
  0xd7   :  { %7529 = shalt.err (!%p7526_p4)
}
  0xd8   :  { %s7530_s1 = scalar_lea.vmem %s172_s3, 16  ;;  %s7534_s28 = scalar_lea.vmem %s172_s3, 32 }
  0xd9   :  { %p7531_p5 = scmp.ne.s32.totalorder %s172_s3, %s7530_s1  ;;  %p7535_p6 = scmp.lt.s32.totalorder %s172_s3, %s172_s3 }
  0xda   :  { %p7536_p7 = scmp.lt.s32.totalorder %s7534_s28, %s7530_s1 }
  0xdc   :  { %p7537_p8 = por %p7536_p7, %p7535_p6 }
  0xde   :  { %p7538_p9 = pnand %p7537_p8, %p7531_p5 }
  0xe0   :  { %7541 = shalt.err (!%p7538_p9)
}
  0xe1   :  { %174 = dma.hbm_to_vmem [thread:$0]  %s7723_s30, 16, %s172_s3, [#allocation15]  }
  0xe2   :  { %s7542_s8 = scalar_lea.hbm %s7733_s12, 16 }
  0xe3   :  { %p7543_p10 = scmp.ne.s32.totalorder %s7733_s12, %s7542_s8  ;;  %p7546_p11 = scmp.lt.u32.totalorder %s7542_s8, %s7733_s12 }
  0xe5   :  { %p7548_p12 = pnand %p7546_p11, %p7543_p10 }
  0xe7   :  { %7551 = shalt.err (!%p7548_p12)
}
  0xe8   :  { %s7552_s9 = scalar_lea.vmem %s192_s26, 16  ;;  %s7556_s2 = scalar_lea.vmem %s192_s26, 32 }
  0xe9   :  { %p7553_p13 = scmp.ne.s32.totalorder %s192_s26, %s7552_s9  ;;  %p7557_p0 = scmp.lt.s32.totalorder %s192_s26, %s192_s26 }
  0xea   :  { %p7558_p1 = scmp.lt.s32.totalorder %s7556_s2, %s7552_s9 }
  0xec   :  { %p7559_p2 = por %p7558_p1, %p7557_p0 }
  0xee   :  { %p7560_p3 = pnand %p7559_p2, %p7553_p13 }
  0xf0   :  { %7563 = shalt.err (!%p7560_p3)
}
  0xf1   :  { %194 = dma.hbm_to_vmem [thread:$0]  %s7733_s12, 16, %s192_s26, [#allocation18]  }
  0xf2   :  { %s7642_s30 = smov [#allocation20]   ;;  %s7564_s6 = scalar_lea.hbm %s7743_s27, 16 }
  0xf3   :  { %s203_s7 = sshll.u32 %s7642_s30, 4  ;;  %p7565_p4 = scmp.ne.s32.totalorder %s7743_s27, %s7564_s6  ;;  %s204_s7 = int_to_ptr.vmem [resolvable:$true] %s203_s7 }
  0xf4   :  { %p7568_p5 = scmp.lt.u32.totalorder %s7564_s6, %s7743_s27 }
  0xf6   :  { %p7570_p6 = pnand %p7568_p5, %p7565_p4 }
  0xf8   :  { %7573 = shalt.err (!%p7570_p6)
}
  0xf9   :  { %s7574_s21 = scalar_lea.vmem %s204_s7, 16  ;;  %s7578_s5 = scalar_lea.vmem %s204_s7, 32 }
  0xfa   :  { %p7575_p7 = scmp.ne.s32.totalorder %s204_s7, %s7574_s21  ;;  %p7579_p8 = scmp.lt.s32.totalorder %s204_s7, %s204_s7 }
  0xfb   :  { %p7580_p9 = scmp.lt.s32.totalorder %s7578_s5, %s7574_s21 }
  0xfd   :  { %p7581_p10 = por %p7580_p9, %p7579_p8 }
  0xff   :  { %p7582_p11 = pnand %p7581_p10, %p7575_p7 }
 0x101   :  { %7585 = shalt.err (!%p7582_p11)
}
 0x102   :  { %206 = dma.hbm_to_vmem [thread:$0]  %s7743_s27, 16, %s204_s7, [#allocation21]  }
 0x103   :  { %7586 = dma.done.wait [#allocation4], 32  }
 0x104   :  { %7587 = vsyncadd [#allocation4], 4294967264 }
 0x105   :  { %7588 = dma.done.wait [#allocation6], 512  }
 0x106   :  { %7589 = vsyncadd [#allocation6], 4294966784 }
 0x107   :  { %7590 = dma.done.wait [#allocation9], 32  }
 0x108   :  { %7591 = vsyncadd [#allocation9], 4294967264 }
 0x109   :  { %7592 = dma.done.wait [#allocation12], 32  }
 0x10a   :  { %7593 = vsyncadd [#allocation12], 4294967264 }
 0x10b   :  { %7594 = dma.done.wait [#allocation15], 32  }
 0x10c   :  { %7595 = vsyncadd [#allocation15], 4294967264 }
 0x10d   :  { %7596 = dma.done.wait [#allocation18], 32  }
 0x10e   :  { %7597 = vsyncadd [#allocation18], 4294967264 }
 0x10f   :  { %7598 = dma.done.wait [#allocation21], 16  }
 0x110   :  { %7599 = vsyncadd [#allocation21], 4294967280  ;;  %v267_v1 = vld [vmem:[#allocation3] sm:$0x3]  ;;  %v309_v3 = vld [vmem:[%s7678_s17 + $0x8] sm:$0xff]  ;;  %s7643_s12 = smov 1   ;;  %v276_v7 = vlaneseq }
 0x111   :  { %v308_v2 = vld [vmem:[%s7678_s17] sm:$0xff]  ;;  %269 = vrot.lane.b32.xlu0 %v267_v1, %s7643_s12  ;;  %v310_v5 = vld [vmem:[%s7678_s17 + $0x10] sm:$0xff]  ;;  %v311_v6 = vld [vmem:[%s7678_s17 + $0x18] sm:$0xff]  ;;  %vm272_vm0 = vcmask 7168   ;;  %vm335_vm1 = vcmask 261120   ;;  %s7644_s17 = smov 88  }
 0x112   :  { %v6699_v4 = vpack.c.bf16 %v309_v3, %v308_v2  ;;  %v6703_v8 = vpack.c.bf16 %v311_v6, %v310_v5  ;;  %v277_v9 = vshrl.u32 %v276_v7, 7  ;;  %v275_v16 = vld [vmem:[#allocation5 + $0x8] sm:$0xff]  ;;  %v274_v17 = vld [vmem:[#allocation5] sm:$0xff]  ;;  %v303_v18 = vld [vmem:[#allocation7 + $0x8] sm:$0xff]  ;;  %s7645_s27 = smov 96   ;;  %s7646_s10 = smov 120  }
 0x113   :  { %v302_v21 = vld [vmem:[#allocation7] sm:$0xff]  ;;  %v7878_v29 = vld [vmem:[#allocation8] ss:$0 sm:$0xff]  ;;  %vm439_vm2 = vcmask 64512   ;;  %vm525_vm4 = vcmask 130048   ;;  %s7647_s11 = smov 56  }
 0x114   :  { %6700 = vmatprep.subr.bf16.mxu1 %v6699_v4  ;;  %v278_v10 = vsub.s32 0, %v277_v9  ;;  %v289_v14 = vsub.s32 1, %v277_v9  ;;  %vm7900_vm3 = vmpackc.low %vm439_vm2, %vm439_vm2  ;;  %s7648_s0 = smov 80   ;;  %s7649_s16 = smov 64   ;;  %vm2908_vm5 = vcmask 523264   ;;  %vm5824_vm6 = vcmask 1040384  }
 0x115   :  { %6702 = vmatpush3.bf16.msra.mxu1 %v6699_v4  ;;  %s7650_s18 = smov 112   ;;  %s7651_s22 = smov 104   ;;  %vm5834_vm7 = vcmask 254976   ;;  %vm5851_vm8 = vcmask 1024  }
 0x116   :  { %6704 = vmatprep.subr.bf16.mxu1 %v6703_v8  ;;  %s7652_s13 = smov 72   ;;  %s7653_s14 = smov 48  }
 0x117   :  { %s7654_s15 = smov 40   ;;  %s8538_s29 = sld [smem:[#allocation30_spill]] }
 0x118   :  { %s8539_s3 = sld [smem:[#allocation31_spill]]  ;;  %s8540_s23 = sld [smem:[#allocation32_spill]] }
 0x119   :  { %6706 = vmatpush3.bf16.msra.mxu1 %v6703_v8  ;;  %s8541_s26 = sld [smem:[#allocation33_spill]]  ;;  %s8542_s19 = sld [smem:[#allocation36_spill]] }
 0x11a   :  { %s8543_s1 = sld [smem:[#allocation34_spill]]  ;;  %s8544_s28 = sld [smem:[#allocation35_spill]] }
 0x11b   :  { %s8545_s8 = sld [smem:[#allocation38_spill]]  ;;  %s8546_s9 = sld [smem:[#allocation37_spill]] }
 0x11c   :  { %s8547_s2 = sld [smem:[#allocation39_spill]]  ;;  %s8548_s30 = sld [smem:[#allocation40_spill]] }
 0x183   :  { %v270_v11 = vpop.permute.xlu0 %269 }
 0x184   :  { %v273_v12 = vsel %vm272_vm0, 1.0, %v270_v11 }
 0x185   :  { %v279_v13 = vrot.slane %v273_v12, %v278_v10  ;;  %v290_v15 = vrot.slane %v273_v12, %v289_v14 }
 0x187   :  { %285 = vbcast.lane.b32.xlu1 %v279_v13, 264  ;;  %281 = vbcast.lane.b32.xlu0 %v279_v13, 256 }
 0x18b   :  { %292 = vbcast.lane.b32.xlu0 %v290_v15, 256 }
 0x1f9   :  { %v286_v19 = vpop.permute.xlu1 %285  ;;  %v282_v20 = vpop.permute.xlu0 %281 }
 0x1fa   :  { %v299_v22 = vmul.f32 %v286_v19, %v275_v16  ;;  %v298_v23 = vmul.f32 %v282_v20, %v274_v17 }
 0x1fc   :  { %v7866_v24 = vadd.f32 %v303_v18, %v299_v22  ;;  %v7868_v25 = vadd.f32 %v302_v21, %v298_v23 }
 0x1fd   :  { %v293_v26 = vpop.permute.xlu0 %292 }
 0x1fe   :  { %v300_v27 = vmul.f32 %v293_v26, %v274_v17  ;;  %6303 = vmatprep.mubr.msk.f32.mxu1 %vm335_vm1, %v7868_v25 }
 0x1ff   :  { %6304 = vmatmul.mubr.msk.f32.vlgmr.msra.gmra.mrb[0].mxu1 %vm335_vm1, %v7866_v24 }
 0x200   :  { %v7874_v28 = vadd.f32 %v302_v21, %v300_v27 }
 0x202   :  { %6306 = vmatprep.mubr.msk.f32.mxu1 %vm335_vm1, %v7874_v28 }
 0x2d2   :  { %v6305_v30 = vpop.f32.mrb[0].mxu1 }
 0x2d3   :  { %v7881_v31 = vadd.f32 %v6305_v30, %v7878_v29  ;;  %v414_v32 = vpop.f32.mrb[1].mxu1 }
 0x2d4   :  { %v7884_v33 = vadd.f32 %v7878_v29, %v414_v32 }
 0x2d6   :  { %v7888_v34 = vpack.i.bf16 %v7881_v31, %v7884_v33 }
 0x2d8   :  { %7008 = vrot.lane.b32.xlu0 %v7888_v34, %s7644_s17  ;;  %7003 = vrot.lane.b32.xlu1 %v7888_v34, %s7645_s27 }
 0x2dc   :  { %637 = vrot.lane.b32.xlu0 %v7881_v31, %s7646_s10  ;;  %296 = vbcast.lane.b32.xlu1 %v290_v15, 264 }
 0x2e0   :  { %635 = vrot.lane.b32.xlu1 %v7884_v33, %s7646_s10 }
 0x34a   :  { %v7004_v35 = vpop.permute.xlu1 %7003  ;;  %v7009_v36 = vpop.permute.xlu0 %7008 }
 0x34b   :  { %v7006_v37 = vunpack.i.h.bf16 %v7004_v35  ;;  %v7005_v38 = vunpack.i.l.bf16 %v7004_v35  ;;  %v7011_v39 = vunpack.i.h.bf16 %v7009_v36  ;;  %v7010_v40 = vunpack.i.l.bf16 %v7009_v36 }
 0x34d   :  { %v6707_v42 = vpack.c.bf16 %v7006_v37, %v7005_v38  ;;  %v6717_v43 = vpack.c.bf16 %v7011_v39, %v7010_v40 }
 0x34e   :  { %v297_v44 = vpop.permute.xlu1 %296  ;;  %v638_v48 = vpop.permute.xlu0 %637 }
 0x34f   :  { %v301_v45 = vmul.f32 %v297_v44, %v275_v16  ;;  %6709 = vmatprep.subr.msk.bf16.mxu1 %vm7900_vm3, %v6707_v42  ;;  %6719 = vmatprep.subr.msk.bf16.mxu0 %vm7900_vm3, %v6717_v43 }
 0x350   :  { %6712 = vmatpush3.bf16.xpose.msk.msra.mxu1 %vm7900_vm3, %v6707_v42  ;;  %6722 = vmatpush3.bf16.xpose.msk.msra.mxu0 %vm7900_vm3, %v6717_v43 }
 0x351   :  { %v7912_v46 = vadd.f32 %v303_v18, %v301_v45 }
 0x352   :  { %v636_v47 = vpop.permute.xlu1 %635 }
 0x353   :  { %6307 = vmatmul.mubr.msk.f32.gmra.mrb[2].mxu1 %vm335_vm1, %v7912_v46  ;;  %6327 = vmatprep.mubr.msk.f32.mxu0 %vm439_vm2, %v636_v47 }
 0x354   :  { %6313 = vmatprep.mubr.msk.f32.mxu1 %vm439_vm2, %v7884_v33 }
 0x357   :  { %6314 = vmatmul.mubr.msk.f32.vlgmr.msra.gmra.mrb[4].mxu1 %vm439_vm2, %v7881_v31  ;;  %6328 = vmatmul.mubr.msk.f32.vlgmr.msra.gmra.mrb[0].mxu0 %vm439_vm2, %v638_v48 }
 0x426   :  { %v7922_v49 = vpop.f32.mrb[2].mxu1 }
 0x427   :  { %v7924_v50 = vpop.f32.mrb[3].mxu1 }
 0x42a   :  { %v6315_v51 = vpop.f32.mrb[4].mxu1  ;;  %v6329_v52 = vpop.f32.mrb[0].mxu0 }
 0x42b   :  { %v524_v53 = vmul.f32 0.35355338, %v6315_v51  ;;  %v514_v54 = vpop.f32.mrb[5].mxu1  ;;  %v717_v55 = vpop.f32.mrb[1].mxu0  ;;  %v727_v59 = vmul.f32 0.35355338, %v6329_v52 }
 0x42c   :  { %v523_v56 = vmul.f32 0.35355338, %v514_v54  ;;  %v726_v57 = vmul.f32 0.35355338, %v717_v55 }
 0x42d   :  { %v529_v58 = vsel %vm525_vm4, %v524_v53, -inf  ;;  %v731_v62 = vsel %vm525_vm4, %v727_v59, -inf }
 0x42e   :  { %530 = vmax.xlane.f32.xlu0 %v529_v58  ;;  %v526_v60 = vsel %vm525_vm4, %v523_v56, -inf  ;;  %v728_v61 = vsel %vm525_vm4, %v726_v57, -inf }
 0x42f   :  { %527 = vmax.xlane.f32.xlu1 %v526_v60 }
 0x432   :  { %729 = vmax.xlane.f32.xlu0 %v728_v61  ;;  %v7973_v61 = vld [vmem:[%s7688_s25 + $0x8] sm:$0xff] }
 0x433   :  { %732 = vmax.xlane.f32.xlu1 %v731_v62  ;;  %6337 = vmatprep.subr.mxu0 %v7973_v61  ;;  %v7978_v62 = vld [vmem:[%s7688_s25] sm:$0xff] }
 0x434   :  { %6338 = vmatpush3.msra.mxu0 %v7973_v61 }
 0x435   :  { %6342 = vmatprep.subr.mxu0 %v7978_v62 }
 0x4bb   :  { %v531_v63 = vpop.xlane.xlu0 %530 }
 0x4bc   :  { %v533_v0 = vsub.f32 %v524_v53, %v531_v63  ;;  %v528_v1 = vpop.xlane.xlu1 %527 }
 0x4bd   :  { %v532_v2 = vsub.f32 %v523_v56, %v528_v1 }
 0x4be   :  { %v536_v3 = vmul.f32 1.442695, %v533_v0 }
 0x4bf   :  { %v534_v4 = vmul.f32 1.442695, %v532_v2  ;;  %v730_v5 = vpop.xlane.xlu0 %729 }
 0x4c0   :  { %7162 = vpow2.f32 %v536_v3  ;;  %v734_v6 = vsub.f32 %v726_v57, %v730_v5  ;;  %v733_v7 = vpop.xlane.xlu1 %732 }
 0x4c1   :  { %7164 = vpow2.f32 %v534_v4  ;;  %v735_v8 = vsub.f32 %v727_v59, %v733_v7  ;;  %v7967_v59 = vadd.f32 %v7878_v29, %v7924_v50 }
 0x4c2   :  { %v736_v9 = vmul.f32 1.442695, %v734_v6 }
 0x4c3   :  { %v738_v10 = vmul.f32 1.442695, %v735_v8 }
 0x4c4   :  { %7166 = vpow2.f32 %v736_v9 }
 0x4c5   :  { %7168 = vpow2.f32 %v738_v10 }
 0x4ca   :  { %v7163_v11 = vpop.eup %7162 }
 0x4cb   :  { %v7165_v12 = vpop.eup %7164  ;;  %v541_v13 = vsel %vm525_vm4, %v7163_v11, 0.0 }
 0x4cc   :  { %542 = vadd.xlane.f32.xlu1 %v541_v13  ;;  %v538_v14 = vsel %vm525_vm4, %v7165_v12, 0.0 }
 0x4cd   :  { %539 = vadd.xlane.f32.xlu0 %v538_v14 }
 0x4ce   :  { %v7167_v15 = vpop.eup %7166 }
 0x4cf   :  { %v7169_v16 = vpop.eup %7168  ;;  %v740_v17 = vsel %vm525_vm4, %v7167_v15, 0.0 }
 0x4d0   :  { %v743_v18 = vsel %vm525_vm4, %v7169_v16, 0.0 }
 0x4d1   :  { %744 = vadd.xlane.f32.xlu1 %v743_v18  ;;  %741 = vadd.xlane.f32.xlu0 %v740_v17 }
 0x4e2   :  { %7018 = vrot.lane.b32.xlu1 %v7888_v34, %s7647_s11 }
 0x4e6   :  { %7023 = vrot.lane.b32.xlu1 %v7888_v34, %s7648_s0 }
 0x4e7   :  { %7013 = vrot.lane.b32.xlu0 %v7888_v34, %s7649_s16 }
 0x4ea   :  { %1001 = vrot.lane.b32.xlu1 %v7881_v31, %s7650_s18 }
 0x4eb   :  { %999 = vrot.lane.b32.xlu0 %v7884_v33, %s7650_s18 }
 0x4ee   :  { %1284 = vrot.lane.b32.xlu1 %v7884_v33, %s7651_s22 }
 0x4ef   :  { %7028 = vrot.lane.b32.xlu0 %v7888_v34, %s7652_s13 }
 0x4f3   :  { %1286 = vrot.lane.b32.xlu0 %v7881_v31, %s7651_s22 }
 0x559   :  { %v543_v19 = vpop.xlane.xlu1 %542 }
 0x55a   :  { %v540_v20 = vpop.xlane.xlu0 %539 }
 0x55b   :  { %7170 = vrcp.f32 %v540_v20  ;;  %v7992_v20 = vadd.f32 %v7922_v49, %v7878_v29 }
 0x55c   :  { %7172 = vrcp.f32 %v543_v19 }
 0x55e   :  { %v745_v21 = vpop.xlane.xlu1 %744  ;;  %v742_v22 = vpop.xlane.xlu0 %741 }
 0x55f   :  { %7174 = vrcp.f32 %v745_v21  ;;  %v7996_v21 = vpack.i.bf16 %v7992_v20, %v7967_v59 }
 0x560   :  { %7176 = vrcp.f32 %v742_v22 }
 0x562   :  { %v7019_v23 = vpop.permute.xlu1 %7018  ;;  %v7014_v26 = vpop.permute.xlu0 %7013 }
 0x563   :  { %v7021_v27 = vunpack.i.h.bf16 %v7019_v23  ;;  %v7020_v30 = vunpack.i.l.bf16 %v7019_v23  ;;  %v7016_v32 = vunpack.i.h.bf16 %v7014_v26  ;;  %v7015_v33 = vunpack.i.l.bf16 %v7014_v26 }
 0x565   :  { %v7171_v35 = vpop.eup %7170  ;;  %v6713_v36 = vpack.c.bf16 %v7016_v32, %v7015_v33  ;;  %v6723_v43 = vpack.c.bf16 %v7021_v27, %v7020_v30 }
 0x566   :  { %v7173_v37 = vpop.eup %7172  ;;  %v7024_v38 = vpop.permute.xlu1 %7023  ;;  %v546_v39 = vmul.f32 %v7171_v35, %v7165_v12 }
 0x567   :  { %v7026_v31 = vunpack.i.h.bf16 %v7024_v38  ;;  %v7025_v40 = vunpack.i.l.bf16 %v7024_v38  ;;  %v1000_v42 = vpop.permute.xlu0 %999  ;;  %6714 = vmatprep.subr.bf16.mxu1 %v6713_v36  ;;  %v547_v45 = vmul.f32 %v7173_v37, %v7163_v11 }
 0x568   :  { %6716 = vmatpush3.bf16.msra.mxu1 %v6713_v36  ;;  %6320 = vmatprep.mubr.msk.f32.mxu1 %vm525_vm4, %v546_v39 }
 0x569   :  { %v7175_v44 = vpop.eup %7174  ;;  %6724 = vmatprep.subr.bf16.mxu1 %v6723_v43  ;;  %v6727_v48 = vpack.c.bf16 %v7026_v31, %v7025_v40 }
 0x56a   :  { %v7177_v47 = vpop.eup %7176  ;;  %v749_v53 = vmul.f32 %v7175_v44, %v7169_v16  ;;  %v1002_v57 = vpop.permute.xlu1 %1001 }
 0x56b   :  { %6321 = vmatmul.mubr.msk.f32.vlgmr.msra.gmra.mrb[6].mxu1 %vm525_vm4, %v547_v45  ;;  %v748_v51 = vmul.f32 %v7177_v47, %v7167_v15  ;;  %v7029_v52 = vpop.permute.xlu0 %7028 }
 0x56c   :  { %6726 = vmatpush3.bf16.msra.mxu1 %v6723_v43  ;;  %v7031_v54 = vunpack.i.h.bf16 %v7029_v52  ;;  %v7030_v55 = vunpack.i.l.bf16 %v7029_v52 }
 0x56d   :  { %6334 = vmatprep.mubr.msk.f32.mxu1 %vm525_vm4, %v748_v51  ;;  %6729 = vmatprep.subr.msk.bf16.mxu1 %vm7900_vm3, %v6727_v48 }
 0x56e   :  { %v6737_v56 = vpack.c.bf16 %v7031_v54, %v7030_v55  ;;  %v1285_v58 = vpop.permute.xlu1 %1284 }
 0x56f   :  { %6335 = vmatmul.mubr.msk.f32.vlgmr.msra.gmra.mrb[8].mxu1 %vm525_vm4, %v749_v53  ;;  %v1287_v60 = vpop.permute.xlu0 %1286 }
 0x570   :  { %6351 = vmatprep.mubr.msk.f32.mxu1 %vm439_vm2, %v1000_v42  ;;  %v8019_v42 = vld [vmem:[%s7688_s25 + $0x10] sm:$0xff] }
 0x575   :  { %6732 = vmatpush3.bf16.xpose.msk.msra.mxu1 %vm7900_vm3, %v6727_v48 }
 0x576   :  { %6739 = vmatprep.subr.msk.bf16.mxu1 %vm7900_vm3, %v6737_v56 }
 0x57c   :  { %6352 = vmatmul.mubr.msk.f32.vlgmr.msra.gmra.mrb[10].mxu1 %vm439_vm2, %v1002_v57 }
 0x57d   :  { %6742 = vmatpush3.bf16.xpose.msk.msra.mxu1 %vm7900_vm3, %v6737_v56  ;;  %6370 = vmatprep.mubr.msk.f32.mxu1 %vm439_vm2, %v1285_v58 }
 0x584   :  { %6371 = vmatmul.mubr.msk.f32.vlgmr.msra.gmra.mrb[12].mxu1 %vm439_vm2, %v1287_v60 }
 0x585   :  { %6389 = vmatprep.mubr.msk.f32.mxu1 %vm439_vm2, %v7967_v59 }
 0x63e   :  { %v6322_v63 = vpop.f32.mrb[6].mxu1 }
 0x63f   :  { %v626_v0 = vpop.f32.mrb[7].mxu1 }
 0x642   :  { %v6336_v50 = vpop.f32.mrb[8].mxu1 }
 0x643   :  { %v828_v1 = vpop.f32.mrb[9].mxu1 }
 0x644   :  { %6339 = vmatprep.mubr.msk.f32.mxu0 %vm439_vm2, %v828_v1 }
 0x645   :  { %6340 = vmatmul.mubr.msk.f32.vlgmr.msra.gmra.mrb[2].mxu0 %vm439_vm2, %v6336_v50 }
 0x646   :  { %6344 = vmatprep.mubr.msk.f32.mxu0 %vm439_vm2, %v626_v0  ;;  %6343 = vmatpush3.msra.mxu0 %v7978_v62 }
 0x64d   :  { %6345 = vmatmul.mubr.msk.f32.vlgmr.msra.gmra.mrb[2].mxu0 %vm439_vm2, %v6322_v63 }
 0x64f   :  { %v6353_v2 = vpop.f32.mrb[10].mxu1 }
 0x650   :  { %v1091_v3 = vmul.f32 0.35355338, %v6353_v2  ;;  %v1081_v4 = vpop.f32.mrb[11].mxu1 }
 0x651   :  { %v1090_v5 = vmul.f32 0.35355338, %v1081_v4 }
 0x652   :  { %v1095_v6 = vsel %vm525_vm4, %v1091_v3, -inf }
 0x653   :  { %1096 = vmax.xlane.f32.xlu0 %v1095_v6  ;;  %v1092_v7 = vsel %vm525_vm4, %v1090_v5, -inf }
 0x654   :  { %1093 = vmax.xlane.f32.xlu1 %v1092_v7 }
 0x657   :  { %v6372_v8 = vpop.f32.mrb[12].mxu1 }
 0x658   :  { %v1366_v9 = vpop.f32.mrb[13].mxu1  ;;  %v1376_v49 = vmul.f32 0.35355338, %v6372_v8 }
 0x659   :  { %v1375_v29 = vmul.f32 0.35355338, %v1366_v9 }
 0x65a   :  { %v1380_v23 = vsel %vm525_vm4, %v1376_v49, -inf }
 0x65b   :  { %v1377_v22 = vsel %vm525_vm4, %v1375_v29, -inf }
 0x6e0   :  { %v1097_v10 = vpop.xlane.xlu0 %1096 }
 0x6e1   :  { %v1099_v11 = vsub.f32 %v1091_v3, %v1097_v10  ;;  %v1094_v12 = vpop.xlane.xlu1 %1093 }
 0x6e2   :  { %v1098_v13 = vsub.f32 %v1090_v5, %v1094_v12 }
 0x6e3   :  { %v1102_v14 = vmul.f32 1.442695, %v1099_v11 }
 0x6e4   :  { %v1100_v15 = vmul.f32 1.442695, %v1098_v13 }
 0x6e5   :  { %7178 = vpow2.f32 %v1102_v14 }
 0x6e6   :  { %7180 = vpow2.f32 %v1100_v15 }
 0x6ef   :  { %v7179_v16 = vpop.eup %7178 }
 0x6f0   :  { %v7181_v17 = vpop.eup %7180  ;;  %v1107_v18 = vsel %vm525_vm4, %v7179_v16, 0.0 }
 0x6f1   :  { %1108 = vadd.xlane.f32.xlu1 %v1107_v18  ;;  %v1104_v19 = vsel %vm525_vm4, %v7181_v17, 0.0 }
 0x6f2   :  { %1105 = vadd.xlane.f32.xlu0 %v1104_v19 }
 0x702   :  { %7038 = vrot.lane.b32.xlu1 %v7996_v21, %s7645_s27 }
 0x706   :  { %7043 = vrot.lane.b32.xlu1 %v7996_v21, %s7644_s17 }
 0x708   :  { %7033 = vrot.lane.b32.xlu0 %v7888_v34, %s7653_s14 }
 0x70a   :  { %1771 = vrot.lane.b32.xlu1 %v7992_v20, %s7646_s10 }
 0x70c   :  { %1769 = vrot.lane.b32.xlu0 %v7967_v59, %s7646_s10 }
 0x72b   :  { %1378 = vmax.xlane.f32.xlu0 %v1377_v22 }
 0x72e   :  { %1381 = vmax.xlane.f32.xlu1 %v1380_v23 }
 0x73f   :  { %7048 = vrot.lane.b32.xlu1 %v7888_v34, %s7654_s15 }
 0x743   :  { %2133 = vrot.lane.b32.xlu1 %v7967_v59, %s7650_s18 }
 0x747   :  { %2135 = vrot.lane.b32.xlu1 %v7992_v20, %s7650_s18 }
 0x77e   :  { %v1109_v26 = vpop.xlane.xlu1 %1108 }
 0x77f   :  { %7182 = vrcp.f32 %v1109_v26  ;;  %v1106_v27 = vpop.xlane.xlu0 %1105 }
 0x780   :  { %7184 = vrcp.f32 %v1106_v27 }
 0x782   :  { %v7039_v30 = vpop.permute.xlu1 %7038 }
 0x783   :  { %v7041_v32 = vunpack.i.h.bf16 %v7039_v30  ;;  %v7040_v33 = vunpack.i.l.bf16 %v7039_v30  ;;  %v7034_v35 = vpop.permute.xlu0 %7033 }
 0x784   :  { %v7036_v36 = vunpack.i.h.bf16 %v7034_v35  ;;  %v7035_v37 = vunpack.i.l.bf16 %v7034_v35 }
 0x785   :  { %v6747_v38 = vpack.c.bf16 %v7041_v32, %v7040_v33 }
 0x786   :  { %v7044_v39 = vpop.permute.xlu1 %7043  ;;  %v6733_v34 = vpack.c.bf16 %v7036_v36, %v7035_v37  ;;  %v8054_v37 = vld [vmem:[%s7688_s25 + $0x18] sm:$0xff]  ;;  %s8537_s25 = sld [smem:[#allocation29_spill]] }
 0x787   :  { %v7046_v31 = vunpack.i.h.bf16 %v7044_v39  ;;  %v7045_v40 = vunpack.i.l.bf16 %v7044_v39  ;;  %6749 = vmatprep.subr.msk.bf16.mxu1 %vm7900_vm3, %v6747_v38  ;;  %v1770_v51 = vpop.permute.xlu0 %1769 }
 0x788   :  { %6734 = vmatprep.subr.bf16.mxu0 %v6733_v34  ;;  %6752 = vmatpush3.bf16.xpose.msk.msra.mxu1 %vm7900_vm3, %v6747_v38 }
 0x789   :  { %v7183_v43 = vpop.eup %7182  ;;  %v6757_v44 = vpack.c.bf16 %v7046_v31, %v7045_v40  ;;  %6736 = vmatpush3.bf16.msra.mxu0 %v6733_v34 }
 0x78a   :  { %v7185_v45 = vpop.eup %7184  ;;  %6361 = vmatprep.subr.mxu0 %v8019_v42  ;;  %v1113_v48 = vmul.f32 %v7183_v43, %v7179_v16  ;;  %v1772_v52 = vpop.permute.xlu1 %1771 }
 0x78b   :  { %6759 = vmatprep.subr.msk.bf16.mxu1 %vm7900_vm3, %v6757_v44  ;;  %v1112_v47 = vmul.f32 %v7185_v45, %v7181_v17 }
 0x78d   :  { %6358 = vmatprep.mubr.msk.f32.mxu0 %vm525_vm4, %v1112_v47 }
 0x78e   :  { %6359 = vmatmul.mubr.msk.f32.vlgmr.msra.gmra.mrb[4].mxu0 %vm525_vm4, %v1113_v48 }
 0x78f   :  { %6390 = vmatmul.mubr.msk.f32.vlgmr.msra.gmra.mrb[14].mxu1 %vm439_vm2, %v7992_v20  ;;  %6362 = vmatpush3.msra.mxu0 %v8019_v42 }
 0x790   :  { %6762 = vmatpush3.bf16.xpose.msk.msra.mxu1 %vm7900_vm3, %v6757_v44  ;;  %6403 = vmatprep.mubr.msk.f32.mxu1 %vm439_vm2, %v1770_v51 }
 0x797   :  { %6404 = vmatmul.mubr.msk.f32.vlgmr.msra.gmra.mrb[16].mxu1 %vm439_vm2, %v1772_v52 }
 0x7b8   :  { %v1379_v53 = vpop.xlane.xlu0 %1378 }
 0x7b9   :  { %v1383_v54 = vsub.f32 %v1375_v29, %v1379_v53 }
 0x7bb   :  { %v1385_v55 = vmul.f32 1.442695, %v1383_v54  ;;  %v1382_v56 = vpop.xlane.xlu1 %1381 }
 0x7bc   :  { %v1384_v57 = vsub.f32 %v1376_v49, %v1382_v56 }
 0x7bd   :  { %7186 = vpow2.f32 %v1385_v55 }
 0x7be   :  { %v1387_v58 = vmul.f32 1.442695, %v1384_v57 }
 0x7bf   :  { %v7049_v60 = vpop.permute.xlu1 %7048 }
 0x7c0   :  { %7188 = vpow2.f32 %v1387_v58  ;;  %v7051_v63 = vunpack.i.h.bf16 %v7049_v60  ;;  %v7050_v0 = vunpack.i.l.bf16 %v7049_v60 }
 0x7c2   :  { %v6743_v50 = vpack.c.bf16 %v7051_v63, %v7050_v0 }
 0x7c3   :  { %v2134_v1 = vpop.permute.xlu1 %2133 }
 0x7c4   :  { %6744 = vmatprep.subr.bf16.mxu0 %v6743_v50  ;;  %6427 = vmatprep.mubr.msk.f32.mxu1 %vm439_vm2, %v2134_v1 }
 0x7c7   :  { %v7187_v2 = vpop.eup %7186  ;;  %v2136_v26 = vpop.permute.xlu1 %2135 }
 0x7c8   :  { %v1389_v3 = vsel %vm525_vm4, %v7187_v2, 0.0 }
 0x7c9   :  { %1390 = vadd.xlane.f32.xlu0 %v1389_v3 }
 0x7ca   :  { %v7189_v4 = vpop.eup %7188 }
 0x7cb   :  { %v1392_v5 = vsel %vm525_vm4, %v7189_v4, 0.0 }
 0x7cd   :  { %1393 = vadd.xlane.f32.xlu0 %v1392_v5 }
 0x7e3   :  { %7053 = vrot.lane.b32.xlu0 %v7996_v21, %s7648_s0 }
 0x856   :  { %v1391_v6 = vpop.xlane.xlu0 %1390 }
 0x857   :  { %7190 = vrcp.f32 %v1391_v6 }
 0x85a   :  { %v1394_v7 = vpop.xlane.xlu0 %1393 }
 0x85b   :  { %7192 = vrcp.f32 %v1394_v7 }
 0x85e   :  { %v7054_v8 = vpop.permute.xlu0 %7053 }
 0x85f   :  { %v7056_v9 = vunpack.i.h.bf16 %v7054_v8  ;;  %v7055_v10 = vunpack.i.l.bf16 %v7054_v8 }
 0x861   :  { %v7191_v11 = vpop.eup %7190  ;;  %v6767_v12 = vpack.c.bf16 %v7056_v9, %v7055_v10  ;;  %v6360_v13 = vpop.f32.mrb[4].mxu0 }
 0x862   :  { %v1192_v14 = vpop.f32.mrb[5].mxu0  ;;  %v6391_v15 = vpop.f32.mrb[14].mxu1  ;;  %v1397_v16 = vmul.f32 %v7191_v11, %v7187_v2 }
 0x863   :  { %v1659_v17 = vmul.f32 0.35355338, %v6391_v15  ;;  %6363 = vmatprep.mubr.msk.f32.mxu0 %vm439_vm2, %v1192_v14  ;;  %v1649_v18 = vpop.f32.mrb[15].mxu1  ;;  %6769 = vmatprep.subr.msk.bf16.mxu1 %vm7900_vm3, %v6767_v12 }
 0x864   :  { %v1658_v19 = vmul.f32 0.35355338, %v1649_v18  ;;  %6364 = vmatmul.mubr.msk.f32.vlgmr.msra.gmra.mrb[2].mxu0 %vm439_vm2, %v6360_v13  ;;  %6772 = vmatpush3.bf16.xpose.msk.msra.mxu1 %vm7900_vm3, %v6767_v12 }
 0x865   :  { %v7193_v29 = vpop.eup %7192  ;;  %6746 = vmatpush3.bf16.msra.mxu0 %v6743_v50  ;;  %6377 = vmatprep.mubr.msk.f32.mxu0 %vm525_vm4, %v1397_v16  ;;  %v1663_v49 = vsel %vm525_vm4, %v1659_v17, -inf }
 0x866   :  { %1664 = vmax.xlane.f32.xlu1 %v1663_v49  ;;  %v1660_v22 = vsel %vm525_vm4, %v1658_v19, -inf  ;;  %v1398_v23 = vmul.f32 %v7193_v29, %v7189_v4  ;;  %6380 = vmatprep.subr.mxu0 %v8054_v37 }
 0x867   :  { %1661 = vmax.xlane.f32.xlu0 %v1660_v22 }
 0x868   :  { %6378 = vmatmul.mubr.msk.f32.vlgmr.msra.gmra.mrb[6].mxu0 %vm525_vm4, %v1398_v23 }
 0x869   :  { %6381 = vmatpush3.msra.mxu0 %v8054_v37 }
 0x86a   :  { %v6405_v27 = vpop.f32.mrb[16].mxu1 }
 0x86b   :  { %v1851_v30 = vpop.f32.mrb[17].mxu1  ;;  %6428 = vmatmul.mubr.msk.f32.vlgmr.msra.gmra.mrb[18].mxu1 %vm439_vm2, %v2136_v26  ;;  %v1861_v33 = vmul.f32 0.35355338, %v6405_v27 }
 0x86c   :  { %v1860_v32 = vmul.f32 0.35355338, %v1851_v30 }
 0x86d   :  { %v1865_v36 = vsel %vm525_vm4, %v1861_v33, -inf }
 0x86e   :  { %v1862_v35 = vsel %vm525_vm4, %v1860_v32, -inf }
 0x86f   :  { %1863 = vmax.xlane.f32.xlu0 %v1862_v35 }
 0x873   :  { %1866 = vmax.xlane.f32.xlu0 %v1865_v36 }
 0x8f3   :  { %v1665_v38 = vpop.xlane.xlu1 %1664 }
 0x8f4   :  { %v1667_v39 = vsub.f32 %v1659_v17, %v1665_v38  ;;  %v1662_v34 = vpop.xlane.xlu0 %1661 }
 0x8f5   :  { %v1666_v31 = vsub.f32 %v1658_v19, %v1662_v34 }
 0x8f6   :  { %v1670_v40 = vmul.f32 1.442695, %v1667_v39 }
 0x8f7   :  { %v1668_v43 = vmul.f32 1.442695, %v1666_v31 }
 0x8f8   :  { %7194 = vpow2.f32 %v1670_v40 }
 0x8f9   :  { %7196 = vpow2.f32 %v1668_v43 }
 0x8fc   :  { %v1864_v44 = vpop.xlane.xlu0 %1863 }
 0x8fd   :  { %v1868_v45 = vsub.f32 %v1860_v32, %v1864_v44 }
 0x8ff   :  { %v1870_v47 = vmul.f32 1.442695, %v1868_v45 }
 0x900   :  { %v1867_v48 = vpop.xlane.xlu0 %1866 }
 0x901   :  { %7198 = vpow2.f32 %v1870_v47  ;;  %v1869_v51 = vsub.f32 %v1861_v33, %v1867_v48 }
 0x902   :  { %v7195_v52 = vpop.eup %7194 }
 0x903   :  { %v7197_v53 = vpop.eup %7196  ;;  %v1872_v54 = vmul.f32 1.442695, %v1869_v51  ;;  %v1675_v55 = vsel %vm525_vm4, %v7195_v52, 0.0  ;;  %v8095_v51 = vld [vmem:[#allocation10] ss:$0 sm:$0xff] }
 0x904   :  { %1676 = vadd.xlane.f32.xlu0 %v1675_v55  ;;  %v1672_v56 = vsel %vm525_vm4, %v7197_v53, 0.0 }
 0x905   :  { %7200 = vpow2.f32 %v1872_v54  ;;  %1673 = vadd.xlane.f32.xlu1 %v1672_v56 }
 0x90b   :  { %v7199_v57 = vpop.eup %7198 }
 0x90c   :  { %v1874_v58 = vsel %vm525_vm4, %v7199_v57, 0.0 }
 0x90d   :  { %1875 = vadd.xlane.f32.xlu1 %v1874_v58 }
 0x90f   :  { %v7201_v60 = vpop.eup %7200 }
 0x910   :  { %v1877_v63 = vsel %vm525_vm4, %v7201_v60, 0.0 }
 0x911   :  { %1878 = vadd.xlane.f32.xlu0 %v1877_v63 }
 0x91e   :  { %7058 = vrot.lane.b32.xlu1 %v7996_v21, %s7649_s16 }
 0x922   :  { %7068 = vrot.lane.b32.xlu1 %v7996_v21, %s7652_s13 }
 0x926   :  { %2418 = vrot.lane.b32.xlu1 %v7967_v59, %s7651_s22 }
 0x927   :  { %7063 = vrot.lane.b32.xlu0 %v7996_v21, %s7647_s11 }
 0x92b   :  { %2420 = vrot.lane.b32.xlu0 %v7992_v20, %s7651_s22 }
 0x93b   :  { %v6379_v0 = vpop.f32.mrb[6].mxu0 }
 0x93c   :  { %v1477_v50 = vpop.f32.mrb[7].mxu0 }
 0x93d   :  { %6382 = vmatprep.mubr.msk.f32.mxu0 %vm439_vm2, %v1477_v50 }
 0x93e   :  { %6383 = vmatmul.mubr.msk.f32.vlgmr.msra.gmra.mrb[2].mxu0 %vm439_vm2, %v6379_v0  ;;  %v6429_v1 = vpop.f32.mrb[18].mxu1 }
 0x93f   :  { %v2215_v2 = vpop.f32.mrb[19].mxu1  ;;  %v2225_v3 = vmul.f32 0.35355338, %v6429_v1 }
 0x940   :  { %v2224_v4 = vmul.f32 0.35355338, %v2215_v2 }
 0x941   :  { %v2229_v59 = vsel %vm525_vm4, %v2225_v3, -inf }
 0x942   :  { %v2226_v5 = vsel %vm525_vm4, %v2224_v4, -inf }
 0x94a   :  { %2227 = vmax.xlane.f32.xlu1 %v2226_v5  ;;  %2230 = vmax.xlane.f32.xlu0 %v2229_v59 }
 0x991   :  { %v1677_v7 = vpop.xlane.xlu0 %1676 }
 0x992   :  { %v1674_v6 = vpop.xlane.xlu1 %1673 }
 0x993   :  { %7202 = vrcp.f32 %v1674_v6 }
 0x994   :  { %7204 = vrcp.f32 %v1677_v7 }
 0x99a   :  { %v1876_v20 = vpop.xlane.xlu1 %1875 }
 0x99b   :  { %7206 = vrcp.f32 %v1876_v20 }
 0x99d   :  { %v7203_v8 = vpop.eup %7202 }
 0x99e   :  { %v7059_v9 = vpop.permute.xlu1 %7058  ;;  %v1879_v10 = vpop.xlane.xlu0 %1878  ;;  %v1680_v11 = vmul.f32 %v7203_v8, %v7197_v53 }
 0x99f   :  { %v7061_v12 = vunpack.i.h.bf16 %v7059_v9  ;;  %v7060_v13 = vunpack.i.l.bf16 %v7059_v9  ;;  %7208 = vrcp.f32 %v1879_v10  ;;  %v7205_v15 = vpop.eup %7204 }
 0x9a0   :  { %6396 = vmatprep.mubr.msk.f32.mxu0 %vm525_vm4, %v1680_v11  ;;  %v1681_v26 = vmul.f32 %v7205_v15, %v7195_v52 }
 0x9a1   :  { %v6753_v14 = vpack.c.bf16 %v7061_v12, %v7060_v13 }
 0x9a2   :  { %v7069_v16 = vpop.permute.xlu1 %7068  ;;  %v7064_v17 = vpop.permute.xlu0 %7063 }
 0x9a3   :  { %v7071_v18 = vunpack.i.h.bf16 %v7069_v16  ;;  %v7070_v19 = vunpack.i.l.bf16 %v7069_v16  ;;  %v7066_v29 = vunpack.i.h.bf16 %v7064_v17  ;;  %v7065_v49 = vunpack.i.l.bf16 %v7064_v17  ;;  %6754 = vmatprep.subr.bf16.mxu0 %v6753_v14 }
 0x9a4   :  { %6756 = vmatpush3.bf16.msra.mxu0 %v6753_v14 }
 0x9a5   :  { %v7207_v22 = vpop.eup %7206  ;;  %v6777_v23 = vpack.c.bf16 %v7071_v18, %v7070_v19  ;;  %v6763_v27 = vpack.c.bf16 %v7066_v29, %v7065_v49 }
 0x9a6   :  { %v2419_v30 = vpop.permute.xlu1 %2418  ;;  %v1882_v32 = vmul.f32 %v7207_v22, %v7199_v57  ;;  %v2421_v36 = vpop.permute.xlu0 %2420 }
 0x9a7   :  { %6397 = vmatmul.mubr.msk.f32.vlgmr.msra.gmra.mrb[8].mxu0 %vm525_vm4, %v1681_v26  ;;  %6764 = vmatprep.subr.bf16.mxu0 %v6763_v27 }
 0x9a8   :  { %6779 = vmatprep.subr.msk.bf16.mxu1 %vm7900_vm3, %v6777_v23  ;;  %6446 = vmatprep.mubr.msk.f32.mxu1 %vm439_vm2, %v2419_v30 }
 0x9a9   :  { %v7209_v33 = vpop.eup %7208  ;;  %6766 = vmatpush3.bf16.msra.mxu0 %v6763_v27  ;;  %6410 = vmatprep.mubr.msk.f32.mxu0 %vm525_vm4, %v1882_v32 }
 0x9aa   :  { %6782 = vmatpush3.bf16.xpose.msk.msra.mxu1 %vm7900_vm3, %v6777_v23  ;;  %v1883_v35 = vmul.f32 %v7209_v33, %v7201_v60  ;;  %6413 = vmatprep.subr.mxu0 %v7973_v61  ;;  %v8116_v33 = vld [vmem:[#allocation11] ss:$0 sm:$0xff] }
 0x9ac   :  { %6411 = vmatmul.mubr.msk.f32.vlgmr.msra.gmra.mrb[10].mxu0 %vm525_vm4, %v1883_v35 }
 0x9ad   :  { %6414 = vmatpush3.msra.mxu0 %v7973_v61 }
 0x9ae   :  { %6418 = vmatprep.subr.mxu0 %v7978_v62 }
 0x9b1   :  { %6447 = vmatmul.mubr.msk.f32.vlgmr.msra.gmra.mrb[20].mxu1 %vm439_vm2, %v2421_v36  ;;  %v8118_v36 = vld [vmem:[#allocation13] ss:$0 sm:$0xff] }
 0x9d7   :  { %v2228_v38 = vpop.xlane.xlu1 %2227  ;;  %v2231_v39 = vpop.xlane.xlu0 %2230 }
 0x9d8   :  { %v2232_v34 = vsub.f32 %v2224_v4, %v2228_v38  ;;  %v2233_v31 = vsub.f32 %v2225_v3, %v2231_v39 }
 0x9da   :  { %v2234_v40 = vmul.f32 1.442695, %v2232_v34  ;;  %v2236_v43 = vmul.f32 1.442695, %v2233_v31 }
 0x9dc   :  { %7210 = vpow2.f32 %v2234_v40 }
 0x9dd   :  { %7212 = vpow2.f32 %v2236_v43 }
 0x9e6   :  { %v7211_v44 = vpop.eup %7210 }
 0x9e7   :  { %v7213_v45 = vpop.eup %7212  ;;  %v2238_v47 = vsel %vm525_vm4, %v7211_v44, 0.0 }
 0x9e8   :  { %2239 = vadd.xlane.f32.xlu0 %v2238_v47  ;;  %v2241_v61 = vsel %vm525_vm4, %v7213_v45, 0.0 }
 0x9e9   :  { %2242 = vadd.xlane.f32.xlu1 %v2241_v61 }
 0x9fe   :  { %7073 = vrot.lane.b32.xlu0 %v7996_v21, %s7653_s14 }
 0xa11   :  { %v8093_v48 = vpop.f32.mrb[2].mxu0 }
 0xa12   :  { %v1558_v52 = vpop.f32.mrb[3].mxu0 }
 0xa13   :  { %v2710_v53 = vadd.f32 %v8095_v51, %v1558_v52 }
 0xa15   :  { %v2714_v54 = vadd.f32 %v2710_v53, %v7868_v25 }
 0xa17   :  { %v2720_v55 = vsel %vm335_vm1, %v2714_v54, 0.0 }
 0xa1d   :  { %2721 = vadd.xlane.f32.xlu0 %v2720_v55 }
 0xa75   :  { %v2240_v56 = vpop.xlane.xlu0 %2239 }
 0xa76   :  { %v2243_v63 = vpop.xlane.xlu1 %2242  ;;  %7214 = vrcp.f32 %v2240_v56 }
 0xa77   :  { %7216 = vrcp.f32 %v2243_v63 }
 0xa79   :  { %v7074_v58 = vpop.permute.xlu0 %7073 }
 0xa7a   :  { %v6398_v57 = vpop.f32.mrb[8].mxu0  ;;  %v7076_v0 = vunpack.i.h.bf16 %v7074_v58  ;;  %v7075_v50 = vunpack.i.l.bf16 %v7074_v58 }
 0xa7b   :  { %v1760_v60 = vpop.f32.mrb[9].mxu0 }
 0xa7c   :  { %v6773_v3 = vpack.c.bf16 %v7076_v0, %v7075_v50  ;;  %v316_v0 = vld [vmem:[%s8537_s25] sm:$0xff]  ;;  %v317_v50 = vld [vmem:[%s8537_s25 + $0x8] sm:$0xff] }
 0xa7f   :  { %v6412_v1 = vpop.f32.mrb[10].mxu0 }
 0xa80   :  { %v1962_v2 = vpop.f32.mrb[11].mxu0  ;;  %v7215_v5 = vpop.eup %7214 }
 0xa81   :  { %6415 = vmatprep.mubr.msk.f32.mxu0 %vm439_vm2, %v1962_v2  ;;  %v7217_v20 = vpop.eup %7216  ;;  %v2246_v8 = vmul.f32 %v7215_v5, %v7211_v44  ;;  %v318_v2 = vld [vmem:[%s8537_s25 + $0x10] sm:$0xff] }
 0xa82   :  { %6416 = vmatmul.mubr.msk.f32.vlgmr.msra.gmra.mrb[12].mxu0 %vm439_vm2, %v6412_v1  ;;  %v2247_v9 = vmul.f32 %v7217_v20, %v7213_v45  ;;  %v6787_v1 = vpack.c.bf16 %v317_v50, %v316_v0 }
 0xa83   :  { %6419 = vmatpush3.msra.mxu0 %v7978_v62  ;;  %6420 = vmatprep.mubr.msk.f32.mxu0 %vm439_vm2, %v1760_v60 }
 0xa84   :  { %v6448_v25 = vpop.f32.mrb[20].mxu1  ;;  %6774 = vmatprep.subr.bf16.mxu0 %v6773_v3  ;;  %6788 = vmatprep.subr.bf16.mxu1 %v6787_v1 }
 0xa85   :  { %v2500_v4 = vpop.f32.mrb[21].mxu1  ;;  %v2510_v6 = vmul.f32 0.35355338, %v6448_v25  ;;  %6790 = vmatpush3.bf16.msra.mxu1 %v6787_v1 }
 0xa86   :  { %v2509_v59 = vmul.f32 0.35355338, %v2500_v4  ;;  %v321_v4 = vld [vmem:[%s8538_s29 + $0x8] sm:$0xff] }
 0xa87   :  { %v2514_v62 = vsel %vm525_vm4, %v2510_v6, -inf }
 0xa88   :  { %v2511_v7 = vsel %vm525_vm4, %v2509_v59, -inf }
 0xa89   :  { %2512 = vmax.xlane.f32.xlu1 %v2511_v7 }
 0xa8a   :  { %6421 = vmatmul.mubr.msk.f32.vlgmr.msra.gmra.mrb[12].mxu0 %vm439_vm2, %v6398_v57 }
 0xa8b   :  { %6776 = vmatpush3.bf16.msra.mxu0 %v6773_v3  ;;  %6434 = vmatprep.mubr.msk.f32.mxu0 %vm525_vm4, %v2246_v8  ;;  %v319_v3 = vld [vmem:[%s8537_s25 + $0x18] sm:$0xff] }
 0xa8c   :  { %6437 = vmatprep.subr.mxu0 %v8019_v42  ;;  %v6791_v25 = vpack.c.bf16 %v319_v3, %v318_v2 }
 0xa8d   :  { %2515 = vmax.xlane.f32.xlu1 %v2514_v62 }
 0xa8e   :  { %6435 = vmatmul.mubr.msk.f32.vlgmr.msra.gmra.mrb[14].mxu0 %vm525_vm4, %v2247_v9  ;;  %6792 = vmatprep.subr.bf16.mxu1 %v6791_v25 }
 0xa8f   :  { %6438 = vmatpush3.msra.mxu0 %v8019_v42  ;;  %6794 = vmatpush3.bf16.msra.mxu1 %v6791_v25 }
 0xaaa   :  { %v2722_v10 = vpop.xlane.xlu0 %2721 }
 0xaab   :  { %v2733_v11 = vmul.f32 0.03125, %v2722_v10  ;;  %v322_v10 = vld [vmem:[%s8538_s29 + $0x10] sm:$0xff] }
 0xaad   :  { %v2737_v12 = vsub.f32 %v2714_v54, %v2733_v11  ;;  %v323_v11 = vld [vmem:[%s8538_s29 + $0x18] sm:$0xff] }
 0xaaf   :  { %v2741_v13 = vmul.f32 %v2737_v12, %v2737_v12 }
 0xab1   :  { %v2745_v14 = vsel %vm335_vm1, %v2741_v13, 0.0 }
 0xab2   :  { %2746 = vadd.xlane.f32.xlu0 %v2745_v14  ;;  %v6799_v14 = vpack.c.bf16 %v323_v11, %v322_v10 }
 0xb16   :  { %v2513_v15 = vpop.xlane.xlu1 %2512 }
 0xb17   :  { %v2517_v16 = vsub.f32 %v2509_v59, %v2513_v15  ;;  %v324_v15 = vld [vmem:[%s8538_s29 + $0x20] sm:$0xff] }
 0xb19   :  { %v2519_v19 = vmul.f32 1.442695, %v2517_v16  ;;  %v325_v16 = vld [vmem:[%s8538_s29 + $0x28] sm:$0xff] }
 0xb1a   :  { %v2516_v17 = vpop.xlane.xlu1 %2515 }
 0xb1b   :  { %v2518_v18 = vsub.f32 %v2510_v6, %v2516_v17  ;;  %v6803_v17 = vpack.c.bf16 %v325_v16, %v324_v15 }
 0xb1d   :  { %v2521_v29 = vmul.f32 1.442695, %v2518_v18  ;;  %v326_v18 = vld [vmem:[%s8538_s29 + $0x30] sm:$0xff] }
 0xb1f   :  { %7218 = vpow2.f32 %v2521_v29 }
 0xb20   :  { %7220 = vpow2.f32 %v2519_v19  ;;  %v327_v19 = vld [vmem:[%s8538_s29 + $0x38] sm:$0xff] }
 0xb21   :  { %v6807_v29 = vpack.c.bf16 %v327_v19, %v326_v18  ;;  %v3086_v19 = vld [vmem:[%s8539_s3 + $0x10] sm:$0xff] }
 0xb29   :  { %v7219_v49 = vpop.eup %7218 }
 0xb2a   :  { %v2526_v22 = vsel %vm525_vm4, %v7219_v49, 0.0  ;;  %v7221_v23 = vpop.eup %7220 }
 0xb2b   :  { %2527 = vadd.xlane.f32.xlu1 %v2526_v22  ;;  %v2523_v42 = vsel %vm525_vm4, %v7221_v23, 0.0 }
 0xb2f   :  { %2524 = vadd.xlane.f32.xlu1 %v2523_v42 }
 0xb3f   :  { %v2747_v26 = vpop.xlane.xlu0 %2746 }
 0xb40   :  { %7078 = vrot.lane.b32.xlu1 %v7996_v21, %s7654_s15  ;;  %v2757_v27 = vmul.f32 0.03125, %v2747_v26  ;;  %v2711_v21 = vadd.f32 %v8093_v48, %v8095_v51 }
 0xb42   :  { %v2761_v30 = vadd.f32 1e-05, %v2757_v27  ;;  %v2715_v34 = vadd.f32 %v2711_v21, %v7866_v24 }
 0xb44   :  { %7222 = vrsqrt.f32 %v2761_v30  ;;  %v2723_v43 = vsel %vm335_vm1, %v2715_v34, 0.0 }
 0xb4e   :  { %v7223_v32 = vpop.eup %7222 }
 0xb4f   :  { %v2769_v35 = vmul.f32 %v7223_v32, %v2737_v12 }
 0xb51   :  { %v2779_v38 = vmul.f32 %v8116_v33, %v2769_v35 }
 0xb53   :  { %v8122_v39 = vadd.f32 %v8118_v36, %v2779_v38 }
 0xb55   :  { %6469 = vmatprep.mubr.msk.f32.mxu1 %vm335_vm1, %v8122_v39 }
 0xb61   :  { %v6436_v31 = vpop.f32.mrb[14].mxu0 }
 0xb62   :  { %v2326_v40 = vpop.f32.mrb[15].mxu0 }
 0xb63   :  { %6439 = vmatprep.mubr.msk.f32.mxu0 %vm439_vm2, %v2326_v40 }
 0xb64   :  { %2724 = vadd.xlane.f32.xlu1 %v2723_v43  ;;  %6440 = vmatmul.mubr.msk.f32.vlgmr.msra.gmra.mrb[12].mxu0 %vm439_vm2, %v6436_v31 }
 0xbb8   :  { %v2528_v44 = vpop.xlane.xlu1 %2527 }
 0xbb9   :  { %7224 = vrcp.f32 %v2528_v44 }
 0xbbc   :  { %v2525_v45 = vpop.xlane.xlu1 %2524 }
 0xbbd   :  { %7226 = vrcp.f32 %v2525_v45 }
 0xbc0   :  { %v7079_v47 = vpop.permute.xlu1 %7078 }
 0xbc1   :  { %v7081_v61 = vunpack.i.h.bf16 %v7079_v47  ;;  %v7080_v52 = vunpack.i.l.bf16 %v7079_v47 }
 0xbc3   :  { %v6783_v53 = vpack.c.bf16 %v7081_v61, %v7080_v52  ;;  %v7225_v24 = vpop.eup %7224 }
 0xbc4   :  { %v2532_v55 = vmul.f32 %v7225_v24, %v7219_v49  ;;  %v8154_v49 = vld [vmem:[#allocation14] ss:$0 sm:$0xff] }
 0xbc5   :  { %6784 = vmatprep.subr.bf16.mxu0 %v6783_v53 }
 0xbc6   :  { %6786 = vmatpush3.bf16.msra.mxu0 %v6783_v53 }
 0xbc7   :  { %v7227_v48 = vpop.eup %7226  ;;  %6456 = vmatprep.subr.mxu0 %v8054_v37 }
 0xbc8   :  { %v2531_v54 = vmul.f32 %v7227_v48, %v7221_v23 }
 0xbca   :  { %6453 = vmatprep.mubr.msk.f32.mxu0 %vm525_vm4, %v2531_v54  ;;  %v8168_v54 = vld [vmem:[#allocation16] ss:$0 sm:$0xff] }
 0xbcb   :  { %6454 = vmatmul.mubr.msk.f32.vlgmr.msra.gmra.mrb[16].mxu0 %vm525_vm4, %v2532_v55 }
 0xbcc   :  { %6457 = vmatpush3.msra.mxu0 %v8054_v37  ;;  %v320_v37 = vld [vmem:[%s8538_s29] sm:$0xff] }
 0xbcd   :  { %v6795_v5 = vpack.c.bf16 %v321_v4, %v320_v37 }
 0xbcf   :  { %6796 = vmatprep.subr.bf16.mxu0 %v6795_v5 }
 0xbf1   :  { %v2725_v56 = vpop.xlane.xlu1 %2724 }
 0xbf2   :  { %v2734_v57 = vmul.f32 0.03125, %v2725_v56 }
 0xbf4   :  { %v2738_v58 = vsub.f32 %v2715_v34, %v2734_v57 }
 0xbf6   :  { %v2742_v60 = vmul.f32 %v2738_v58, %v2738_v58 }
 0xbf8   :  { %v2748_v63 = vsel %vm335_vm1, %v2742_v60, 0.0 }
 0xbf9   :  { %2749 = vadd.xlane.f32.xlu0 %v2748_v63 }
 0xc86   :  { %v2750_v59 = vpop.xlane.xlu0 %2749 }
 0xc87   :  { %v2758_v6 = vmul.f32 0.03125, %v2750_v59 }
 0xc89   :  { %v2762_v7 = vadd.f32 1e-05, %v2758_v6 }
 0xc8b   :  { %7228 = vrsqrt.f32 %v2762_v7 }
 0xc95   :  { %v7229_v20 = vpop.eup %7228 }
 0xc96   :  { %v2770_v8 = vmul.f32 %v7229_v20, %v2738_v58 }
 0xc98   :  { %v2780_v9 = vmul.f32 %v8116_v33, %v2770_v8 }
 0xc9a   :  { %v2790_v62 = vadd.f32 %v8118_v36, %v2780_v9 }
 0xc9c   :  { %6470 = vmatmul.mubr.msk.f32.vlgmr.msra.gmra.mrb[22].mxu1 %vm335_vm1, %v2790_v62 }
 0xc9e   :  { %v6455_v12 = vpop.f32.mrb[16].mxu0 }
 0xc9f   :  { %v2611_v13 = vpop.f32.mrb[17].mxu0 }
 0xca0   :  { %6458 = vmatprep.mubr.msk.f32.mxu0 %vm439_vm2, %v2611_v13 }
 0xca1   :  { %6459 = vmatmul.mubr.msk.f32.vlgmr.msra.gmra.mrb[12].mxu0 %vm439_vm2, %v6455_v12 }
 0xca2   :  { %6798 = vmatpush3.bf16.msra.mxu0 %v6795_v5 }
 0xca3   :  { %6800 = vmatprep.subr.bf16.mxu0 %v6799_v14 }
 0xca6   :  { %6802 = vmatpush3.bf16.msra.mxu0 %v6799_v14 }
 0xca7   :  { %6804 = vmatprep.subr.bf16.mxu0 %v6803_v17 }
 0xcaa   :  { %6806 = vmatpush3.bf16.msra.mxu0 %v6803_v17  ;;  %v3084_v17 = vld [vmem:[%s8539_s3] sm:$0xff] }
 0xcab   :  { %6808 = vmatprep.subr.bf16.mxu0 %v6807_v29 }
 0xcae   :  { %6810 = vmatpush3.bf16.msra.mxu0 %v6807_v29  ;;  %v3087_v29 = vld [vmem:[%s8539_s3 + $0x18] sm:$0xff] }
 0xd6f   :  { %v6471_v22 = vpop.f32.mrb[22].mxu1 }
 0xd70   :  { %v2884_v23 = vadd.f32 %v6471_v22, %v8154_v49  ;;  %v2878_v42 = vpop.f32.mrb[23].mxu1  ;;  %v6815_v22 = vpack.c.bf16 %v3087_v29, %v3086_v19 }
 0xd71   :  { %v2879_v26 = vadd.f32 %v8154_v49, %v2878_v42 }
 0xd72   :  { %v2898_v30 = vmax.f32 %v2884_v23, 0.0 }
 0xd73   :  { %v2897_v27 = vmax.f32 %v2879_v26, 0.0 }
 0xd74   :  { %v6460_v32 = vpop.f32.mrb[12].mxu0 }
 0xd75   :  { %v2692_v35 = vpop.f32.mrb[13].mxu0  ;;  %6491 = vmatprep.mubr.msk.f32.mxu0 %vm2908_vm5, %v2897_v27  ;;  %v2713_v38 = vadd.f32 %v6460_v32, %v8095_v51 }
 0xd76   :  { %v2712_v21 = vadd.f32 %v8095_v51, %v2692_v35  ;;  %6492 = vmatmul.mubr.msk.f32.vlgmr.msra.gmra.mrb[18].mxu0 %vm2908_vm5, %v2898_v30 }
 0xd77   :  { %v2717_v40 = vadd.f32 %v2713_v38, %v7912_v46  ;;  %v8190_v38 = vld [vmem:[#allocation17] ss:$0 sm:$0xff] }
 0xd78   :  { %v2716_v34 = vadd.f32 %v2712_v21, %v7874_v28 }
 0xd79   :  { %v2729_v43 = vsel %vm335_vm1, %v2717_v40, 0.0 }
 0xd7a   :  { %v2726_v31 = vsel %vm335_vm1, %v2716_v34, 0.0 }
 0xd7b   :  { %2727 = vadd.xlane.f32.xlu0 %v2726_v31 }
 0xd7f   :  { %2730 = vadd.xlane.f32.xlu0 %v2729_v43 }
 0xe08   :  { %v2728_v44 = vpop.xlane.xlu0 %2727 }
 0xe09   :  { %v2735_v45 = vmul.f32 0.03125, %v2728_v44 }
 0xe0b   :  { %v2739_v47 = vsub.f32 %v2716_v34, %v2735_v45 }
 0xe0c   :  { %v2731_v61 = vpop.xlane.xlu0 %2730 }
 0xe0d   :  { %v2736_v52 = vmul.f32 0.03125, %v2731_v61  ;;  %v2743_v53 = vmul.f32 %v2739_v47, %v2739_v47 }
 0xe0f   :  { %v2740_v24 = vsub.f32 %v2717_v40, %v2736_v52  ;;  %v2751_v51 = vsel %vm335_vm1, %v2743_v53, 0.0  ;;  %v8192_v40 = vld [vmem:[#allocation19] ss:$0 sm:$0xff] }
 0xe10   :  { %2752 = vadd.xlane.f32.xlu0 %v2751_v51 }
 0xe11   :  { %v2744_v48 = vmul.f32 %v2740_v24, %v2740_v24 }
 0xe13   :  { %v2754_v28 = vsel %vm335_vm1, %v2744_v48, 0.0 }
 0xe14   :  { %2755 = vadd.xlane.f32.xlu1 %v2754_v28 }
 0xe49   :  { %v6493_v46 = vpop.f32.mrb[18].mxu0 }
 0xe4a   :  { %v2993_v55 = vadd.f32 %v6493_v46, %v8168_v54  ;;  %v2987_v56 = vpop.f32.mrb[19].mxu0 }
 0xe4b   :  { %v2988_v57 = vadd.f32 %v8168_v54, %v2987_v56 }
 0xe4c   :  { %v3007_v58 = vadd.f32 %v2993_v55, %v2790_v62 }
 0xe4d   :  { %v3006_v60 = vadd.f32 %v2988_v57, %v8122_v39 }
 0xe4e   :  { %v3015_v63 = vsel %vm335_vm1, %v3007_v58, 0.0 }
 0xe4f   :  { %3016 = vadd.xlane.f32.xlu1 %v3015_v63  ;;  %v3012_v0 = vsel %vm335_vm1, %v3006_v60, 0.0 }
 0xe50   :  { %3013 = vadd.xlane.f32.xlu0 %v3012_v0 }
 0xe9d   :  { %v2753_v50 = vpop.xlane.xlu0 %2752 }
 0xe9e   :  { %v2759_v1 = vmul.f32 0.03125, %v2753_v50 }
 0xea0   :  { %v2763_v2 = vadd.f32 1e-05, %v2759_v1 }
 0xea1   :  { %v2756_v3 = vpop.xlane.xlu1 %2755 }
 0xea2   :  { %7230 = vrsqrt.f32 %v2763_v2  ;;  %v2760_v25 = vmul.f32 0.03125, %v2756_v3 }
 0xea4   :  { %v2764_v37 = vadd.f32 1e-05, %v2760_v25 }
 0xea6   :  { %7232 = vrsqrt.f32 %v2764_v37 }
 0xeac   :  { %v7231_v4 = vpop.eup %7230 }
 0xead   :  { %v2771_v5 = vmul.f32 %v7231_v4, %v2739_v47 }
 0xeaf   :  { %v2781_v59 = vmul.f32 %v8116_v33, %v2771_v5 }
 0xeb0   :  { %v7233_v6 = vpop.eup %7232 }
 0xeb1   :  { %v8177_v39 = vadd.f32 %v8118_v36, %v2781_v59  ;;  %v2772_v7 = vmul.f32 %v7233_v6, %v2740_v24  ;;  %v8217_v6 = vld [vmem:[#allocation20] ss:$0 sm:$0xff] }
 0xeb3   :  { %6472 = vmatprep.mubr.msk.f32.mxu1 %vm335_vm1, %v8177_v39  ;;  %v2782_v20 = vmul.f32 %v8116_v33, %v2772_v7 }
 0xeb5   :  { %v2792_v8 = vadd.f32 %v8118_v36, %v2782_v20  ;;  %v3085_v36 = vld [vmem:[%s8539_s3 + $0x8] sm:$0xff] }
 0xeb6   :  { %v6811_v18 = vpack.c.bf16 %v3085_v36, %v3084_v17 }
 0xeb7   :  { %6473 = vmatmul.mubr.msk.f32.gmra.mrb[24].mxu1 %vm335_vm1, %v2792_v8 }
 0xeb8   :  { %6812 = vmatprep.subr.bf16.mxu1 %v6811_v18 }
 0xeb9   :  { %6814 = vmatpush3.bf16.msra.mxu1 %v6811_v18 }
 0xeba   :  { %6816 = vmatprep.subr.bf16.mxu1 %v6815_v22 }
 0xebd   :  { %6818 = vmatpush3.bf16.msra.mxu1 %v6815_v22 }
 0xedc   :  { %v3017_v9 = vpop.xlane.xlu1 %3016 }
 0xedd   :  { %v3025_v62 = vmul.f32 0.03125, %v3017_v9  ;;  %v3014_v10 = vpop.xlane.xlu0 %3013 }
 0xede   :  { %v3024_v11 = vmul.f32 0.03125, %v3014_v10 }
 0xedf   :  { %v3029_v12 = vsub.f32 %v3007_v58, %v3025_v62 }
 0xee0   :  { %v3028_v13 = vsub.f32 %v3006_v60, %v3024_v11 }
 0xee1   :  { %v3033_v14 = vmul.f32 %v3029_v12, %v3029_v12 }
 0xee2   :  { %v3032_v15 = vmul.f32 %v3028_v13, %v3028_v13 }
 0xee3   :  { %v3039_v16 = vsel %vm335_vm1, %v3033_v14, 0.0 }
 0xee4   :  { %3040 = vadd.xlane.f32.xlu1 %v3039_v16  ;;  %v3036_v33 = vsel %vm335_vm1, %v3032_v15, 0.0 }
 0xee5   :  { %3037 = vadd.xlane.f32.xlu0 %v3036_v33 }
 0xf71   :  { %v3041_v23 = vpop.xlane.xlu1 %3040 }
 0xf72   :  { %v3049_v42 = vmul.f32 0.03125, %v3041_v23  ;;  %v3038_v26 = vpop.xlane.xlu0 %3037 }
 0xf73   :  { %v3048_v27 = vmul.f32 0.03125, %v3038_v26 }
 0xf74   :  { %v3053_v30 = vadd.f32 1e-05, %v3049_v42 }
 0xf75   :  { %v3052_v32 = vadd.f32 1e-05, %v3048_v27 }
 0xf76   :  { %7234 = vrsqrt.f32 %v3053_v30 }
 0xf77   :  { %7236 = vrsqrt.f32 %v3052_v32 }
 0xf80   :  { %v7235_v35 = vpop.eup %7234 }
 0xf81   :  { %v7237_v21 = vpop.eup %7236  ;;  %v3061_v34 = vmul.f32 %v7235_v35, %v3029_v12 }
 0xf82   :  { %v3060_v31 = vmul.f32 %v7237_v21, %v3028_v13 }
 0xf83   :  { %v3071_v43 = vmul.f32 %v8190_v38, %v3061_v34 }
 0xf84   :  { %v3070_v44 = vmul.f32 %v8190_v38, %v3060_v31 }
 0xf85   :  { %v8200_v47 = vadd.f32 %v8192_v40, %v3071_v43 }
 0xf86   :  { %v8197_v45 = vadd.f32 %v8192_v40, %v3070_v44 }
 0xf88   :  { %6505 = vmatprep.mubr.msk.f32.mxu1 %vm335_vm1, %v8197_v45 }
 0xf89   :  { %6506 = vmatmul.mubr.msk.f32.vlgmr.msra.gmra.mrb[26].mxu1 %vm335_vm1, %v8200_v47 }
 0xf8a   :  { %v6474_v61 = vpop.f32.mrb[24].mxu1 }
 0xf8b   :  { %v2894_v52 = vadd.f32 %v6474_v61, %v8154_v49  ;;  %v2888_v53 = vpop.f32.mrb[25].mxu1 }
 0xf8c   :  { %v2889_v24 = vadd.f32 %v8154_v49, %v2888_v53 }
 0xf8d   :  { %v2900_v48 = vmax.f32 %v2894_v52, 0.0 }
 0xf8e   :  { %v2899_v51 = vmax.f32 %v2889_v24, 0.0 }
 0xf90   :  { %6494 = vmatprep.mubr.msk.f32.mxu0 %vm2908_vm5, %v2899_v51 }
 0xf91   :  { %6495 = vmatmul.mubr.msk.f32.gmra.mrb[20].mxu0 %vm2908_vm5, %v2900_v48 }
0x105c   :  { %v6507_v28 = vpop.f32.mrb[26].mxu1 }
0x105d   :  { %v3189_v46 = vpop.f32.mrb[27].mxu1 }
0x105e   :  { %v8223_v7 = vadd.f32 %v8217_v6, %v3189_v46 }
0x1064   :  { %v6496_v55 = vpop.f32.mrb[20].mxu0 }
0x1065   :  { %v3003_v56 = vadd.f32 %v6496_v55, %v8168_v54  ;;  %v2997_v57 = vpop.f32.mrb[21].mxu0 }
0x1066   :  { %v2998_v58 = vadd.f32 %v8168_v54, %v2997_v57 }
0x1067   :  { %v3009_v60 = vadd.f32 %v3003_v56, %v2792_v8 }
0x1068   :  { %v3008_v63 = vadd.f32 %v2998_v58, %v8177_v39  ;;  %v8220_v39 = vadd.f32 %v6507_v28, %v8217_v6 }
0x1069   :  { %v3021_v0 = vsel %vm335_vm1, %v3009_v60, 0.0 }
0x106a   :  { %3022 = vadd.xlane.f32.xlu1 %v3021_v0  ;;  %v3018_v49 = vsel %vm335_vm1, %v3008_v63, 0.0  ;;  %v8227_v20 = vpack.i.bf16 %v8220_v39, %v8223_v7 }
0x106b   :  { %3019 = vadd.xlane.f32.xlu0 %v3018_v49 }
0x10f7   :  { %v3023_v50 = vpop.xlane.xlu1 %3022 }
0x10f8   :  { %v3027_v1 = vmul.f32 0.03125, %v3023_v50  ;;  %v3020_v2 = vpop.xlane.xlu0 %3019 }
0x10f9   :  { %v3026_v3 = vmul.f32 0.03125, %v3020_v2 }
0x10fa   :  { %v3031_v25 = vsub.f32 %v3009_v60, %v3027_v1 }
0x10fb   :  { %v3030_v37 = vsub.f32 %v3008_v63, %v3026_v3 }
0x10fc   :  { %v3035_v4 = vmul.f32 %v3031_v25, %v3031_v25 }
0x10fd   :  { %v3034_v5 = vmul.f32 %v3030_v37, %v3030_v37 }
0x10fe   :  { %v3045_v59 = vsel %vm335_vm1, %v3035_v4, 0.0 }
0x10ff   :  { %3046 = vadd.xlane.f32.xlu1 %v3045_v59  ;;  %v3042_v54 = vsel %vm335_vm1, %v3034_v5, 0.0 }
0x1100   :  { %3043 = vadd.xlane.f32.xlu0 %v3042_v54 }
0x1110   :  { %7088 = vrot.lane.b32.xlu1 %v8227_v20, %s7644_s17 }
0x1114   :  { %3408 = vrot.lane.b32.xlu1 %v8223_v7, %s7646_s10 }
0x1116   :  { %7083 = vrot.lane.b32.xlu0 %v8227_v20, %s7645_s27 }
0x111a   :  { %3410 = vrot.lane.b32.xlu0 %v8220_v39, %s7646_s10 }
0x118c   :  { %v3047_v8 = vpop.xlane.xlu1 %3046 }
0x118d   :  { %v3051_v9 = vmul.f32 0.03125, %v3047_v8  ;;  %v3044_v62 = vpop.xlane.xlu0 %3043 }
0x118e   :  { %v3050_v10 = vmul.f32 0.03125, %v3044_v62 }
0x118f   :  { %v3055_v11 = vadd.f32 1e-05, %v3051_v9 }
0x1190   :  { %v3054_v12 = vadd.f32 1e-05, %v3050_v10  ;;  %v7089_v13 = vpop.permute.xlu1 %7088 }
0x1191   :  { %7238 = vrsqrt.f32 %v3055_v11  ;;  %v7091_v14 = vunpack.i.h.bf16 %v7089_v13  ;;  %v7090_v15 = vunpack.i.l.bf16 %v7089_v13  ;;  %v7084_v16 = vpop.permute.xlu0 %7083 }
0x1192   :  { %7240 = vrsqrt.f32 %v3054_v12  ;;  %v7086_v33 = vunpack.i.h.bf16 %v7084_v16  ;;  %v7085_v17 = vunpack.i.l.bf16 %v7084_v16 }
0x1193   :  { %v6829_v36 = vpack.c.bf16 %v7091_v14, %v7090_v15 }
0x1194   :  { %v6819_v18 = vpack.c.bf16 %v7086_v33, %v7085_v17  ;;  %v3409_v19 = vpop.permute.xlu1 %3408 }
0x1195   :  { %6831 = vmatprep.subr.msk.bf16.mxu0 %vm7900_vm3, %v6829_v36  ;;  %6529 = vmatprep.mubr.msk.f32.mxu0 %vm439_vm2, %v3409_v19  ;;  %v3411_v23 = vpop.permute.xlu0 %3410 }
0x1196   :  { %6821 = vmatprep.subr.msk.bf16.mxu1 %vm7900_vm3, %v6819_v18  ;;  %6834 = vmatpush3.bf16.xpose.msk.msra.mxu0 %vm7900_vm3, %v6829_v36 }
0x1197   :  { %6824 = vmatpush3.bf16.xpose.msk.msra.mxu1 %vm7900_vm3, %v6819_v18 }
0x119b   :  { %v7239_v29 = vpop.eup %7238 }
0x119c   :  { %v7241_v22 = vpop.eup %7240  ;;  %v3063_v42 = vmul.f32 %v7239_v29, %v3031_v25 }
0x119d   :  { %6530 = vmatmul.mubr.msk.f32.vlgmr.msra.gmra.mrb[22].mxu0 %vm439_vm2, %v3411_v23  ;;  %v3062_v26 = vmul.f32 %v7241_v22, %v3030_v37 }
0x119e   :  { %v3073_v27 = vmul.f32 %v8190_v38, %v3063_v42 }
0x119f   :  { %v3072_v30 = vmul.f32 %v8190_v38, %v3062_v26 }
0x11a0   :  { %v8253_v35 = vadd.f32 %v8192_v40, %v3073_v27 }
0x11a1   :  { %v8250_v32 = vadd.f32 %v8192_v40, %v3072_v30 }
0x11a3   :  { %6508 = vmatprep.mubr.msk.f32.mxu1 %vm335_vm1, %v8250_v32 }
0x11a4   :  { %6509 = vmatmul.mubr.msk.f32.gmra.mrb[28].mxu1 %vm335_vm1, %v8253_v35 }
0x11a5   :  { %6515 = vmatprep.mubr.msk.f32.mxu1 %vm439_vm2, %v8223_v7 }
0x11a8   :  { %6516 = vmatmul.mubr.msk.f32.vlgmr.msra.gmra.mrb[30].mxu1 %vm439_vm2, %v8220_v39 }
0x1270   :  { %v6531_v21 = vpop.f32.mrb[22].mxu0 }
0x1271   :  { %v3490_v38 = vpop.f32.mrb[23].mxu0  ;;  %v3500_v24 = vmul.f32 0.35355338, %v6531_v21 }
0x1272   :  { %v3499_v52 = vmul.f32 0.35355338, %v3490_v38 }
0x1273   :  { %v3504_v28 = vsel %vm525_vm4, %v3500_v24, -inf }
0x1274   :  { %v3501_v48 = vsel %vm525_vm4, %v3499_v52, -inf }
0x1277   :  { %v8263_v34 = vpop.f32.mrb[28].mxu1 }
0x1278   :  { %v8265_v31 = vpop.f32.mrb[29].mxu1 }
0x127b   :  { %v6517_v40 = vpop.f32.mrb[30].mxu1 }
0x127c   :  { %v3298_v43 = vmul.f32 0.35355338, %v6517_v40  ;;  %v3288_v44 = vpop.f32.mrb[31].mxu1 }
0x127d   :  { %v3297_v61 = vmul.f32 0.35355338, %v3288_v44 }
0x127e   :  { %v3302_v53 = vsel %vm525_vm4, %v3298_v43, -inf }
0x127f   :  { %3303 = vmax.xlane.f32.xlu0 %v3302_v53  ;;  %v3299_v51 = vsel %vm525_vm4, %v3297_v61, -inf }
0x1280   :  { %3300 = vmax.xlane.f32.xlu1 %v3299_v51 }
0x1283   :  { %3502 = vmax.xlane.f32.xlu0 %v3501_v48  ;;  %v8314_v48 = vld [vmem:[%s8540_s23 + $0x8] sm:$0xff] }
0x1284   :  { %3505 = vmax.xlane.f32.xlu1 %v3504_v28  ;;  %6539 = vmatprep.subr.mxu0 %v8314_v48  ;;  %v8319_v28 = vld [vmem:[%s8540_s23] sm:$0xff] }
0x1285   :  { %6540 = vmatpush3.msra.mxu0 %v8314_v48 }
0x1286   :  { %6544 = vmatprep.subr.mxu0 %v8319_v28 }
0x130c   :  { %v3304_v46 = vpop.xlane.xlu0 %3303 }
0x130d   :  { %v3301_v55 = vpop.xlane.xlu1 %3300  ;;  %v3306_v57 = vsub.f32 %v3298_v43, %v3304_v46 }
0x130e   :  { %v3305_v56 = vsub.f32 %v3297_v61, %v3301_v55 }
0x130f   :  { %v3309_v1 = vmul.f32 1.442695, %v3306_v57 }
0x1310   :  { %v3503_v58 = vpop.xlane.xlu0 %3502  ;;  %v3307_v49 = vmul.f32 1.442695, %v3305_v56 }
0x1311   :  { %v3507_v60 = vsub.f32 %v3499_v52, %v3503_v58  ;;  %v3506_v63 = vpop.xlane.xlu1 %3505 }
0x1312   :  { %v3508_v0 = vsub.f32 %v3500_v24, %v3506_v63  ;;  %v8308_v24 = vadd.f32 %v8217_v6, %v8265_v31 }
0x1313   :  { %v3509_v50 = vmul.f32 1.442695, %v3507_v60 }
0x1314   :  { %v3511_v2 = vmul.f32 1.442695, %v3508_v0 }
0x1315   :  { %7242 = vpow2.f32 %v3509_v50 }
0x1316   :  { %7244 = vpow2.f32 %v3511_v2 }
0x1317   :  { %7246 = vpow2.f32 %v3307_v49 }
0x1318   :  { %7248 = vpow2.f32 %v3309_v1 }
0x131f   :  { %v7243_v3 = vpop.eup %7242 }
0x1320   :  { %v7245_v25 = vpop.eup %7244  ;;  %v3513_v37 = vsel %vm525_vm4, %v7243_v3, 0.0 }
0x1321   :  { %v7247_v4 = vpop.eup %7246  ;;  %3514 = vadd.xlane.f32.xlu0 %v3513_v37  ;;  %v3516_v5 = vsel %vm525_vm4, %v7245_v25, 0.0 }
0x1322   :  { %v7249_v59 = vpop.eup %7248  ;;  %3517 = vadd.xlane.f32.xlu1 %v3516_v5  ;;  %v3311_v54 = vsel %vm525_vm4, %v7247_v4, 0.0 }
0x1323   :  { %v3314_v8 = vsel %vm525_vm4, %v7249_v59, 0.0 }
0x1325   :  { %3312 = vadd.xlane.f32.xlu0 %v3311_v54 }
0x1326   :  { %3315 = vadd.xlane.f32.xlu1 %v3314_v8 }
0x1337   :  { %7098 = vrot.lane.b32.xlu1 %v8227_v20, %s7647_s11 }
0x133b   :  { %7093 = vrot.lane.b32.xlu0 %v8227_v20, %s7649_s16  ;;  %7103 = vrot.lane.b32.xlu1 %v8227_v20, %s7648_s0 }
0x133f   :  { %3772 = vrot.lane.b32.xlu0 %v8223_v7, %s7650_s18  ;;  %3774 = vrot.lane.b32.xlu1 %v8220_v39, %s7650_s18 }
0x1343   :  { %7108 = vrot.lane.b32.xlu0 %v8227_v20, %s7652_s13  ;;  %4057 = vrot.lane.b32.xlu1 %v8223_v7, %s7651_s22 }
0x1347   :  { %4059 = vrot.lane.b32.xlu0 %v8220_v39, %s7651_s22 }
0x13ae   :  { %v3515_v9 = vpop.xlane.xlu0 %3514 }
0x13af   :  { %v3518_v62 = vpop.xlane.xlu1 %3517  ;;  %7250 = vrcp.f32 %v3515_v9 }
0x13b2   :  { %v3313_v10 = vpop.xlane.xlu0 %3312 }
0x13b3   :  { %7252 = vrcp.f32 %v3313_v10  ;;  %v3316_v11 = vpop.xlane.xlu1 %3315 }
0x13b4   :  { %7254 = vrcp.f32 %v3316_v11 }
0x13b5   :  { %7256 = vrcp.f32 %v3518_v62  ;;  %v8333_v62 = vadd.f32 %v8263_v34, %v8217_v6 }
0x13b6   :  { %v7094_v12 = vpop.permute.xlu0 %7093 }
0x13b7   :  { %v7096_v13 = vunpack.i.h.bf16 %v7094_v12  ;;  %v7095_v14 = vunpack.i.l.bf16 %v7094_v12  ;;  %v7099_v15 = vpop.permute.xlu1 %7098  ;;  %v8337_v10 = vpack.i.bf16 %v8333_v62, %v8308_v24 }
0x13b8   :  { %v7101_v16 = vunpack.i.h.bf16 %v7099_v15  ;;  %v7100_v33 = vunpack.i.l.bf16 %v7099_v15 }
0x13b9   :  { %v6825_v17 = vpack.c.bf16 %v7096_v13, %v7095_v14  ;;  %v7251_v18 = vpop.eup %7250 }
0x13ba   :  { %v6835_v36 = vpack.c.bf16 %v7101_v16, %v7100_v33  ;;  %v3773_v19 = vpop.permute.xlu0 %3772  ;;  %v3521_v30 = vmul.f32 %v7251_v18, %v7243_v3 }
0x13bb   :  { %6826 = vmatprep.subr.bf16.mxu1 %v6825_v17  ;;  %v7104_v7 = vpop.permute.xlu1 %7103 }
0x13bc   :  { %6828 = vmatpush3.bf16.msra.mxu1 %v6825_v17  ;;  %v7106_v29 = vunpack.i.h.bf16 %v7104_v7  ;;  %v7105_v22 = vunpack.i.l.bf16 %v7104_v7 }
0x13bd   :  { %v7253_v39 = vpop.eup %7252  ;;  %6836 = vmatprep.subr.bf16.mxu1 %v6835_v36 }
0x13be   :  { %v7255_v23 = vpop.eup %7254  ;;  %v3319_v42 = vmul.f32 %v7253_v39, %v7247_v4  ;;  %v6839_v21 = vpack.c.bf16 %v7106_v29, %v7105_v22  ;;  %v7109_v40 = vpop.permute.xlu0 %7108  ;;  %v8360_v22 = vld [vmem:[%s8540_s23 + $0x10] sm:$0xff] }
0x13bf   :  { %v3320_v26 = vmul.f32 %v7255_v23, %v7249_v59  ;;  %v7257_v27 = vpop.eup %7256  ;;  %v7111_v43 = vunpack.i.h.bf16 %v7109_v40  ;;  %v7110_v44 = vunpack.i.l.bf16 %v7109_v40  ;;  %v3775_v52 = vpop.permute.xlu1 %3774 }
0x13c0   :  { %6522 = vmatprep.mubr.msk.f32.mxu1 %vm525_vm4, %v3319_v42  ;;  %v3522_v38 = vmul.f32 %v7257_v27, %v7245_v25 }
0x13c1   :  { %6523 = vmatmul.mubr.msk.f32.vlgmr.msra.gmra.mrb[32].mxu1 %vm525_vm4, %v3320_v26  ;;  %v6849_v61 = vpack.c.bf16 %v7111_v43, %v7110_v44 }
0x13c2   :  { %6838 = vmatpush3.bf16.msra.mxu1 %v6835_v36  ;;  %6536 = vmatprep.mubr.msk.f32.mxu1 %vm525_vm4, %v3521_v30  ;;  %v4060_v51 = vpop.permute.xlu0 %4059 }
0x13c3   :  { %6841 = vmatprep.subr.msk.bf16.mxu1 %vm7900_vm3, %v6839_v21  ;;  %v4058_v53 = vpop.permute.xlu1 %4057 }
0x13c5   :  { %6537 = vmatmul.mubr.msk.f32.vlgmr.msra.gmra.mrb[34].mxu1 %vm525_vm4, %v3522_v38 }
0x13c6   :  { %6553 = vmatprep.mubr.msk.f32.mxu1 %vm439_vm2, %v3773_v19 }
0x13cb   :  { %6844 = vmatpush3.bf16.xpose.msk.msra.mxu1 %vm7900_vm3, %v6839_v21 }
0x13cc   :  { %6851 = vmatprep.subr.msk.bf16.mxu1 %vm7900_vm3, %v6849_v61 }
0x13d2   :  { %6554 = vmatmul.mubr.msk.f32.vlgmr.msra.gmra.mrb[36].mxu1 %vm439_vm2, %v3775_v52 }
0x13d3   :  { %6854 = vmatpush3.bf16.xpose.msk.msra.mxu1 %vm7900_vm3, %v6849_v61  ;;  %6572 = vmatprep.mubr.msk.f32.mxu1 %vm439_vm2, %v4058_v53 }
0x13da   :  { %6573 = vmatmul.mubr.msk.f32.vlgmr.msra.gmra.mrb[38].mxu1 %vm439_vm2, %v4060_v51 }
0x13db   :  { %6591 = vmatprep.mubr.msk.f32.mxu1 %vm439_vm2, %v8308_v24 }
0x1494   :  { %v6524_v46 = vpop.f32.mrb[32].mxu1 }
0x1495   :  { %v3399_v55 = vpop.f32.mrb[33].mxu1 }
0x1498   :  { %v6538_v31 = vpop.f32.mrb[34].mxu1 }
0x1499   :  { %v3601_v56 = vpop.f32.mrb[35].mxu1 }
0x149a   :  { %6541 = vmatprep.mubr.msk.f32.mxu0 %vm439_vm2, %v3601_v56 }
0x149b   :  { %6542 = vmatmul.mubr.msk.f32.vlgmr.msra.gmra.mrb[24].mxu0 %vm439_vm2, %v6538_v31 }
0x149c   :  { %6546 = vmatprep.mubr.msk.f32.mxu0 %vm439_vm2, %v3399_v55  ;;  %6545 = vmatpush3.msra.mxu0 %v8319_v28 }
0x14a3   :  { %6547 = vmatmul.mubr.msk.f32.vlgmr.msra.gmra.mrb[24].mxu0 %vm439_vm2, %v6524_v46 }
0x14a5   :  { %v6555_v57 = vpop.f32.mrb[36].mxu1 }
0x14a6   :  { %v3864_v58 = vmul.f32 0.35355338, %v6555_v57  ;;  %v3854_v60 = vpop.f32.mrb[37].mxu1 }
0x14a7   :  { %v3863_v63 = vmul.f32 0.35355338, %v3854_v60 }
0x14a8   :  { %v3868_v0 = vsel %vm525_vm4, %v3864_v58, -inf }
0x14a9   :  { %3869 = vmax.xlane.f32.xlu0 %v3868_v0  ;;  %v3865_v49 = vsel %vm525_vm4, %v3863_v63, -inf }
0x14aa   :  { %3866 = vmax.xlane.f32.xlu1 %v3865_v49 }
0x14ad   :  { %v6574_v50 = vpop.f32.mrb[38].mxu1 }
0x14ae   :  { %v4139_v1 = vpop.f32.mrb[39].mxu1  ;;  %v4149_v34 = vmul.f32 0.35355338, %v6574_v50 }
0x14af   :  { %v4148_v6 = vmul.f32 0.35355338, %v4139_v1 }
0x14b0   :  { %v4153_v12 = vsel %vm525_vm4, %v4149_v34, -inf }
0x14b1   :  { %v4150_v11 = vsel %vm525_vm4, %v4148_v6, -inf }
0x1536   :  { %v3870_v2 = vpop.xlane.xlu0 %3869 }
0x1537   :  { %v3872_v3 = vsub.f32 %v3864_v58, %v3870_v2  ;;  %v3867_v25 = vpop.xlane.xlu1 %3866 }
0x1538   :  { %v3871_v37 = vsub.f32 %v3863_v63, %v3867_v25 }
0x1539   :  { %v3875_v4 = vmul.f32 1.442695, %v3872_v3 }
0x153a   :  { %v3873_v5 = vmul.f32 1.442695, %v3871_v37 }
0x153b   :  { %7258 = vpow2.f32 %v3875_v4 }
0x153c   :  { %7260 = vpow2.f32 %v3873_v5 }
0x1545   :  { %v7259_v59 = vpop.eup %7258 }
0x1546   :  { %v7261_v54 = vpop.eup %7260  ;;  %v3880_v8 = vsel %vm525_vm4, %v7259_v59, 0.0 }
0x1547   :  { %3881 = vadd.xlane.f32.xlu1 %v3880_v8  ;;  %v3877_v9 = vsel %vm525_vm4, %v7261_v54, 0.0 }
0x1548   :  { %3878 = vadd.xlane.f32.xlu0 %v3877_v9 }
0x1558   :  { %7118 = vrot.lane.b32.xlu1 %v8337_v10, %s7645_s27 }
0x155c   :  { %7123 = vrot.lane.b32.xlu1 %v8337_v10, %s7644_s17 }
0x155e   :  { %7113 = vrot.lane.b32.xlu0 %v8227_v20, %s7653_s14 }
0x1560   :  { %4544 = vrot.lane.b32.xlu1 %v8333_v62, %s7646_s10 }
0x1562   :  { %4542 = vrot.lane.b32.xlu0 %v8308_v24, %s7646_s10 }
0x1581   :  { %4151 = vmax.xlane.f32.xlu0 %v4150_v11 }
0x1584   :  { %4154 = vmax.xlane.f32.xlu1 %v4153_v12 }
0x1595   :  { %7128 = vrot.lane.b32.xlu1 %v8227_v20, %s7654_s15 }
0x1599   :  { %4906 = vrot.lane.b32.xlu1 %v8308_v24, %s7650_s18 }
0x159d   :  { %4908 = vrot.lane.b32.xlu1 %v8333_v62, %s7650_s18 }
0x15d4   :  { %v3882_v13 = vpop.xlane.xlu1 %3881 }
0x15d5   :  { %7262 = vrcp.f32 %v3882_v13  ;;  %v3879_v14 = vpop.xlane.xlu0 %3878 }
0x15d6   :  { %7264 = vrcp.f32 %v3879_v14 }
0x15d8   :  { %v7119_v15 = vpop.permute.xlu1 %7118 }
0x15d9   :  { %v7121_v16 = vunpack.i.h.bf16 %v7119_v15  ;;  %v7120_v33 = vunpack.i.l.bf16 %v7119_v15  ;;  %v7114_v17 = vpop.permute.xlu0 %7113 }
0x15da   :  { %v7116_v36 = vunpack.i.h.bf16 %v7114_v17  ;;  %v7115_v7 = vunpack.i.l.bf16 %v7114_v17 }
0x15db   :  { %v6859_v18 = vpack.c.bf16 %v7121_v16, %v7120_v33 }
0x15dc   :  { %v6845_v39 = vpack.c.bf16 %v7116_v36, %v7115_v7  ;;  %v7124_v20 = vpop.permute.xlu1 %7123  ;;  %v8395_v7 = vld [vmem:[%s8540_s23 + $0x18] sm:$0xff] }
0x15dd   :  { %v7126_v19 = vunpack.i.h.bf16 %v7124_v20  ;;  %v7125_v29 = vunpack.i.l.bf16 %v7124_v20  ;;  %6861 = vmatprep.subr.msk.bf16.mxu1 %vm7900_vm3, %v6859_v18  ;;  %v4543_v21 = vpop.permute.xlu0 %4542 }
0x15de   :  { %6846 = vmatprep.subr.bf16.mxu0 %v6845_v39  ;;  %6864 = vmatpush3.bf16.xpose.msk.msra.mxu1 %vm7900_vm3, %v6859_v18 }
0x15df   :  { %v7263_v23 = vpop.eup %7262  ;;  %v6869_v42 = vpack.c.bf16 %v7126_v19, %v7125_v29  ;;  %6848 = vmatpush3.bf16.msra.mxu0 %v6845_v39 }
0x15e0   :  { %v7265_v26 = vpop.eup %7264  ;;  %6563 = vmatprep.subr.mxu0 %v8360_v22  ;;  %v3886_v30 = vmul.f32 %v7263_v23, %v7259_v59  ;;  %v4545_v38 = vpop.permute.xlu1 %4544 }
0x15e1   :  { %6871 = vmatprep.subr.msk.bf16.mxu1 %vm7900_vm3, %v6869_v42  ;;  %v3885_v27 = vmul.f32 %v7265_v26, %v7261_v54 }
0x15e3   :  { %6560 = vmatprep.mubr.msk.f32.mxu0 %vm525_vm4, %v3885_v27 }
0x15e4   :  { %6561 = vmatmul.mubr.msk.f32.vlgmr.msra.gmra.mrb[26].mxu0 %vm525_vm4, %v3886_v30 }
0x15e5   :  { %6592 = vmatmul.mubr.msk.f32.vlgmr.msra.gmra.mrb[40].mxu1 %vm439_vm2, %v8333_v62  ;;  %6564 = vmatpush3.msra.mxu0 %v8360_v22 }
0x15e6   :  { %6874 = vmatpush3.bf16.xpose.msk.msra.mxu1 %vm7900_vm3, %v6869_v42  ;;  %6605 = vmatprep.mubr.msk.f32.mxu1 %vm439_vm2, %v4543_v21 }
0x15ed   :  { %6606 = vmatmul.mubr.msk.f32.vlgmr.msra.gmra.mrb[42].mxu1 %vm439_vm2, %v4545_v38 }
0x160e   :  { %v4152_v40 = vpop.xlane.xlu0 %4151 }
0x160f   :  { %v4156_v43 = vsub.f32 %v4148_v6, %v4152_v40 }
0x1611   :  { %v4158_v44 = vmul.f32 1.442695, %v4156_v43  ;;  %v4155_v61 = vpop.xlane.xlu1 %4154 }
0x1612   :  { %v4157_v52 = vsub.f32 %v4149_v34, %v4155_v61 }
0x1613   :  { %7266 = vpow2.f32 %v4158_v44 }
0x1614   :  { %v4160_v53 = vmul.f32 1.442695, %v4157_v52 }
0x1615   :  { %v7129_v51 = vpop.permute.xlu1 %7128 }
0x1616   :  { %7268 = vpow2.f32 %v4160_v53  ;;  %v7131_v46 = vunpack.i.h.bf16 %v7129_v51  ;;  %v7130_v55 = vunpack.i.l.bf16 %v7129_v51 }
0x1618   :  { %v6855_v31 = vpack.c.bf16 %v7131_v46, %v7130_v55 }
0x1619   :  { %v4907_v56 = vpop.permute.xlu1 %4906 }
0x161a   :  { %6856 = vmatprep.subr.bf16.mxu0 %v6855_v31  ;;  %6629 = vmatprep.mubr.msk.f32.mxu1 %vm439_vm2, %v4907_v56 }
0x161d   :  { %v7267_v57 = vpop.eup %7266  ;;  %v4909_v13 = vpop.permute.xlu1 %4908 }
0x161e   :  { %v4162_v58 = vsel %vm525_vm4, %v7267_v57, 0.0 }
0x161f   :  { %4163 = vadd.xlane.f32.xlu0 %v4162_v58 }
0x1620   :  { %v7269_v60 = vpop.eup %7268 }
0x1621   :  { %v4165_v63 = vsel %vm525_vm4, %v7269_v60, 0.0 }
0x1623   :  { %4166 = vadd.xlane.f32.xlu0 %v4165_v63 }
0x1639   :  { %7133 = vrot.lane.b32.xlu0 %v8337_v10, %s7648_s0 }
0x16ac   :  { %v4164_v0 = vpop.xlane.xlu0 %4163 }
0x16ad   :  { %7270 = vrcp.f32 %v4164_v0 }
0x16b0   :  { %v4167_v49 = vpop.xlane.xlu0 %4166 }
0x16b1   :  { %7272 = vrcp.f32 %v4167_v49 }
0x16b4   :  { %v7134_v50 = vpop.permute.xlu0 %7133 }
0x16b5   :  { %v7136_v1 = vunpack.i.h.bf16 %v7134_v50  ;;  %v7135_v2 = vunpack.i.l.bf16 %v7134_v50 }
0x16b7   :  { %v7271_v3 = vpop.eup %7270  ;;  %v6879_v25 = vpack.c.bf16 %v7136_v1, %v7135_v2  ;;  %v6562_v37 = vpop.f32.mrb[26].mxu0 }
0x16b8   :  { %v3965_v4 = vpop.f32.mrb[27].mxu0  ;;  %v6593_v5 = vpop.f32.mrb[40].mxu1  ;;  %v4170_v59 = vmul.f32 %v7271_v3, %v7267_v57 }
0x16b9   :  { %v4432_v54 = vmul.f32 0.35355338, %v6593_v5  ;;  %6565 = vmatprep.mubr.msk.f32.mxu0 %vm439_vm2, %v3965_v4  ;;  %v4422_v8 = vpop.f32.mrb[41].mxu1  ;;  %6881 = vmatprep.subr.msk.bf16.mxu1 %vm7900_vm3, %v6879_v25 }
0x16ba   :  { %v4431_v9 = vmul.f32 0.35355338, %v4422_v8  ;;  %6566 = vmatmul.mubr.msk.f32.vlgmr.msra.gmra.mrb[24].mxu0 %vm439_vm2, %v6562_v37  ;;  %6884 = vmatpush3.bf16.xpose.msk.msra.mxu1 %vm7900_vm3, %v6879_v25 }
0x16bb   :  { %v7273_v6 = vpop.eup %7272  ;;  %6858 = vmatpush3.bf16.msra.mxu0 %v6855_v31  ;;  %6579 = vmatprep.mubr.msk.f32.mxu0 %vm525_vm4, %v4170_v59  ;;  %v4436_v34 = vsel %vm525_vm4, %v4432_v54, -inf }
0x16bc   :  { %v4171_v11 = vmul.f32 %v7273_v6, %v7269_v60  ;;  %4437 = vmax.xlane.f32.xlu1 %v4436_v34  ;;  %v4433_v12 = vsel %vm525_vm4, %v4431_v9, -inf  ;;  %6582 = vmatprep.subr.mxu0 %v8395_v7 }
0x16bd   :  { %4434 = vmax.xlane.f32.xlu0 %v4433_v12 }
0x16be   :  { %6580 = vmatmul.mubr.msk.f32.vlgmr.msra.gmra.mrb[28].mxu0 %vm525_vm4, %v4171_v11 }
0x16bf   :  { %6583 = vmatpush3.msra.mxu0 %v8395_v7 }
0x16c0   :  { %v6607_v14 = vpop.f32.mrb[42].mxu1 }
0x16c1   :  { %v4624_v15 = vpop.f32.mrb[43].mxu1  ;;  %6630 = vmatmul.mubr.msk.f32.vlgmr.msra.gmra.mrb[44].mxu1 %vm439_vm2, %v4909_v13  ;;  %v4634_v33 = vmul.f32 0.35355338, %v6607_v14 }
0x16c2   :  { %v4633_v16 = vmul.f32 0.35355338, %v4624_v15 }
0x16c3   :  { %v4638_v36 = vsel %vm525_vm4, %v4634_v33, -inf }
0x16c4   :  { %v4635_v17 = vsel %vm525_vm4, %v4633_v16, -inf }
0x16c5   :  { %4636 = vmax.xlane.f32.xlu0 %v4635_v17 }
0x16c9   :  { %4639 = vmax.xlane.f32.xlu0 %v4638_v36 }
0x1749   :  { %v4438_v18 = vpop.xlane.xlu1 %4437 }
0x174a   :  { %v4440_v39 = vsub.f32 %v4432_v54, %v4438_v18  ;;  %v4435_v20 = vpop.xlane.xlu0 %4434 }
0x174b   :  { %v4439_v19 = vsub.f32 %v4431_v9, %v4435_v20 }
0x174c   :  { %v4443_v29 = vmul.f32 1.442695, %v4440_v39 }
0x174d   :  { %v4441_v23 = vmul.f32 1.442695, %v4439_v19 }
0x174e   :  { %7274 = vpow2.f32 %v4443_v29 }
0x174f   :  { %7276 = vpow2.f32 %v4441_v23 }
0x1752   :  { %v4637_v42 = vpop.xlane.xlu0 %4636 }
0x1753   :  { %v4641_v26 = vsub.f32 %v4633_v16, %v4637_v42 }
0x1755   :  { %v4643_v27 = vmul.f32 1.442695, %v4641_v26 }
0x1756   :  { %v4640_v30 = vpop.xlane.xlu0 %4639 }
0x1757   :  { %7278 = vpow2.f32 %v4643_v27  ;;  %v4642_v21 = vsub.f32 %v4634_v33, %v4640_v30  ;;  %v8435_v30 = vld [vmem:[%s8541_s26] ss:$0 sm:$0xff] }
0x1758   :  { %v7275_v38 = vpop.eup %7274 }
0x1759   :  { %v7277_v40 = vpop.eup %7276  ;;  %v4645_v43 = vmul.f32 1.442695, %v4642_v21  ;;  %v4448_v44 = vsel %vm525_vm4, %v7275_v38, 0.0 }
0x175a   :  { %4449 = vadd.xlane.f32.xlu0 %v4448_v44  ;;  %v4445_v61 = vsel %vm525_vm4, %v7277_v40, 0.0 }
0x175b   :  { %7280 = vpow2.f32 %v4645_v43  ;;  %4446 = vadd.xlane.f32.xlu1 %v4445_v61 }
0x1761   :  { %v7279_v52 = vpop.eup %7278 }
0x1762   :  { %v4647_v53 = vsel %vm525_vm4, %v7279_v52, 0.0 }
0x1763   :  { %4648 = vadd.xlane.f32.xlu1 %v4647_v53 }
0x1765   :  { %v7281_v51 = vpop.eup %7280 }
0x1766   :  { %v4650_v46 = vsel %vm525_vm4, %v7281_v51, 0.0 }
0x1767   :  { %4651 = vadd.xlane.f32.xlu0 %v4650_v46 }
0x1774   :  { %7138 = vrot.lane.b32.xlu1 %v8337_v10, %s7649_s16 }
0x1778   :  { %7148 = vrot.lane.b32.xlu1 %v8337_v10, %s7652_s13 }
0x177c   :  { %5191 = vrot.lane.b32.xlu1 %v8308_v24, %s7651_s22 }
0x177d   :  { %7143 = vrot.lane.b32.xlu0 %v8337_v10, %s7647_s11 }
0x1781   :  { %5193 = vrot.lane.b32.xlu0 %v8333_v62, %s7651_s22 }
0x1791   :  { %v6581_v55 = vpop.f32.mrb[28].mxu0 }
0x1792   :  { %v4250_v31 = vpop.f32.mrb[29].mxu0 }
0x1793   :  { %6584 = vmatprep.mubr.msk.f32.mxu0 %vm439_vm2, %v4250_v31 }
0x1794   :  { %6585 = vmatmul.mubr.msk.f32.vlgmr.msra.gmra.mrb[24].mxu0 %vm439_vm2, %v6581_v55  ;;  %v6631_v56 = vpop.f32.mrb[44].mxu1 }
0x1795   :  { %v4988_v57 = vpop.f32.mrb[45].mxu1  ;;  %v4998_v58 = vmul.f32 0.35355338, %v6631_v56 }
0x1796   :  { %v4997_v60 = vmul.f32 0.35355338, %v4988_v57 }
0x1797   :  { %v5002_v24 = vsel %vm525_vm4, %v4998_v58, -inf }
0x1798   :  { %v4999_v63 = vsel %vm525_vm4, %v4997_v60, -inf }
0x17a0   :  { %5000 = vmax.xlane.f32.xlu1 %v4999_v63  ;;  %5003 = vmax.xlane.f32.xlu0 %v5002_v24 }
0x17e7   :  { %v4450_v49 = vpop.xlane.xlu0 %4449 }
0x17e8   :  { %v4447_v0 = vpop.xlane.xlu1 %4446 }
0x17e9   :  { %7282 = vrcp.f32 %v4447_v0 }
0x17ea   :  { %7284 = vrcp.f32 %v4450_v49 }
0x17f0   :  { %v4649_v62 = vpop.xlane.xlu1 %4648 }
0x17f1   :  { %7286 = vrcp.f32 %v4649_v62 }
0x17f3   :  { %v7283_v50 = vpop.eup %7282 }
0x17f4   :  { %v7139_v1 = vpop.permute.xlu1 %7138  ;;  %v4652_v2 = vpop.xlane.xlu0 %4651  ;;  %v4453_v3 = vmul.f32 %v7283_v50, %v7277_v40 }
0x17f5   :  { %v7141_v25 = vunpack.i.h.bf16 %v7139_v1  ;;  %v7140_v37 = vunpack.i.l.bf16 %v7139_v1  ;;  %7288 = vrcp.f32 %v4652_v2  ;;  %v7285_v5 = vpop.eup %7284 }
0x17f6   :  { %6598 = vmatprep.mubr.msk.f32.mxu0 %vm525_vm4, %v4453_v3  ;;  %v4454_v12 = vmul.f32 %v7285_v5, %v7275_v38 }
0x17f7   :  { %v6865_v4 = vpack.c.bf16 %v7141_v25, %v7140_v37 }
0x17f8   :  { %v7149_v59 = vpop.permute.xlu1 %7148  ;;  %v7144_v54 = vpop.permute.xlu0 %7143 }
0x17f9   :  { %v7151_v8 = vunpack.i.h.bf16 %v7149_v59  ;;  %v7150_v9 = vunpack.i.l.bf16 %v7149_v59  ;;  %v7146_v6 = vunpack.i.h.bf16 %v7144_v54  ;;  %v7145_v34 = vunpack.i.l.bf16 %v7144_v54  ;;  %6866 = vmatprep.subr.bf16.mxu0 %v6865_v4 }
0x17fa   :  { %6868 = vmatpush3.bf16.msra.mxu0 %v6865_v4 }
0x17fb   :  { %v7287_v11 = vpop.eup %7286  ;;  %v6889_v13 = vpack.c.bf16 %v7151_v8, %v7150_v9  ;;  %v6875_v14 = vpack.c.bf16 %v7146_v6, %v7145_v34 }
0x17fc   :  { %v5192_v15 = vpop.permute.xlu1 %5191  ;;  %v4655_v16 = vmul.f32 %v7287_v11, %v7279_v52  ;;  %v5194_v36 = vpop.permute.xlu0 %5193 }
0x17fd   :  { %6599 = vmatmul.mubr.msk.f32.vlgmr.msra.gmra.mrb[30].mxu0 %vm525_vm4, %v4454_v12  ;;  %6876 = vmatprep.subr.bf16.mxu0 %v6875_v14 }
0x17fe   :  { %6891 = vmatprep.subr.msk.bf16.mxu1 %vm7900_vm3, %v6889_v13  ;;  %6648 = vmatprep.mubr.msk.f32.mxu1 %vm439_vm2, %v5192_v15 }
0x17ff   :  { %v7289_v33 = vpop.eup %7288  ;;  %6878 = vmatpush3.bf16.msra.mxu0 %v6875_v14  ;;  %6612 = vmatprep.mubr.msk.f32.mxu0 %vm525_vm4, %v4655_v16 }
0x1800   :  { %v4656_v17 = vmul.f32 %v7289_v33, %v7281_v51  ;;  %6894 = vmatpush3.bf16.xpose.msk.msra.mxu1 %vm7900_vm3, %v6889_v13  ;;  %6615 = vmatprep.subr.mxu0 %v8314_v48 }
0x1802   :  { %6613 = vmatmul.mubr.msk.f32.vlgmr.msra.gmra.mrb[32].mxu0 %vm525_vm4, %v4656_v17 }
0x1803   :  { %6616 = vmatpush3.msra.mxu0 %v8314_v48 }
0x1804   :  { %6620 = vmatprep.subr.mxu0 %v8319_v28 }
0x1807   :  { %6649 = vmatmul.mubr.msk.f32.vlgmr.msra.gmra.mrb[46].mxu1 %vm439_vm2, %v5194_v36 }
0x182d   :  { %v5001_v18 = vpop.xlane.xlu1 %5000  ;;  %v5004_v39 = vpop.xlane.xlu0 %5003 }
0x182e   :  { %v5005_v20 = vsub.f32 %v4997_v60, %v5001_v18  ;;  %v5006_v19 = vsub.f32 %v4998_v58, %v5004_v39 }
0x1830   :  { %v5007_v29 = vmul.f32 1.442695, %v5005_v20  ;;  %v5009_v23 = vmul.f32 1.442695, %v5006_v19 }
0x1832   :  { %7290 = vpow2.f32 %v5007_v29 }
0x1833   :  { %7292 = vpow2.f32 %v5009_v23 }
0x183c   :  { %v7291_v41 = vpop.eup %7290 }
0x183d   :  { %v7293_v42 = vpop.eup %7292  ;;  %v5011_v26 = vsel %vm525_vm4, %v7291_v41, 0.0 }
0x183e   :  { %5012 = vadd.xlane.f32.xlu0 %v5011_v26  ;;  %v5014_v48 = vsel %vm525_vm4, %v7293_v42, 0.0 }
0x183f   :  { %5015 = vadd.xlane.f32.xlu1 %v5014_v48 }
0x1854   :  { %7153 = vrot.lane.b32.xlu0 %v8337_v10, %s7653_s14 }
0x1867   :  { %v6586_v27 = vpop.f32.mrb[24].mxu0 }
0x1868   :  { %v4331_v21 = vpop.f32.mrb[25].mxu0 }
0x1869   :  { %v5483_v38 = vadd.f32 %v8435_v30, %v4331_v21 }
0x186b   :  { %v8439_v40 = vadd.f32 %v5483_v38, %v8197_v45 }
0x186d   :  { %v5493_v43 = vsel %vm335_vm1, %v8439_v40, 0.0 }
0x1873   :  { %5494 = vadd.xlane.f32.xlu0 %v5493_v43 }
0x18cb   :  { %v5013_v44 = vpop.xlane.xlu0 %5012 }
0x18cc   :  { %v5016_v51 = vpop.xlane.xlu1 %5015  ;;  %7294 = vrcp.f32 %v5013_v44 }
0x18cd   :  { %7296 = vrcp.f32 %v5016_v51  ;;  %v3094_v51 = vld [vmem:[%s8542_s19 + $0x10] sm:$0xff] }
0x18cf   :  { %v7154_v52 = vpop.permute.xlu0 %7153 }
0x18d0   :  { %v6600_v61 = vpop.f32.mrb[30].mxu0  ;;  %v7156_v46 = vunpack.i.h.bf16 %v7154_v52  ;;  %v7155_v55 = vunpack.i.l.bf16 %v7154_v52 }
0x18d1   :  { %v4533_v53 = vpop.f32.mrb[31].mxu0 }
0x18d2   :  { %v6885_v57 = vpack.c.bf16 %v7156_v46, %v7155_v55  ;;  %v3095_v46 = vld [vmem:[%s8542_s19 + $0x18] sm:$0xff] }
0x18d3   :  { %v6903_v55 = vpack.c.bf16 %v3095_v46, %v3094_v51 }
0x18d5   :  { %v6614_v31 = vpop.f32.mrb[32].mxu0 }
0x18d6   :  { %v4735_v56 = vpop.f32.mrb[33].mxu0  ;;  %v7295_v60 = vpop.eup %7294 }
0x18d7   :  { %6617 = vmatprep.mubr.msk.f32.mxu0 %vm439_vm2, %v4735_v56  ;;  %v7297_v49 = vpop.eup %7296  ;;  %v5019_v62 = vmul.f32 %v7295_v60, %v7291_v41 }
0x18d8   :  { %6618 = vmatmul.mubr.msk.f32.vlgmr.msra.gmra.mrb[34].mxu0 %vm439_vm2, %v6614_v31  ;;  %v5020_v50 = vmul.f32 %v7297_v49, %v7293_v42 }
0x18d9   :  { %6621 = vmatpush3.msra.mxu0 %v8319_v28  ;;  %6622 = vmatprep.mubr.msk.f32.mxu0 %vm439_vm2, %v4533_v53  ;;  %v3093_v53 = vld [vmem:[%s8542_s19 + $0x8] sm:$0xff] }
0x18da   :  { %v6650_v45 = vpop.f32.mrb[46].mxu1  ;;  %6886 = vmatprep.subr.bf16.mxu0 %v6885_v57 }
0x18db   :  { %v5273_v58 = vpop.f32.mrb[47].mxu1  ;;  %v5283_v24 = vmul.f32 0.35355338, %v6650_v45 }
0x18dc   :  { %v5282_v63 = vmul.f32 0.35355338, %v5273_v58 }
0x18dd   :  { %v5287_v28 = vsel %vm525_vm4, %v5283_v24, -inf }
0x18de   :  { %v5284_v0 = vsel %vm525_vm4, %v5282_v63, -inf }
0x18df   :  { %5285 = vmax.xlane.f32.xlu1 %v5284_v0 }
0x18e0   :  { %6623 = vmatmul.mubr.msk.f32.vlgmr.msra.gmra.mrb[34].mxu0 %vm439_vm2, %v6600_v61 }
0x18e1   :  { %6888 = vmatpush3.bf16.msra.mxu0 %v6885_v57  ;;  %6636 = vmatprep.mubr.msk.f32.mxu0 %vm525_vm4, %v5019_v62 }
0x18e2   :  { %6639 = vmatprep.subr.mxu0 %v8360_v22 }
0x18e3   :  { %5288 = vmax.xlane.f32.xlu1 %v5287_v28 }
0x18e4   :  { %6637 = vmatmul.mubr.msk.f32.vlgmr.msra.gmra.mrb[36].mxu0 %vm525_vm4, %v5020_v50 }
0x18e5   :  { %6640 = vmatpush3.msra.mxu0 %v8360_v22  ;;  %v5484_v22 = vadd.f32 %v6586_v27, %v8435_v30 }
0x18e7   :  { %v5488_v9 = vadd.f32 %v5484_v22, %v8200_v47 }
0x18e9   :  { %v5496_v11 = vsel %vm335_vm1, %v5488_v9, 0.0 }
0x1900   :  { %v5495_v20 = vpop.xlane.xlu0 %5494 }
0x1901   :  { %v5505_v23 = vmul.f32 0.03125, %v5495_v20 }
0x196c   :  { %v5286_v1 = vpop.xlane.xlu1 %5285 }
0x196d   :  { %v5290_v2 = vsub.f32 %v5282_v63, %v5286_v1 }
0x196f   :  { %v5292_v37 = vmul.f32 1.442695, %v5290_v2 }
0x1970   :  { %v5289_v3 = vpop.xlane.xlu1 %5288 }
0x1971   :  { %v5291_v25 = vsub.f32 %v5283_v24, %v5289_v3 }
0x1973   :  { %v5294_v4 = vmul.f32 1.442695, %v5291_v25 }
0x1975   :  { %7298 = vpow2.f32 %v5294_v4 }
0x1976   :  { %7300 = vpow2.f32 %v5292_v37  ;;  %v6047_v37 = vld [vmem:[%s8543_s1] ss:$0 sm:$0xff] }
0x197f   :  { %v7299_v5 = vpop.eup %7298 }
0x1980   :  { %v5299_v59 = vsel %vm525_vm4, %v7299_v5, 0.0  ;;  %v7301_v54 = vpop.eup %7300 }
0x1981   :  { %5300 = vadd.xlane.f32.xlu1 %v5299_v59  ;;  %v5296_v8 = vsel %vm525_vm4, %v7301_v54, 0.0 }
0x1985   :  { %5297 = vadd.xlane.f32.xlu1 %v5296_v8 }
0x1996   :  { %7158 = vrot.lane.b32.xlu1 %v8337_v10, %s7654_s15 }
0x19b7   :  { %v6638_v6 = vpop.f32.mrb[36].mxu0 }
0x19b8   :  { %v5099_v34 = vpop.f32.mrb[37].mxu0 }
0x19b9   :  { %6641 = vmatprep.mubr.msk.f32.mxu0 %vm439_vm2, %v5099_v34  ;;  %v3096_v34 = vld [vmem:[%s8545_s8] sm:$0xff] }
0x19ba   :  { %5497 = vadd.xlane.f32.xlu1 %v5496_v11  ;;  %6642 = vmatmul.mubr.msk.f32.vlgmr.msra.gmra.mrb[34].mxu0 %vm439_vm2, %v6638_v6  ;;  %v3097_v11 = vld [vmem:[%s8545_s8 + $0x8] sm:$0xff] }
0x1a0e   :  { %v5301_v12 = vpop.xlane.xlu1 %5300 }
0x1a0f   :  { %7302 = vrcp.f32 %v5301_v12  ;;  %v3098_v12 = vld [vmem:[%s8545_s8 + $0x10] sm:$0xff] }
0x1a12   :  { %v5298_v13 = vpop.xlane.xlu1 %5297 }
0x1a13   :  { %7304 = vrcp.f32 %v5298_v13  ;;  %v6907_v13 = vpack.c.bf16 %v3097_v11, %v3096_v34 }
0x1a16   :  { %v7159_v14 = vpop.permute.xlu1 %7158 }
0x1a17   :  { %v7161_v15 = vunpack.i.h.bf16 %v7159_v14  ;;  %v7160_v10 = vunpack.i.l.bf16 %v7159_v14  ;;  %v3099_v14 = vld [vmem:[%s8545_s8 + $0x18] sm:$0xff] }
0x1a19   :  { %v6895_v16 = vpack.c.bf16 %v7161_v15, %v7160_v10  ;;  %v7303_v33 = vpop.eup %7302  ;;  %v6911_v15 = vpack.c.bf16 %v3099_v14, %v3098_v12  ;;  %v3100_v10 = vld [vmem:[%s8545_s8 + $0x20] sm:$0xff] }
0x1a1a   :  { %v5305_v36 = vmul.f32 %v7303_v33, %v7299_v5  ;;  %v6048_v5 = vld [vmem:[%s8544_s28] ss:$0 sm:$0xff] }
0x1a1b   :  { %6896 = vmatprep.subr.bf16.mxu0 %v6895_v16 }
0x1a1c   :  { %6898 = vmatpush3.bf16.msra.mxu0 %v6895_v16  ;;  %v3101_v16 = vld [vmem:[%s8545_s8 + $0x28] sm:$0xff] }
0x1a1d   :  { %v7305_v47 = vpop.eup %7304  ;;  %6658 = vmatprep.subr.mxu0 %v8395_v7  ;;  %v6915_v33 = vpack.c.bf16 %v3101_v16, %v3100_v10 }
0x1a1e   :  { %v5304_v17 = vmul.f32 %v7305_v47, %v7301_v54  ;;  %v3102_v47 = vld [vmem:[%s8545_s8 + $0x30] sm:$0xff] }
0x1a20   :  { %6655 = vmatprep.mubr.msk.f32.mxu0 %vm525_vm4, %v5304_v17  ;;  %v3103_v17 = vld [vmem:[%s8545_s8 + $0x38] sm:$0xff] }
0x1a21   :  { %6656 = vmatmul.mubr.msk.f32.vlgmr.msra.gmra.mrb[38].mxu0 %vm525_vm4, %v5305_v36  ;;  %v6919_v36 = vpack.c.bf16 %v3103_v17, %v3102_v47  ;;  %v6060_v47 = vld [vmem:[%s7793_s24] ss:$0 sm:$0xff] }
0x1a22   :  { %6659 = vmatpush3.msra.mxu0 %v8395_v7  ;;  %v5509_v7 = vsub.f32 %v8439_v40, %v5505_v23  ;;  %v3092_v40 = vld [vmem:[%s8542_s19] sm:$0xff] }
0x1a23   :  { %6908 = vmatprep.subr.bf16.mxu0 %v6907_v13 }
0x1a24   :  { %v5513_v61 = vmul.f32 %v5509_v7, %v5509_v7 }
0x1a47   :  { %v5498_v26 = vpop.xlane.xlu1 %5497 }
0x1a48   :  { %v5506_v27 = vmul.f32 0.03125, %v5498_v26 }
0x1a4a   :  { %v5510_v43 = vsub.f32 %v5488_v9, %v5506_v27 }
0x1a4c   :  { %v5514_v52 = vmul.f32 %v5510_v43, %v5510_v43 }
0x1af4   :  { %v6657_v18 = vpop.f32.mrb[38].mxu0 }
0x1af5   :  { %v5384_v39 = vpop.f32.mrb[39].mxu0 }
0x1af6   :  { %6660 = vmatprep.mubr.msk.f32.mxu0 %vm439_vm2, %v5384_v39 }
0x1af7   :  { %6661 = vmatmul.mubr.msk.f32.vlgmr.msra.gmra.mrb[34].mxu0 %vm439_vm2, %v6657_v18 }
0x1af8   :  { %6910 = vmatpush3.bf16.msra.mxu0 %v6907_v13 }
0x1af9   :  { %6912 = vmatprep.subr.bf16.mxu0 %v6911_v15 }
0x1afc   :  { %6914 = vmatpush3.bf16.msra.mxu0 %v6911_v15  ;;  %v6059_v15 = vld [vmem:[%s8548_s30] ss:$0 sm:$0xff] }
0x1afd   :  { %6916 = vmatprep.subr.bf16.mxu0 %v6915_v33 }
0x1b00   :  { %6918 = vmatpush3.bf16.msra.mxu0 %v6915_v33 }
0x1b01   :  { %6920 = vmatprep.subr.bf16.mxu0 %v6919_v36 }
0x1b04   :  { %6922 = vmatpush3.bf16.msra.mxu0 %v6919_v36 }
0x1bca   :  { %v6662_v19 = vpop.f32.mrb[34].mxu0 }
0x1bcb   :  { %v5465_v29 = vpop.f32.mrb[35].mxu0  ;;  %v5486_v41 = vadd.f32 %v6662_v19, %v8435_v30 }
0x1bcc   :  { %v5485_v42 = vadd.f32 %v8435_v30, %v5465_v29  ;;  %v5517_v30 = vsel %vm335_vm1, %v5513_v61, 0.0 }
0x1bcd   :  { %v5490_v21 = vadd.f32 %v5486_v41, %v8253_v35  ;;  %v6899_v35 = vpack.c.bf16 %v3093_v53, %v3092_v40 }
0x1bce   :  { %v5489_v48 = vadd.f32 %v5485_v42, %v8250_v32  ;;  %v5520_v32 = vsel %vm335_vm1, %v5514_v52, 0.0 }
0x1bcf   :  { %v5502_v44 = vsel %vm335_vm1, %v5490_v21, 0.0  ;;  %6900 = vmatprep.subr.bf16.mxu1 %v6899_v35 }
0x1bd0   :  { %v5499_v38 = vsel %vm335_vm1, %v5489_v48, 0.0  ;;  %6902 = vmatpush3.bf16.msra.mxu1 %v6899_v35 }
0x1bd1   :  { %5500 = vadd.xlane.f32.xlu0 %v5499_v38  ;;  %6904 = vmatprep.subr.bf16.mxu1 %v6903_v55 }
0x1bd4   :  { %6906 = vmatpush3.bf16.msra.mxu1 %v6903_v55 }
0x1bd5   :  { %5503 = vadd.xlane.f32.xlu0 %v5502_v44 }
0x1bd9   :  { %5518 = vadd.xlane.f32.xlu0 %v5517_v30 }
0x1bdd   :  { %5521 = vadd.xlane.f32.xlu0 %v5520_v32 }
0x1c5e   :  { %v5501_v31 = vpop.xlane.xlu0 %5500 }
0x1c5f   :  { %v5507_v56 = vmul.f32 0.03125, %v5501_v31 }
0x1c61   :  { %v5511_v57 = vsub.f32 %v5489_v48, %v5507_v56  ;;  %v6054_v56 = vld [vmem:[%s8547_s2] ss:$0 sm:$0xff] }
0x1c62   :  { %v5504_v45 = vpop.xlane.xlu0 %5503 }
0x1c63   :  { %v5508_v58 = vmul.f32 0.03125, %v5504_v45  ;;  %v5515_v60 = vmul.f32 %v5511_v57, %v5511_v57 }
0x1c65   :  { %v5512_v63 = vsub.f32 %v5490_v21, %v5508_v58  ;;  %v5523_v24 = vsel %vm335_vm1, %v5515_v60, 0.0 }
0x1c66   :  { %5524 = vadd.xlane.f32.xlu0 %v5523_v24  ;;  %v5519_v0 = vpop.xlane.xlu0 %5518 }
0x1c67   :  { %v5529_v49 = vmul.f32 0.03125, %v5519_v0  ;;  %v5516_v62 = vmul.f32 %v5512_v63, %v5512_v63 }
0x1c69   :  { %v5533_v50 = vadd.f32 1e-05, %v5529_v49  ;;  %v5526_v28 = vsel %vm335_vm1, %v5516_v62, 0.0 }
0x1c6a   :  { %5527 = vadd.xlane.f32.xlu1 %v5526_v28  ;;  %v5522_v1 = vpop.xlane.xlu0 %5521 }
0x1c6b   :  { %7306 = vrsqrt.f32 %v5533_v50  ;;  %v5530_v2 = vmul.f32 0.03125, %v5522_v1 }
0x1c6d   :  { %v5534_v3 = vadd.f32 1e-05, %v5530_v2 }
0x1c6f   :  { %7308 = vrsqrt.f32 %v5534_v3 }
0x1c75   :  { %v7307_v25 = vpop.eup %7306 }
0x1c76   :  { %v5541_v4 = vmul.f32 %v7307_v25, %v5509_v7 }
0x1c78   :  { %v5551_v59 = vmul.f32 %v6047_v37, %v5541_v4 }
0x1c79   :  { %v7309_v54 = vpop.eup %7308 }
0x1c7a   :  { %v5542_v8 = vmul.f32 %v7309_v54, %v5510_v43  ;;  %v8486_v22 = vadd.f32 %v6048_v5, %v5551_v59  ;;  %v6049_v43 = vld [vmem:[%s8546_s9] ss:$0 sm:$0xff] }
0x1c7c   :  { %6671 = vmatprep.mubr.msk.f32.mxu1 %vm335_vm1, %v8486_v22  ;;  %v5552_v9 = vmul.f32 %v6047_v37, %v5542_v8 }
0x1c7e   :  { %v5562_v6 = vadd.f32 %v6048_v5, %v5552_v9 }
0x1c80   :  { %6672 = vmatmul.mubr.msk.f32.vlgmr.msra.gmra.mrb[48].mxu1 %vm335_vm1, %v5562_v6 }
0x1cf3   :  { %v5525_v18 = vpop.xlane.xlu0 %5524 }
0x1cf4   :  { %v5531_v39 = vmul.f32 0.03125, %v5525_v18 }
0x1cf6   :  { %v5535_v20 = vadd.f32 1e-05, %v5531_v39  ;;  %v6061_v39 = vld [vmem:[%s7798_s20] ss:$0 sm:$0xff] }
0x1cf7   :  { %v5528_v19 = vpop.xlane.xlu1 %5527 }
0x1cf8   :  { %7310 = vrsqrt.f32 %v5535_v20  ;;  %v5532_v29 = vmul.f32 0.03125, %v5528_v19 }
0x1cfa   :  { %v5536_v23 = vadd.f32 1e-05, %v5532_v29 }
0x1cfc   :  { %7312 = vrsqrt.f32 %v5536_v23  ;;  %v6062_v23 = vld [vmem:[#allocation2] ss:$0 sm:$0xff] }
0x1d02   :  { %v7311_v41 = vpop.eup %7310 }
0x1d03   :  { %v5543_v42 = vmul.f32 %v7311_v41, %v5511_v57 }
0x1d05   :  { %v5553_v26 = vmul.f32 %v6047_v37, %v5543_v42 }
0x1d06   :  { %v7313_v48 = vpop.eup %7312 }
0x1d07   :  { %v5563_v7 = vadd.f32 %v6048_v5, %v5553_v26  ;;  %v5544_v27 = vmul.f32 %v7313_v48, %v5512_v63 }
0x1d09   :  { %6674 = vmatprep.mubr.msk.f32.mxu1 %vm335_vm1, %v5563_v7  ;;  %v5554_v21 = vmul.f32 %v6047_v37, %v5544_v27 }
0x1d0b   :  { %v5564_v38 = vadd.f32 %v6048_v5, %v5554_v21 }
0x1d0d   :  { %6675 = vmatmul.mubr.msk.f32.gmra.mrb[50].mxu1 %vm335_vm1, %v5564_v38 }
0x1d53   :  { %v6673_v44 = vpop.f32.mrb[48].mxu1 }
0x1d54   :  { %v5656_v61 = vadd.f32 %v6673_v44, %v6049_v43  ;;  %v5650_v30 = vpop.f32.mrb[49].mxu1 }
0x1d55   :  { %v5651_v52 = vadd.f32 %v6049_v43, %v5650_v30 }
0x1d56   :  { %v5670_v40 = vmax.f32 %v5656_v61, 0.0 }
0x1d57   :  { %v5669_v32 = vmax.f32 %v5651_v52, 0.0 }
0x1d59   :  { %6693 = vmatprep.mubr.msk.f32.mxu0 %vm2908_vm5, %v5669_v32 }
0x1d5a   :  { %6694 = vmatmul.mubr.msk.f32.vlgmr.msra.gmra.mrb[40].mxu0 %vm2908_vm5, %v5670_v40 }
0x1de0   :  { %v6676_v53 = vpop.f32.mrb[50].mxu1 }
0x1de1   :  { %v5666_v35 = vadd.f32 %v6676_v53, %v6049_v43  ;;  %v5660_v51 = vpop.f32.mrb[51].mxu1 }
0x1de2   :  { %v5661_v46 = vadd.f32 %v6049_v43, %v5660_v51 }
0x1de3   :  { %v5672_v31 = vmax.f32 %v5666_v35, 0.0 }
0x1de4   :  { %v5671_v55 = vmax.f32 %v5661_v46, 0.0 }
0x1de6   :  { %6696 = vmatprep.mubr.msk.f32.mxu0 %vm2908_vm5, %v5671_v55 }
0x1de7   :  { %6697 = vmatmul.mubr.msk.f32.gmra.mrb[42].mxu0 %vm2908_vm5, %v5672_v31 }
0x1e2d   :  { %v6695_v57 = vpop.f32.mrb[40].mxu0 }
0x1e2e   :  { %v5758_v45 = vpop.f32.mrb[41].mxu0 }
0x1e2f   :  { %v5759_v58 = vadd.f32 %v6054_v56, %v5758_v45 }
0x1e31   :  { %v5775_v60 = vadd.f32 %v5759_v58, %v8486_v22 }
0x1e33   :  { %v5779_v63 = vsel %vm335_vm1, %v5775_v60, 0.0 }
0x1e34   :  { %5780 = vadd.xlane.f32.xlu1 %v5779_v63 }
0x1eba   :  { %v6698_v24 = vpop.f32.mrb[42].mxu0 }
0x1ebb   :  { %v5767_v0 = vpop.f32.mrb[43].mxu0 }
0x1ebc   :  { %v5768_v49 = vadd.f32 %v6054_v56, %v5767_v0 }
0x1ebe   :  { %v5776_v62 = vadd.f32 %v5768_v49, %v5563_v7 }
0x1ec0   :  { %v5782_v50 = vsel %vm335_vm1, %v5776_v62, 0.0 }
0x1ec1   :  { %v5781_v28 = vpop.xlane.xlu1 %5780  ;;  %5783 = vadd.xlane.f32.xlu0 %v5782_v50 }
0x1ec2   :  { %v5785_v1 = vmul.f32 0.03125, %v5781_v28 }
0x1ec4   :  { %v5787_v2 = vsub.f32 %v5775_v60, %v5785_v1 }
0x1ec6   :  { %v5789_v3 = vmul.f32 %v5787_v2, %v5787_v2 }
0x1ec8   :  { %v5791_v25 = vsel %vm335_vm1, %v5789_v3, 0.0 }
0x1ec9   :  { %5792 = vadd.xlane.f32.xlu1 %v5791_v25 }
0x1f4e   :  { %v5784_v37 = vpop.xlane.xlu0 %5783 }
0x1f4f   :  { %v5786_v4 = vmul.f32 0.03125, %v5784_v37 }
0x1f51   :  { %v5788_v5 = vsub.f32 %v5776_v62, %v5786_v4 }
0x1f53   :  { %v5790_v59 = vmul.f32 %v5788_v5, %v5788_v5 }
0x1f55   :  { %v5794_v54 = vsel %vm335_vm1, %v5790_v59, 0.0 }
0x1f56   :  { %5795 = vadd.xlane.f32.xlu0 %v5794_v54  ;;  %v5793_v8 = vpop.xlane.xlu1 %5792 }
0x1f57   :  { %v5797_v22 = vmul.f32 0.03125, %v5793_v8 }
0x1f59   :  { %v5799_v9 = vadd.f32 1e-05, %v5797_v22 }
0x1f5b   :  { %7314 = vrsqrt.f32 %v5799_v9 }
0x1f65   :  { %v7315_v12 = vpop.eup %7314 }
0x1f66   :  { %v5803_v13 = vmul.f32 %v7315_v12, %v5787_v2 }
0x1f68   :  { %v5811_v16 = vmul.f32 %v6059_v15, %v5803_v13 }
0x1f6a   :  { %v5819_v36 = vadd.f32 %v6060_v47, %v5811_v16 }
0x1fe3   :  { %v5796_v6 = vpop.xlane.xlu0 %5795 }
0x1fe4   :  { %v5798_v34 = vmul.f32 0.03125, %v5796_v6 }
0x1fe6   :  { %v5800_v11 = vadd.f32 1e-05, %v5798_v34 }
0x1fe8   :  { %7316 = vrsqrt.f32 %v5800_v11 }
0x1ff2   :  { %v7317_v14 = vpop.eup %7316 }
0x1ff3   :  { %v5804_v10 = vmul.f32 %v7317_v14, %v5788_v5 }
0x1ff5   :  { %v5812_v33 = vmul.f32 %v6059_v15, %v5804_v10 }
0x1ff7   :  { %v5820_v17 = vadd.f32 %v6060_v47, %v5812_v33 }
0x1ff9   :  { %v5822_v18 = vrot.slane %v5820_v17, 7 }
0x1ffb   :  { %v5825_v20 = vsel %vm5824_vm6, %v5819_v36, %v5822_v18 }
0x1ffc   :  { %v5833_v19 = vmul.f32 %v6061_v39, %v5825_v20 }
0x1ffe   :  { %v5835_v29 = vsel %vm5834_vm7, %v5833_v19, 0.0 }
0x1fff   :  { %5836 = vadd.xlane.f32.xlu0 %v5835_v29 }
0x208c   :  { %v5837_v41 = vpop.xlane.xlu0 %5836 }
0x208d   :  { %v5845_v42 = vadd.f32 %v6062_v23, %v5837_v41 }
0x208f   :  { %v5846_v26 = vsub.f32 0.0, %v5845_v42 }
0x2091   :  { %v5847_v48 = vmul.f32 1.442695, %v5846_v26 }
0x2093   :  { %7318 = vpow2.f32 %v5847_v48 }
0x209d   :  { %v7319_v7 = vpop.eup %7318 }
0x209e   :  { %v5849_v27 = vadd.f32 1.0, %v7319_v7 }
0x20a0   :  { %7320 = vrcp.f32 %v5849_v27 }
0x20aa   :  { %v7321_v21 = vpop.eup %7320 }
0x20ab   :  { %5852 = vst.msk [vmem:[%s7806_s4] sm:$0x3] %vm5851_vm8, %v7321_v21 }
0x20ac   :  { %5857 = vsyncpa [#allocation4], 1 }
0x20ad   :  { %5858 = vsyncpa [#allocation6], 1 }
0x20ae   :  { %5859 = vsyncpa [#allocation9], 1 }
0x20af   :  { %5860 = vsyncpa [#allocation12], 1 }
0x20b0   :  { %5861 = vsyncpa [#allocation15], 1 }
0x20b1   :  { %5862 = vsyncpa [#allocation18], 1 }
0x20b2   :  { %5863 = vsyncpa [#allocation21], 1 }

</bundles_post_ra>
